<compile_context>
chip_gen: v7x
topology: tpu7x:2x2x1
jax: 0.10.0
libtpu: 0.0.40
codegen_flags: <defaults>
</compile_context>

<pallas_src>
import jax
import jax.numpy as jnp
from jax import lax
from jax.experimental import pallas as pl
from jax.experimental.pallas import tpu as pltpu


# ---------------------------------------------------------------------------
# Helpers
# ---------------------------------------------------------------------------
def _round_up(x, m):
    return (x + m - 1) // m * m


def _divisors(n):
    return [d for d in range(1, n + 1) if n % d == 0]


def _vmem_budget_bytes():
    """~75% of per-core physical VMEM; conservative 64 MiB (v7x) fallback."""
    cap = 64 * 1024 * 1024
    try:
        info = pltpu.get_tpu_info()
        c = getattr(info, "vmem_capacity_bytes", None)
        if c:
            cap = int(c)
    except Exception:
        pass
    return (cap * 3) // 4   # leave headroom for compiler-internal scratch


def _footprint_bytes(bb, tile_v, S, D, in_sz, out_sz):
    """Double-buffered VMEM footprint of one grid step, with (8,128) padding."""
    d_pad = _round_up(D, 128)
    s_sub = _round_up(S, 8)
    s_lane = _round_up(S, 128)
    w = 2 * tile_v * d_pad * in_sz           # weight tile (dominant)
    h = 2 * bb * s_sub * d_pad * in_sz       # activation tile
    bias = 2 * tile_v * 128 * in_sz          # (tile_v, 1) is lane-padded to 128
    out = 2 * bb * tile_v * s_lane * out_sz  # output tile
    return w + h + bias + out


def _select_tiles(B, S, D, V, in_sz, out_sz, budget):
    """Pick (bb, tile_v): batches packed per step and vocab tile width."""
    divs = _divisors(B)
    if S % 128 == 0:
        # Pack batches so the matmul N dim (= bb*S) reaches >= 256 to fill the
        # 256-wide MXU on v6e/v7x; slices stay lane-aligned since S % 128 == 0.
        bb_pref = next((d for d in divs if d * S >= 256), B)
    else:
        # Decode-style / unaligned S: per-batch matmuls in an unrolled loop;
        # a small bb just amortizes the ~0.35us per-grid-step overhead.
        bb_pref = max(d for d in divs if d <= 8)
    bb_candidates = sorted((d for d in divs if d <= bb_pref), reverse=True)

    # Vocab tile: multiple of 128, capped at 2048 (and at V rounded down to 128
    # so ordinary boundary masking handles a non-multiple-of-128 vocab).
    v_cap = min(2048, max(128, (V // 128) * 128))
    for bb in bb_candidates:
        tv = v_cap
        while tv >= 128:
            if _footprint_bytes(bb, tv, S, D, in_sz, out_sz) <= budget:
                return bb, tv
            tv -= 128
    # TODO(synk): add K-tiling over D (third 'arbitrary' grid axis + f32 VMEM
    # accumulator) for extreme D where even a (1, 128) tile pair exceeds VMEM.
    return 1, 128


# ---------------------------------------------------------------------------
# Kernel
# ---------------------------------------------------------------------------
def _make_decoder_kernel(bb, S, D):
    packed = (S % 128 == 0) and bb > 1

    def kernel(h_ref, w_ref, b_ref, o_ref):
        # h_ref: (bb, S, D)        activations for bb batch rows
        # w_ref: (tile_v, D)       weights in native (V, D) layout
        # b_ref: (tile_v, 1)       bias column
        # o_ref: (bb, tile_v, S)   permuted logits tile (written directly)
        w = w_ref[...]
        bias = b_ref[...]
        if packed:
            # Single matmul with N = bb*S (>= 256): layout-trivial collapse of
            # the leading dims since S is a multiple of the sublane tile.
            hf = h_ref[...].reshape(bb * S, D)
            y = lax.dot_general(
                w, hf,
                dimension_numbers=(((1,), (1,)), ((), ())),   # contract over D
                preferred_element_type=jnp.float32,
            ) + bias
            for i in range(bb):                 # lane-aligned slices (S % 128 == 0)
                o_ref[i] = y[:, i * S:(i + 1) * S].astype(o_ref.dtype)
        else:
            for i in range(bb):
                y = lax.dot_general(
                    w, h_ref[i],
                    dimension_numbers=(((1,), (1,)), ((), ())),
                    preferred_element_type=jnp.float32,
                ) + bias
                o_ref[i] = y.astype(o_ref.dtype)

    return kernel


# ---------------------------------------------------------------------------
# Wrapper
# ---------------------------------------------------------------------------
def decoder_forward(H, W, b):
    """Equivalent of nn.Linear(df, vocab)(H).permute(0, 2, 1).

    H: (B, S, D)   W: (V, D)   b: (V,)   ->   (B, V, S)
    """
    B, S, D = H.shape
    V = W.shape[0]
    assert W.shape == (V, D) and b.shape == (V,)

    in_sz = jnp.dtype(H.dtype).itemsize
    out_sz = in_sz
    budget = _vmem_budget_bytes()
    bb, tile_v = _select_tiles(B, S, D, V, in_sz, out_sz, budget)

    grid = (pl.cdiv(V, tile_v), B // bb)   # vocab OUTER -> each W tile streamed once
    b2 = b.reshape(V, 1)

    cost = pl.CostEstimate(
        flops=2 * B * S * D * V,
        bytes_accessed=(B * S * D + V * D + V + B * S * V) * in_sz,
        transcendentals=0,
    )
    cparams = pltpu.CompilerParams(
        # vocab axis "parallel": megacore (v7x) splits the W stream across TCs;
        # batch axis "arbitrary" so sharding never lands on it (which would
        # double per-TC weight traffic).
        dimension_semantics=("parallel", "arbitrary"),
        vmem_limit_bytes=budget,
    )

    return pl.pallas_call(
        _make_decoder_kernel(bb, S, D),
        out_shape=jax.ShapeDtypeStruct((B, V, S), H.dtype),
        grid_spec=pltpu.PrefetchScalarGridSpec(
            num_scalar_prefetch=0,
            grid=grid,
            in_specs=[
                pl.BlockSpec((bb, S, D), lambda vj, bi: (bi, 0, 0)),   # H block
                pl.BlockSpec((tile_v, D), lambda vj, bi: (vj, 0)),     # W tile (native)
                pl.BlockSpec((tile_v, 1), lambda vj, bi: (vj, 0)),     # bias tile
            ],
            out_specs=pl.BlockSpec((bb, tile_v, S), lambda vj, bi: (bi, vj, 0)),
        ),
        compiler_params=cparams,
        cost_estimate=cost,
    )(H, W, b2)


def init_decoder_params(key, df, vocab_size, dtype=jnp.float32):
    # Deterministic init matching nn.Linear's default U(-1/sqrt(df), 1/sqrt(df)).
    kw, kb = jax.random.split(key)
    bound = 1.0 / (df ** 0.5)
    W = jax.random.uniform(kw, (vocab_size, df), dtype, -bound, bound)
    b = jax.random.uniform(kb, (vocab_size,), dtype, -bound, bound)
    return W, b


if __name__ == "__main__":
    key = jax.random.PRNGKey(0)
    k_h1, k_h2, k_p = jax.random.split(key, 3)

    DF, VOCAB = 512, 1000   # nn.Linear(df=512, vocab_size=1000) module defaults
    W, b = init_decoder_params(k_p, DF, VOCAB)

    fwd = jax.jit(decoder_forward)

    def reference(H):
        y = jnp.einsum("bsd,vd->bsv", H, W, precision=lax.Precision.HIGHEST) + b
        return jnp.transpose(y, (0, 2, 1))

    # --- Case 1: decode-style small S (per-batch path + masked vocab tail) ---
    B, S = 2, 16
    H1 = jax.random.normal(k_h1, (B, S, DF), dtype=jnp.float32)
    out1 = jax.block_until_ready(fwd(H1, W, b))
    assert out1.shape == (B, VOCAB, S), out1.shape
    assert jnp.allclose(out1, reference(H1), atol=2e-3, rtol=2e-3)

    # --- Case 2: S multiple of 128 (packed-MXU path, matmul N = bb*S >= 256) ---
    S2 = 128
    H2 = jax.random.normal(k_h2, (B, S2, DF), dtype=jnp.float32)
    out2 = jax.block_until_ready(fwd(H2, W, b))
    assert out2.shape == (B, VOCAB, S2), out2.shape
    assert jnp.allclose(out2, reference(H2), atol=2e-3, rtol=2e-3)

    print("KERNEL_OK")
</pallas_src>

<mosaic_0001>
module attributes {stable_mosaic.version = 11 : i64} {
  func.func @kernel(%arg0: i32, %arg1: i32, %arg2: memref<2x16x512xf32, #tpu.memory_space<vmem>>, %arg3: memref<896x512xf32, #tpu.memory_space<vmem>>, %arg4: memref<896x1xf32, #tpu.memory_space<vmem>>, %arg5: memref<2x896x16xf32, #tpu.memory_space<vmem>>) attributes {dimension_semantics = [#tpu.dimension_semantics<parallel>, #tpu.dimension_semantics<arbitrary>], iteration_bounds = array<i64: 2, 1>, scalar_prefetch = 0 : i64, scratch_operands = 0 : i64, tpu.core_type = #tpu.core_type<tc>, window_params = [{transform_indices = @transform_0, window_bounds = array<i64: 2, 16, 512>}, {transform_indices = @transform_1, window_bounds = array<i64: 896, 512>}, {transform_indices = @transform_2, window_bounds = array<i64: 896, 1>}, {transform_indices = @transform_3, window_bounds = array<i64: 2, 896, 16>}]} {
    %c0 = arith.constant 0 : index
    %c0_0 = arith.constant 0 : index
    %0 = vector.load %arg3[%c0, %c0_0] : memref<896x512xf32, #tpu.memory_space<vmem>>, vector<896x512xf32>
    %c0_1 = arith.constant 0 : index
    %c0_2 = arith.constant 0 : index
    %1 = vector.load %arg4[%c0_1, %c0_2] : memref<896x1xf32, #tpu.memory_space<vmem>>, vector<896x1xf32>
    %c0_3 = arith.constant 0 : index
    %c0_4 = arith.constant 0 : index
    %c0_5 = arith.constant 0 : index
    %2 = vector.load %arg2[%c0_3, %c0_4, %c0_5] : memref<2x16x512xf32, #tpu.memory_space<vmem>>, vector<1x16x512xf32>
    %3 = vector.shape_cast %2 : vector<1x16x512xf32> to vector<16x512xf32>
    %cst = arith.constant dense<0.000000e+00> : vector<896x16xf32>
    %4 = tpu.matmul %0, %3, %cst {dimension_numbers = #tpu.dot_dimension_numbers<[1], [1], [0], [0], [0, 0, 1, 0], [], []>} : vector<896x512xf32>, vector<16x512xf32>, vector<896x16xf32> -> vector<896x16xf32>
    %5 = vector.broadcast %1 : vector<896x1xf32> to vector<896x16xf32>
    %6 = arith.addf %4, %5 : vector<896x16xf32>
    %c0_6 = arith.constant 0 : index
    %c0_7 = arith.constant 0 : index
    %c0_8 = arith.constant 0 : index
    %7 = vector.load %arg5[%c0_6, %c0_7, %c0_8] : memref<2x896x16xf32, #tpu.memory_space<vmem>>, vector<1x896x16xf32>
    %8 = vector.shape_cast %7 : vector<1x896x16xf32> to vector<896x16xf32>
    %9 = vector.shape_cast %6 : vector<896x16xf32> to vector<1x896x16xf32>
    tpu.vector_store %arg5[%c0_6, %c0_7, %c0_8], %9 {strides = array<i32>} : memref<2x896x16xf32, #tpu.memory_space<vmem>>, vector<1x896x16xf32>,
    %c1 = arith.constant 1 : index
    %c0_9 = arith.constant 0 : index
    %c0_10 = arith.constant 0 : index
    %10 = vector.load %arg2[%c1, %c0_9, %c0_10] : memref<2x16x512xf32, #tpu.memory_space<vmem>>, vector<1x16x512xf32>
    %11 = vector.shape_cast %10 : vector<1x16x512xf32> to vector<16x512xf32>
    %cst_11 = arith.constant dense<0.000000e+00> : vector<896x16xf32>
    %12 = tpu.matmul %0, %11, %cst_11 {dimension_numbers = #tpu.dot_dimension_numbers<[1], [1], [0], [0], [0, 0, 1, 0], [], []>} : vector<896x512xf32>, vector<16x512xf32>, vector<896x16xf32> -> vector<896x16xf32>
    %13 = vector.broadcast %1 : vector<896x1xf32> to vector<896x16xf32>
    %14 = arith.addf %12, %13 : vector<896x16xf32>
    %c1_12 = arith.constant 1 : index
    %c0_13 = arith.constant 0 : index
    %c0_14 = arith.constant 0 : index
    %15 = vector.load %arg5[%c1_12, %c0_13, %c0_14] : memref<2x896x16xf32, #tpu.memory_space<vmem>>, vector<1x896x16xf32>
    %16 = vector.shape_cast %15 : vector<1x896x16xf32> to vector<896x16xf32>
    %17 = vector.shape_cast %14 : vector<896x16xf32> to vector<1x896x16xf32>
    tpu.vector_store %arg5[%c1_12, %c0_13, %c0_14], %17 {strides = array<i32>} : memref<2x896x16xf32, #tpu.memory_space<vmem>>, vector<1x896x16xf32>,
    return
  }
  func.func @transform_0(%arg0: i32, %arg1: i32) -> (i32, i32, i32) {
    %c0_i32 = arith.constant 0 : i32
    %c0_i32_0 = arith.constant 0 : i32
    %c0_i32_1 = arith.constant 0 : i32
    return %arg1, %c0_i32, %c0_i32_0 : i32, i32, i32
  }
  func.func @transform_1(%arg0: i32, %arg1: i32) -> (i32, i32) {
    %c0_i32 = arith.constant 0 : i32
    %c0_i32_0 = arith.constant 0 : i32
    return %arg0, %c0_i32 : i32, i32
  }
  func.func @transform_2(%arg0: i32, %arg1: i32) -> (i32, i32) {
    %c0_i32 = arith.constant 0 : i32
    %c0_i32_0 = arith.constant 0 : i32
    return %arg0, %c0_i32 : i32, i32
  }
  func.func @transform_3(%arg0: i32, %arg1: i32) -> (i32, i32, i32) {
    %c0_i32 = arith.constant 0 : i32
    %c0_i32_0 = arith.constant 0 : i32
    return %arg1, %arg0, %c0_i32 : i32, i32, i32
  }
}

</mosaic_0001>

<bundles_post_ra>
// kernel: decoder_forward.1
= control target key start
LH: loop header
LB: loop body
LE: loop exit
PB: predicated region body
PF: predicated region fallthrough
CT: control target
= control target key end

     0   :  { %8 = vsyncpa [#allocation3], 0  ;;  %s7292_s0 = inlined_call_operand.hbm [shape: f32[2,16,512], index: 0, kind: input, shape index: {}]   ;;  %s7293_s1 = inlined_call_operand.hbm [shape: f32[1000,512], index: 1, kind: input, shape index: {}]   ;;  %s7294_s2 = inlined_call_operand.vmem [shape: f32[1000,1], index: 2, kind: input, shape index: {}]   ;;  %s7295_s3 = inlined_call_operand.vmem [shape: f32[2,1000,16], index: 3, kind: output, shape index: {}]  }
   0x1   :  { %9 = vsyncpa [#allocation5], 0 }
   0x2   :  { %11 = vsyncpa [#allocation5 + $0x1], 0  ;;  %s5845_s12 = smov 0   ;;  %s5847_s13 = smov 0  }
   0x3   :  { %s5849_s14 = smov 0   ;;  %s5851_s15 = smov 0  }
   0x4   :  { %s5853_s16 = smov 0   ;;  %s5855_s17 = smov 0  }
   0x5 LB: > { %s4671_s18 = sadd.s32 4294967295, %s5784_s17   ;;  %s29_s19 = sadd.s32 1, %s5780_s16  ;;  %s5784_s17 = sphi %s5855_s17, %s17_s17   ;;  %s5780_s16 = sphi %s5853_s16, %s7320_s16   ;;  %s5776_s15 = sphi %s5851_s15, %s7319_s15   ;;  %s5772_s14 = sphi %s5849_s14, %s7318_s14   ;;  %s5768_s13 = sphi %s5847_s13, %s7317_s13   ;;  %s5764_s12 = sphi %s5845_s12, %s7316_s12  }
   0x6   : > { %p31_p0 = scmp.ge.s32.totalorder %s29_s19, 2  ;;  %s62_s20 = sadd.s32 1, %s5772_s14 }
   0x7   : > { %p69_p1 = scmp.ne.s32.totalorder %s5772_s14, %s5768_s13  ;;  %p70_p2 = scmp.eq.s32.totalorder %s5784_s17, 0 }
   0x8   : > { %s7322_s19 = smov (%p31_p0, %s29_s19), 0  ;;  %p75_p4 = scmp.ne.s32.totalorder %s5768_s13, %s5764_s12 }
   0x9   : > { %p5881_p3 = por %p70_p2, %p69_p1  ;;  %s59_s22 = ssub.s32 %s5780_s16, %s7322_s19 }
   0xa   : > { %p5888_p5 = scmp.eq.s32.totalorder %s4671_s18, 0  ;;  %p60_p6 = scmp.eq.s32.totalorder %s59_s22, 0 }
   0xb   : > { %s7300_s21 = scalar_select %p5881_p3, 1, 0 }
   0xc   : > { %s7301_s23 = scalar_select %p5888_p5, 1, 0 }
   0xd   : > { %p127_p7 = scmp.eq.s32.totalorder %s4671_s18, 1  ;;  %p5894_p8 = por %p5888_p5, %p75_p4 }
   0xe   : > { %p4673_p9 = scmp.ge.s32.totalorder %s5784_s17, 1  ;;  %p140_p11 = scmp.lt.s32.totalorder %s5784_s17, 3 }
   0xf   : > { %s7302_s24 = scalar_select %p5894_p8, 1, 0 }
  0x10   : > { %s5900_s25 = scalar_select %p60_p6, %s5772_s14, %s62_s20  }
  0x11   : > { %p5902_p10 = por %p127_p7, %p69_p1  ;;  %p5907_p12 = pnand %p4673_p9, %p140_p11 }
  0x12   : > { %s5818_s28 = smov [#allocation2]   ;;  %s5642_s6 = scalar_lea.hbm %s7292_s0, 2048 }
  0x13   : > { %s7303_s26 = scalar_select %p5902_p10, 1, 0 }
  0x14   : > { %s7304_s27 = scalar_select %p5907_p12, 1, 0 }
  0x15   : > { %s156_s29 = sshll.u32 %s5818_s28, 4  ;;  %p5516_p13 = pneg %p5907_p12  ;;  %s157_s29 = int_to_ptr.vmem [resolvable:$true] %s156_s29 }
  0x16   : > { %p5643_p1 = scmp.ne.s32.totalorder %s7292_s0, %s5642_s6  ;;  %p5649_p7 = scmp.lt.u32.totalorder %s5642_s6, %s7292_s0 }
  0x17   : > { %p5915_p0 = pnand %p5516_p13, %p5888_p5 }
  0x19   : > { %p5644_p2 = pneg %p5915_p0 }
  0x1b   : > { %p5645_p4 = pnand %p5644_p2, %p5643_p1 }
  0x1d   : > { %p5646_p6 = pneg %p5645_p4 }
  0x1f   : > { %p5651_p9 = pnand %p5649_p7, %p5646_p6 }
  0x21   : > { %5654 = shalt.err (!%p5651_p9)
}
  0x22   : > { %s5655_s11 = scalar_lea.vmem %s157_s29, 2048  ;;  %p5663_p8 = scmp.lt.s32.totalorder %s157_s29, %s157_s29 }
  0x23   : > { %p5656_p11 = scmp.ne.s32.totalorder %s157_s29, %s5655_s11  ;;  %p5664_p5 = scmp.lt.s32.totalorder %s5655_s11, %s5655_s11 }
  0x25   : > { %p5658_p13 = pnand %p5656_p11, %p5644_p2  ;;  %p5665_p12 = por %p5664_p5, %p5663_p8 }
  0x27   : > { %p5659_p10 = pneg %p5658_p13 }
  0x29   : > { %p5666_p3 = pnand %p5665_p12, %p5659_p10 }
  0x2b   : > { %5669 = shalt.err (!%p5666_p3)
}
  0x2c   : > { %s5819_s12 = smov 512   ;;  %s5820_s18 = smov 32  }
  0x2d   : > { %5519 = dma.hbm_to_vmem [thread:$0]  (!%p5915_p0), %s7292_s0, 2048, %s157_s29, [#allocation3], %s5819_s12, %s5819_s12, %s5820_s18  }
  0x2e   : > { %p4675_p1 = scmp.ge.s32.totalorder %s5784_s17, 2 }
  0x2f   : > { %p7306_p4 = scmp.ne.s32.totalorder (!%p4675_p1), %s7300_s21, 0 }
  0x30   : > { %166 = sbr.rel (%p4675_p1) target bundleno = 90 (0x5a), region = 20 }
  0x37   : > { %169 = sbr.rel (!%p7306_p4) target bundleno = 90 (0x5a), region = 24  ;;  %s170_s28 = sand.u32 (%p7306_p4), 1, %s5772_s14  }
  0x38   : > { %s175_s4 = smul.u32 (%p7306_p4), 112, %s5780_s16  ;;  %s5943_s8 = scalar_lea.sflag (%p7306_p4), [#allocation5], %s170_s28 }
  0x39   : > { %s5508_s5 = smul.u32 (%p7306_p4), 3584, %s170_s28 }
  0x3a   : > { %s176_s6 = ssub.s32 (%p7306_p4), 125, %s175_s4 }
  0x3b   : > { %p177_p3 = scmp.lt.s32.totalorder (%p7306_p4), %s176_s6, 112  ;;  %s174_s29 = scalar_lea.vmem (%p7306_p4), [#allocation4], %s5508_s5 }
  0x3e   : > { %s7324_s6 = smov (!%p177_p3, %s176_s6), 112 }
  0x3f   : > { %s5940_s7 = sshll.u32 %s7324_s6, 9 }
  0x40   : > { %s182_s30 = ssub.s32 57344, %s5940_s7 }
  0x41   : > { %183 = vsyncadd %s5943_s8, %s182_s30  ;;  %p4678_p5 = scmp.ne.s32.totalorder %s5940_s7, 0  ;;  %s4819_s21 = smul.u32 57344, %s5780_s16 }
  0x42   : > { %s189_s9 = sshll.u32 %s174_s29, 4  ;;  %s5674_s28 = scalar_lea.hbm %s7293_s1, 64000  ;;  %s5953_s9 = int_to_ptr.vmem [resolvable:$true] %s189_s9 }
  0x43   : > { %s5951_s12 = scalar_lea.hbm %s7293_s1, %s4819_s21 }
  0x44   : > { %s5670_s18 = scalar_lea.hbm %s5951_s12, %s5940_s7  ;;  %p5675_p0 = scmp.lt.u32.totalorder %s5951_s12, %s7293_s1 }
  0x45   : > { %p5671_p8 = scmp.ne.s32.totalorder %s5951_s12, %s5670_s18  ;;  %p5676_p2 = scmp.lt.u32.totalorder %s5674_s28, %s5670_s18 }
  0x46   : > { %p5678_p7 = scmp.lt.u32.totalorder %s5670_s18, %s5951_s12 }
  0x47   : > { %p5672_p10 = pnand %p5671_p8, %p4678_p5  ;;  %p5677_p6 = por %p5676_p2, %p5675_p0 }
  0x49   : > { %p5673_p12 = pneg %p5672_p10  ;;  %p5679_p9 = por %p5678_p7, %p5677_p6 }
  0x4b   : > { %p5680_p11 = pnand %p5679_p9, %p5673_p12 }
  0x4d   : > { %5683 = shalt.err (!%p5680_p11)
}
  0x4e   : > { %s5684_s6 = scalar_lea.vmem %s5953_s9, %s5940_s7  ;;  %s5821_s30 = smov [#allocation4]  }
  0x4f   : > { %p5685_p13 = scmp.ne.s32.totalorder %s5953_s9, %s5684_s6  ;;  %s5688_s29 = sshll.u32 %s5821_s30, 4  ;;  %s5689_s29 = int_to_ptr.vmem [resolvable:$false] %s5688_s29 }
  0x50   : > { %s5690_s21 = scalar_lea.vmem %s5689_s29, 114688  ;;  %p5691_p3 = scmp.lt.s32.totalorder %s5953_s9, %s5689_s29 }
  0x51   : > { %p5686_p1 = pnand %p5685_p13, %p4678_p5  ;;  %p5692_p8 = scmp.lt.s32.totalorder %s5690_s21, %s5684_s6 }
  0x53   : > { %p5687_p4 = pneg %p5686_p1  ;;  %p5693_p10 = por %p5692_p8, %p5691_p3 }
  0x55   : > { %p5694_p0 = pnand %p5693_p10, %p5687_p4 }
  0x57   : > { %5697 = shalt.err (!%p5694_p0)
}
  0x58   : > { %s5822_s10 = smov 512   ;;  %s5823_s11 = smov 32  }
  0x59   : > { %195 = dma.hbm_to_vmem [thread:$0]  (%p4678_p5), %s5951_s12, %s5940_s7, %s5953_s9, %s5943_s8, %s5822_s10, %s5822_s10, %s5823_s11  }
  0x5a PF: > { %p7307_p12 = scmp.ne.s32.totalorder %s7304_s27, 0 }
  0x5b   : > { %p7308_p2 = scmp.ne.s32.totalorder (!%p7307_p12), %s7301_s23, 0 }
  0x5c   : > { %218 = sbr.rel (%p7307_p12) target bundleno = 1298 (0x512), region = 32 }
  0x63   : > { %5755 = dma.done.wait (%p7308_p2), [#allocation3], 2048  }
  0x64   : > { %5757 = vsyncadd (%p7308_p2), [#allocation3], 4294965248  ;;  %s5987_s18 = sand.u32 1, %s5768_s13   ;;  %p7309_p5 = scmp.ne.s32.totalorder %s7302_s24, 0 }
  0x65   : > { %s5509_s20 = smul.u32 3584, %s5987_s18  ;;  %s225_s22 = scalar_lea.sflag [#allocation5], %s5987_s18 }
  0x67   : > { %s5991_s7 = scalar_lea.vmem [#allocation4], %s5509_s20 }
  0x68   : > { %5759 = dma.done.wait (%p7309_p5), %s225_s22, 57344  }
  0x69   : > { %5761 = vsyncadd (%p7309_p5), %s225_s22, 4294909952  ;;  %v847_v0 = vld [vmem:[#allocation2 + $0x8] sm:$0xff]  ;;  %v846_v5 = vld [vmem:[#allocation2] sm:$0xff]  ;;  %s6199_s23 = smul.u32 112, %s5776_s15  ;;  %vm2664_vm0 = vcmask 130048   ;;  %p7310_p7 = scmp.ne.s32.totalorder %s7303_s26, 0 }
  0x6a   : > { %v851_v1 = vld [vmem:[#allocation2 + $0x28] sm:$0xff]  ;;  %v850_v6 = vld [vmem:[#allocation2 + $0x20] sm:$0xff]  ;;  %v849_v13 = vld [vmem:[#allocation2 + $0x18] sm:$0xff]  ;;  %s5510_s28 = smul.u32 1792, %s5987_s18 }
  0x6b   : > { %v2779_v2 = vld [vmem:[#allocation2 + $0x48] sm:$0xff]  ;;  %v4820_v3 = vpack.c.bf16 %v851_v1, %v847_v0  ;;  %v4822_v8 = vpack.c.bf16 %v850_v6, %v846_v5  ;;  %v2778_v9 = vld [vmem:[#allocation2 + $0x40] sm:$0xff]  ;;  %v853_v14 = vld [vmem:[#allocation2 + $0x38] sm:$0xff]  ;;  %p271_p6 = scmp.lt.s32.totalorder %s6199_s23, 124  ;;  %s4158_s5 = ssub.s32 (%p7310_p7), 125, %s6199_s23 }
  0x6c   : > { %v2783_v4 = vld [vmem:[#allocation2 + $0x68] sm:$0xff]  ;;  %v2782_v10 = vld [vmem:[#allocation2 + $0x60] sm:$0xff]  ;;  %v4824_v15 = vpack.c.bf16 %v853_v14, %v849_v13  ;;  %v2781_v16 = vld [vmem:[#allocation2 + $0x58] sm:$0xff]  ;;  %s6484_s4 = scalar_lea.vmem [#allocation6], %s5510_s28   ;;  %s4816_s6 = smul.u32 (%p7310_p7), 896, %s5776_s15 }
  0x6d   : > { %v4828_v7 = vpack.c.bf16 %v2783_v4, %v2779_v2  ;;  %v287_v11 = vld [vmem:[%s5991_s7 + $0x8] sm:$0xff]  ;;  %4821 = vmatprep.subr.bf16.mxu0 %v4820_v3  ;;  %v4830_v12 = vpack.c.bf16 %v2782_v10, %v2778_v9  ;;  %v2785_v17 = vld [vmem:[#allocation2 + $0x78] sm:$0xff]  ;;  %v848_v19 = vld [vmem:[#allocation2 + $0x10] sm:$0xff]  ;;  %s272_s24 = scalar_select %p271_p6, %s6199_s23, 124 }
  0x6e   : > { %1478 = vmatprep.mubr.f32.mxu0 %v287_v11  ;;  %4823 = vmatpush1.bf16.xpose.msra.mxu0 %v4822_v8  ;;  %v4832_v18 = vpack.c.bf16 %v2785_v17, %v2781_v16  ;;  %v852_v20 = vld [vmem:[#allocation2 + $0x30] sm:$0xff]  ;;  %v286_v23 = vld [vmem:[%s5991_s7] sm:$0xff]  ;;  %v291_v26 = vld [vmem:[%s5991_s7 + $0x28] sm:$0xff]  ;;  %p4159_p9 = scmp.lt.s32.totalorder (%p7310_p7), %s4158_s5, 112  ;;  %s7081_s21 = scalar_lea.vmem (%p7310_p7), %s7295_s3, %s4816_s6  }
  0x6f   : > { %4829 = vmatprep.subr.bf16.mxu1 %v4828_v7  ;;  %2850 = vmatprep.mubr.f32.mxu1 %v287_v11  ;;  %v2780_v21 = vld [vmem:[#allocation2 + $0x50] sm:$0xff]  ;;  %v4826_v24 = vpack.c.bf16 %v852_v20, %v848_v19  ;;  %v290_v27 = vld [vmem:[%s5991_s7 + $0x20] sm:$0xff]  ;;  %v295_v28 = vld [vmem:[%s5991_s7 + $0x48] sm:$0xff]  ;;  %s4685_s27 = sshll.u32 %s272_s24, 3 }
  0x70   : > { %4831 = vmatpush1.bf16.xpose.msra.mxu1 %v4830_v12  ;;  %4825 = vmatprep.subr.bf16.mxu0 %v4824_v15  ;;  %v2784_v22 = vld [vmem:[#allocation2 + $0x70] sm:$0xff]  ;;  %v294_v29 = vld [vmem:[%s5991_s7 + $0x40] sm:$0xff]  ;;  %v299_v30 = vld [vmem:[%s5991_s7 + $0x68] sm:$0xff]  ;;  %s6210_s12 = scalar_lea.vmem %s7294_s2, %s4685_s27 }
  0x71   : > { %4833 = vmatprep.subr.bf16.mxu1 %v4832_v18  ;;  %v4834_v25 = vpack.c.bf16 %v2784_v22, %v2780_v21  ;;  %v298_v31 = vld [vmem:[%s5991_s7 + $0x60] sm:$0xff]  ;;  %v303_v32 = vld [vmem:[%s5991_s7 + $0x88] sm:$0xff] }
  0x72   : > { %v302_v33 = vld [vmem:[%s5991_s7 + $0x80] sm:$0xff]  ;;  %v307_v34 = vld [vmem:[%s5991_s7 + $0xa8] sm:$0xff] }
  0x73   : > { %v306_v35 = vld [vmem:[%s5991_s7 + $0xa0] sm:$0xff]  ;;  %v311_v36 = vld [vmem:[%s5991_s7 + $0xc8] sm:$0xff] }
  0x74   : > { %v310_v37 = vld [vmem:[%s5991_s7 + $0xc0] sm:$0xff]  ;;  %v315_v38 = vld [vmem:[%s5991_s7 + $0xe8] sm:$0xff] }
  0x75   : > { %1479 = vmatmul.mubr.f32.vlgmr.msra.gmra.mrb[0].mxu0 %v286_v23  ;;  %v314_v39 = vld [vmem:[%s5991_s7 + $0xe0] sm:$0xff]  ;;  %v319_v40 = vld [vmem:[%s5991_s7 + $0x108] sm:$0xff] }
  0x76   : > { %4827 = vmatpush1.bf16.xpose.msra.mxu0 %v4826_v24  ;;  %1483 = vmatprep.mubr.f32.mxu0 %v291_v26  ;;  %v318_v41 = vld [vmem:[%s5991_s7 + $0x100] sm:$0xff]  ;;  %v323_v42 = vld [vmem:[%s5991_s7 + $0x128] sm:$0xff] }
  0x77   : > { %2851 = vmatmul.mubr.f32.vlgmr.msra.gmra.mrb[0].mxu1 %v286_v23  ;;  %v322_v43 = vld [vmem:[%s5991_s7 + $0x120] sm:$0xff]  ;;  %v327_v44 = vld [vmem:[%s5991_s7 + $0x148] sm:$0xff] }
  0x78   : > { %4835 = vmatpush1.bf16.xpose.msra.mxu1 %v4834_v25  ;;  %2855 = vmatprep.mubr.f32.mxu1 %v291_v26  ;;  %v326_v45 = vld [vmem:[%s5991_s7 + $0x140] sm:$0xff]  ;;  %v331_v46 = vld [vmem:[%s5991_s7 + $0x168] sm:$0xff] }
  0x79   : > { %1484 = vmatmul.mubr.f32.gmra.mrb[2].mxu0 %v290_v27  ;;  %v330_v47 = vld [vmem:[%s5991_s7 + $0x160] sm:$0xff]  ;;  %v335_v48 = vld [vmem:[%s5991_s7 + $0x188] sm:$0xff] }
  0x7a   : > { %1488 = vmatprep.mubr.f32.mxu0 %v295_v28  ;;  %v334_v49 = vld [vmem:[%s5991_s7 + $0x180] sm:$0xff]  ;;  %v339_v50 = vld [vmem:[%s5991_s7 + $0x1a8] sm:$0xff] }
  0x7b   : > { %2856 = vmatmul.mubr.f32.gmra.mrb[2].mxu1 %v290_v27  ;;  %v338_v51 = vld [vmem:[%s5991_s7 + $0x1a0] sm:$0xff]  ;;  %v343_v52 = vld [vmem:[%s5991_s7 + $0x1c8] sm:$0xff] }
  0x7c   : > { %2860 = vmatprep.mubr.f32.mxu1 %v295_v28  ;;  %v342_v53 = vld [vmem:[%s5991_s7 + $0x1c0] sm:$0xff]  ;;  %v347_v54 = vld [vmem:[%s5991_s7 + $0x1e8] sm:$0xff] }
  0x7d   : > { %1489 = vmatmul.mubr.f32.gmra.mrb[4].mxu0 %v294_v29  ;;  %v346_v55 = vld [vmem:[%s5991_s7 + $0x1e0] sm:$0xff]  ;;  %v351_v56 = vld [vmem:[%s5991_s7 + $0x208] sm:$0xff] }
  0x7e   : > { %1493 = vmatprep.mubr.f32.mxu0 %v299_v30  ;;  %v350_v57 = vld [vmem:[%s5991_s7 + $0x200] sm:$0xff]  ;;  %v355_v58 = vld [vmem:[%s5991_s7 + $0x228] sm:$0xff] }
  0x7f   : > { %2861 = vmatmul.mubr.f32.gmra.mrb[4].mxu1 %v294_v29  ;;  %v354_v59 = vld [vmem:[%s5991_s7 + $0x220] sm:$0xff]  ;;  %v359_v60 = vld [vmem:[%s5991_s7 + $0x248] sm:$0xff] }
  0x80   : > { %2865 = vmatprep.mubr.f32.mxu1 %v299_v30  ;;  %v358_v61 = vld [vmem:[%s5991_s7 + $0x240] sm:$0xff]  ;;  %v363_v62 = vld [vmem:[%s5991_s7 + $0x268] sm:$0xff] }
  0x81   : > { %1494 = vmatmul.mubr.f32.gmra.mrb[6].mxu0 %v298_v31  ;;  %v362_v63 = vld [vmem:[%s5991_s7 + $0x260] sm:$0xff]  ;;  %v367_v0 = vld [vmem:[%s5991_s7 + $0x288] sm:$0xff] }
  0x82   : > { %1498 = vmatprep.mubr.f32.mxu0 %v303_v32  ;;  %v366_v1 = vld [vmem:[%s5991_s7 + $0x280] sm:$0xff]  ;;  %v371_v2 = vld [vmem:[%s5991_s7 + $0x2a8] sm:$0xff] }
  0x83   : > { %2866 = vmatmul.mubr.f32.gmra.mrb[6].mxu1 %v298_v31  ;;  %v370_v3 = vld [vmem:[%s5991_s7 + $0x2a0] sm:$0xff]  ;;  %v375_v4 = vld [vmem:[%s5991_s7 + $0x2c8] sm:$0xff] }
  0x84   : > { %2870 = vmatprep.mubr.f32.mxu1 %v303_v32  ;;  %v374_v5 = vld [vmem:[%s5991_s7 + $0x2c0] sm:$0xff]  ;;  %v379_v6 = vld [vmem:[%s5991_s7 + $0x2e8] sm:$0xff] }
  0x85   : > { %1499 = vmatmul.mubr.f32.gmra.mrb[8].mxu0 %v302_v33  ;;  %v378_v7 = vld [vmem:[%s5991_s7 + $0x2e0] sm:$0xff]  ;;  %v383_v8 = vld [vmem:[%s5991_s7 + $0x308] sm:$0xff] }
  0x86   : > { %1503 = vmatprep.mubr.f32.mxu0 %v307_v34  ;;  %v382_v9 = vld [vmem:[%s5991_s7 + $0x300] sm:$0xff]  ;;  %v387_v10 = vld [vmem:[%s5991_s7 + $0x328] sm:$0xff] }
  0x87   : > { %2871 = vmatmul.mubr.f32.gmra.mrb[8].mxu1 %v302_v33  ;;  %v386_v11 = vld [vmem:[%s5991_s7 + $0x320] sm:$0xff]  ;;  %v391_v12 = vld [vmem:[%s5991_s7 + $0x348] sm:$0xff] }
  0x88   : > { %2875 = vmatprep.mubr.f32.mxu1 %v307_v34  ;;  %v390_v13 = vld [vmem:[%s5991_s7 + $0x340] sm:$0xff]  ;;  %v395_v14 = vld [vmem:[%s5991_s7 + $0x368] sm:$0xff] }
  0x89   : > { %1504 = vmatmul.mubr.f32.gmra.mrb[10].mxu0 %v306_v35  ;;  %v394_v15 = vld [vmem:[%s5991_s7 + $0x360] sm:$0xff]  ;;  %v399_v16 = vld [vmem:[%s5991_s7 + $0x388] sm:$0xff] }
  0x8a   : > { %1508 = vmatprep.mubr.f32.mxu0 %v311_v36  ;;  %v398_v17 = vld [vmem:[%s5991_s7 + $0x380] sm:$0xff]  ;;  %v403_v18 = vld [vmem:[%s5991_s7 + $0x3a8] sm:$0xff] }
  0x8b   : > { %2876 = vmatmul.mubr.f32.gmra.mrb[10].mxu1 %v306_v35  ;;  %v402_v19 = vld [vmem:[%s5991_s7 + $0x3a0] sm:$0xff]  ;;  %v407_v20 = vld [vmem:[%s5991_s7 + $0x3c8] sm:$0xff] }
  0x8c   : > { %2880 = vmatprep.mubr.f32.mxu1 %v311_v36  ;;  %v406_v21 = vld [vmem:[%s5991_s7 + $0x3c0] sm:$0xff]  ;;  %v411_v22 = vld [vmem:[%s5991_s7 + $0x3e8] sm:$0xff] }
  0x8d   : > { %1509 = vmatmul.mubr.f32.gmra.mrb[12].mxu0 %v310_v37  ;;  %v410_v23 = vld [vmem:[%s5991_s7 + $0x3e0] sm:$0xff]  ;;  %v415_v24 = vld [vmem:[%s5991_s7 + $0x408] sm:$0xff] }
  0x8e   : > { %1513 = vmatprep.mubr.f32.mxu0 %v315_v38  ;;  %v414_v25 = vld [vmem:[%s5991_s7 + $0x400] sm:$0xff]  ;;  %v419_v26 = vld [vmem:[%s5991_s7 + $0x428] sm:$0xff] }
  0x8f   : > { %2881 = vmatmul.mubr.f32.gmra.mrb[12].mxu1 %v310_v37  ;;  %v418_v27 = vld [vmem:[%s5991_s7 + $0x420] sm:$0xff]  ;;  %v423_v28 = vld [vmem:[%s5991_s7 + $0x448] sm:$0xff] }
  0x90   : > { %2885 = vmatprep.mubr.f32.mxu1 %v315_v38  ;;  %v422_v29 = vld [vmem:[%s5991_s7 + $0x440] sm:$0xff]  ;;  %v427_v30 = vld [vmem:[%s5991_s7 + $0x468] sm:$0xff] }
  0x91   : > { %1514 = vmatmul.mubr.f32.gmra.mrb[14].mxu0 %v314_v39  ;;  %v426_v31 = vld [vmem:[%s5991_s7 + $0x460] sm:$0xff]  ;;  %v431_v32 = vld [vmem:[%s5991_s7 + $0x488] sm:$0xff] }
  0x92   : > { %1518 = vmatprep.mubr.f32.mxu0 %v319_v40  ;;  %v430_v33 = vld [vmem:[%s5991_s7 + $0x480] sm:$0xff]  ;;  %v435_v34 = vld [vmem:[%s5991_s7 + $0x4a8] sm:$0xff] }
  0x93   : > { %2886 = vmatmul.mubr.f32.gmra.mrb[14].mxu1 %v314_v39  ;;  %v434_v35 = vld [vmem:[%s5991_s7 + $0x4a0] sm:$0xff]  ;;  %v439_v36 = vld [vmem:[%s5991_s7 + $0x4c8] sm:$0xff] }
  0x94   : > { %2890 = vmatprep.mubr.f32.mxu1 %v319_v40  ;;  %v438_v37 = vld [vmem:[%s5991_s7 + $0x4c0] sm:$0xff]  ;;  %v443_v38 = vld [vmem:[%s5991_s7 + $0x4e8] sm:$0xff] }
  0x95   : > { %1519 = vmatmul.mubr.f32.gmra.mrb[16].mxu0 %v318_v41  ;;  %v442_v39 = vld [vmem:[%s5991_s7 + $0x4e0] sm:$0xff]  ;;  %v447_v40 = vld [vmem:[%s5991_s7 + $0x508] sm:$0xff] }
  0x96   : > { %1523 = vmatprep.mubr.f32.mxu0 %v323_v42 }
  0x97   : > { %2891 = vmatmul.mubr.f32.gmra.mrb[16].mxu1 %v318_v41  ;;  %v446_v41 = vld [vmem:[%s5991_s7 + $0x500] sm:$0xff] }
  0x98   : > { %2895 = vmatprep.mubr.f32.mxu1 %v323_v42  ;;  %v451_v42 = vld [vmem:[%s5991_s7 + $0x528] sm:$0xff] }
  0x99   : > { %1524 = vmatmul.mubr.f32.gmra.mrb[18].mxu0 %v322_v43 }
  0x9a   : > { %1528 = vmatprep.mubr.f32.mxu0 %v327_v44 }
  0x9b   : > { %2896 = vmatmul.mubr.f32.gmra.mrb[18].mxu1 %v322_v43  ;;  %v450_v43 = vld [vmem:[%s5991_s7 + $0x520] sm:$0xff] }
  0x9c   : > { %2900 = vmatprep.mubr.f32.mxu1 %v327_v44  ;;  %v455_v44 = vld [vmem:[%s5991_s7 + $0x548] sm:$0xff] }
  0x9d   : > { %1529 = vmatmul.mubr.f32.gmra.mrb[20].mxu0 %v326_v45 }
  0x9e   : > { %1533 = vmatprep.mubr.f32.mxu0 %v331_v46 }
  0x9f   : > { %2901 = vmatmul.mubr.f32.gmra.mrb[20].mxu1 %v326_v45  ;;  %v454_v45 = vld [vmem:[%s5991_s7 + $0x540] sm:$0xff] }
  0xa0   : > { %2905 = vmatprep.mubr.f32.mxu1 %v331_v46  ;;  %v459_v46 = vld [vmem:[%s5991_s7 + $0x568] sm:$0xff] }
  0xa1   : > { %1534 = vmatmul.mubr.f32.gmra.mrb[22].mxu0 %v330_v47 }
  0xa2   : > { %1538 = vmatprep.mubr.f32.mxu0 %v335_v48 }
  0xa3   : > { %2906 = vmatmul.mubr.f32.gmra.mrb[22].mxu1 %v330_v47  ;;  %v458_v47 = vld [vmem:[%s5991_s7 + $0x560] sm:$0xff] }
  0xa4   : > { %2910 = vmatprep.mubr.f32.mxu1 %v335_v48  ;;  %v463_v48 = vld [vmem:[%s5991_s7 + $0x588] sm:$0xff] }
  0xa5   : > { %1539 = vmatmul.mubr.f32.gmra.mrb[24].mxu0 %v334_v49 }
  0xa6   : > { %1543 = vmatprep.mubr.f32.mxu0 %v339_v50 }
  0xa7   : > { %2911 = vmatmul.mubr.f32.gmra.mrb[24].mxu1 %v334_v49  ;;  %v462_v49 = vld [vmem:[%s5991_s7 + $0x580] sm:$0xff] }
  0xa8   : > { %2915 = vmatprep.mubr.f32.mxu1 %v339_v50  ;;  %v467_v50 = vld [vmem:[%s5991_s7 + $0x5a8] sm:$0xff] }
  0xa9   : > { %1544 = vmatmul.mubr.f32.gmra.mrb[26].mxu0 %v338_v51 }
  0xaa   : > { %1548 = vmatprep.mubr.f32.mxu0 %v343_v52 }
  0xab   : > { %2916 = vmatmul.mubr.f32.gmra.mrb[26].mxu1 %v338_v51  ;;  %v466_v51 = vld [vmem:[%s5991_s7 + $0x5a0] sm:$0xff] }
  0xac   : > { %2920 = vmatprep.mubr.f32.mxu1 %v343_v52  ;;  %v471_v52 = vld [vmem:[%s5991_s7 + $0x5c8] sm:$0xff] }
  0xad   : > { %1549 = vmatmul.mubr.f32.gmra.mrb[28].mxu0 %v342_v53 }
  0xae   : > { %1553 = vmatprep.mubr.f32.mxu0 %v347_v54 }
  0xaf   : > { %2921 = vmatmul.mubr.f32.gmra.mrb[28].mxu1 %v342_v53  ;;  %v470_v53 = vld [vmem:[%s5991_s7 + $0x5c0] sm:$0xff] }
  0xb0   : > { %2925 = vmatprep.mubr.f32.mxu1 %v347_v54  ;;  %v475_v54 = vld [vmem:[%s5991_s7 + $0x5e8] sm:$0xff] }
  0xb1   : > { %1554 = vmatmul.mubr.f32.gmra.mrb[30].mxu0 %v346_v55 }
  0xb2   : > { %1558 = vmatprep.mubr.f32.mxu0 %v351_v56 }
  0xb3   : > { %2926 = vmatmul.mubr.f32.gmra.mrb[30].mxu1 %v346_v55  ;;  %v474_v55 = vld [vmem:[%s5991_s7 + $0x5e0] sm:$0xff] }
  0xb4   : > { %2930 = vmatprep.mubr.f32.mxu1 %v351_v56  ;;  %v479_v56 = vld [vmem:[%s5991_s7 + $0x608] sm:$0xff] }
  0xb5   : > { %1559 = vmatmul.mubr.f32.gmra.mrb[32].mxu0 %v350_v57 }
  0xb6   : > { %1563 = vmatprep.mubr.f32.mxu0 %v355_v58 }
  0xb7   : > { %2931 = vmatmul.mubr.f32.gmra.mrb[32].mxu1 %v350_v57  ;;  %v478_v57 = vld [vmem:[%s5991_s7 + $0x600] sm:$0xff] }
  0xb8   : > { %2935 = vmatprep.mubr.f32.mxu1 %v355_v58  ;;  %v483_v58 = vld [vmem:[%s5991_s7 + $0x628] sm:$0xff] }
  0xb9   : > { %1564 = vmatmul.mubr.f32.gmra.mrb[34].mxu0 %v354_v59 }
  0xba   : > { %1568 = vmatprep.mubr.f32.mxu0 %v359_v60 }
  0xbb   : > { %2936 = vmatmul.mubr.f32.gmra.mrb[34].mxu1 %v354_v59  ;;  %v482_v59 = vld [vmem:[%s5991_s7 + $0x620] sm:$0xff] }
  0xbc   : > { %2940 = vmatprep.mubr.f32.mxu1 %v359_v60  ;;  %v487_v60 = vld [vmem:[%s5991_s7 + $0x648] sm:$0xff] }
  0xbd   : > { %1569 = vmatmul.mubr.f32.gmra.mrb[36].mxu0 %v358_v61 }
  0xbe   : > { %1573 = vmatprep.mubr.f32.mxu0 %v363_v62 }
  0xbf   : > { %2941 = vmatmul.mubr.f32.gmra.mrb[36].mxu1 %v358_v61  ;;  %v486_v61 = vld [vmem:[%s5991_s7 + $0x640] sm:$0xff] }
  0xc0   : > { %2945 = vmatprep.mubr.f32.mxu1 %v363_v62  ;;  %v491_v62 = vld [vmem:[%s5991_s7 + $0x668] sm:$0xff] }
  0xc1   : > { %1574 = vmatmul.mubr.f32.gmra.mrb[38].mxu0 %v362_v63 }
  0xc2   : > { %1578 = vmatprep.mubr.f32.mxu0 %v367_v0 }
  0xc3   : > { %2946 = vmatmul.mubr.f32.gmra.mrb[38].mxu1 %v362_v63  ;;  %v490_v63 = vld [vmem:[%s5991_s7 + $0x660] sm:$0xff] }
  0xc4   : > { %2950 = vmatprep.mubr.f32.mxu1 %v367_v0  ;;  %v495_v0 = vld [vmem:[%s5991_s7 + $0x688] sm:$0xff] }
  0xc5   : > { %1579 = vmatmul.mubr.f32.gmra.mrb[40].mxu0 %v366_v1 }
  0xc6   : > { %1583 = vmatprep.mubr.f32.mxu0 %v371_v2 }
  0xc7   : > { %2951 = vmatmul.mubr.f32.gmra.mrb[40].mxu1 %v366_v1  ;;  %v494_v1 = vld [vmem:[%s5991_s7 + $0x680] sm:$0xff] }
  0xc8   : > { %2955 = vmatprep.mubr.f32.mxu1 %v371_v2  ;;  %v499_v2 = vld [vmem:[%s5991_s7 + $0x6a8] sm:$0xff] }
  0xc9   : > { %1584 = vmatmul.mubr.f32.gmra.mrb[42].mxu0 %v370_v3 }
  0xca   : > { %1588 = vmatprep.mubr.f32.mxu0 %v375_v4 }
  0xcb   : > { %2956 = vmatmul.mubr.f32.gmra.mrb[42].mxu1 %v370_v3  ;;  %v498_v3 = vld [vmem:[%s5991_s7 + $0x6a0] sm:$0xff] }
  0xcc   : > { %2960 = vmatprep.mubr.f32.mxu1 %v375_v4  ;;  %v503_v4 = vld [vmem:[%s5991_s7 + $0x6c8] sm:$0xff] }
  0xcd   : > { %1589 = vmatmul.mubr.f32.gmra.mrb[44].mxu0 %v374_v5 }
  0xce   : > { %1593 = vmatprep.mubr.f32.mxu0 %v379_v6 }
  0xcf   : > { %2961 = vmatmul.mubr.f32.gmra.mrb[44].mxu1 %v374_v5  ;;  %v502_v5 = vld [vmem:[%s5991_s7 + $0x6c0] sm:$0xff] }
  0xd0   : > { %2965 = vmatprep.mubr.f32.mxu1 %v379_v6  ;;  %v507_v6 = vld [vmem:[%s5991_s7 + $0x6e8] sm:$0xff] }
  0xd1   : > { %1594 = vmatmul.mubr.f32.gmra.mrb[46].mxu0 %v378_v7 }
  0xd2   : > { %1598 = vmatprep.mubr.f32.mxu0 %v383_v8 }
  0xd3   : > { %2966 = vmatmul.mubr.f32.gmra.mrb[46].mxu1 %v378_v7  ;;  %v506_v7 = vld [vmem:[%s5991_s7 + $0x6e0] sm:$0xff] }
  0xd4   : > { %2970 = vmatprep.mubr.f32.mxu1 %v383_v8  ;;  %v511_v8 = vld [vmem:[%s5991_s7 + $0x708] sm:$0xff] }
  0xd5   : > { %1599 = vmatmul.mubr.f32.gmra.mrb[48].mxu0 %v382_v9 }
  0xd6   : > { %1603 = vmatprep.mubr.f32.mxu0 %v387_v10 }
  0xd7   : > { %2971 = vmatmul.mubr.f32.gmra.mrb[48].mxu1 %v382_v9  ;;  %v510_v9 = vld [vmem:[%s5991_s7 + $0x700] sm:$0xff] }
  0xd8   : > { %2975 = vmatprep.mubr.f32.mxu1 %v387_v10  ;;  %v515_v10 = vld [vmem:[%s5991_s7 + $0x728] sm:$0xff] }
  0xd9   : > { %1604 = vmatmul.mubr.f32.gmra.mrb[50].mxu0 %v386_v11 }
  0xda   : > { %1608 = vmatprep.mubr.f32.mxu0 %v391_v12 }
  0xdb   : > { %2976 = vmatmul.mubr.f32.gmra.mrb[50].mxu1 %v386_v11  ;;  %v514_v11 = vld [vmem:[%s5991_s7 + $0x720] sm:$0xff] }
  0xdc   : > { %2980 = vmatprep.mubr.f32.mxu1 %v391_v12  ;;  %v519_v12 = vld [vmem:[%s5991_s7 + $0x748] sm:$0xff] }
  0xdd   : > { %1609 = vmatmul.mubr.f32.gmra.mrb[52].mxu0 %v390_v13 }
  0xde   : > { %1613 = vmatprep.mubr.f32.mxu0 %v395_v14 }
  0xdf   : > { %2981 = vmatmul.mubr.f32.gmra.mrb[52].mxu1 %v390_v13  ;;  %v518_v13 = vld [vmem:[%s5991_s7 + $0x740] sm:$0xff] }
  0xe0   : > { %2985 = vmatprep.mubr.f32.mxu1 %v395_v14  ;;  %v523_v14 = vld [vmem:[%s5991_s7 + $0x768] sm:$0xff] }
  0xe1   : > { %1614 = vmatmul.mubr.f32.gmra.mrb[54].mxu0 %v394_v15 }
  0xe2   : > { %1618 = vmatprep.mubr.f32.mxu0 %v399_v16 }
  0xe3   : > { %2986 = vmatmul.mubr.f32.gmra.mrb[54].mxu1 %v394_v15  ;;  %v522_v15 = vld [vmem:[%s5991_s7 + $0x760] sm:$0xff] }
  0xe4   : > { %2990 = vmatprep.mubr.f32.mxu1 %v399_v16  ;;  %v527_v16 = vld [vmem:[%s5991_s7 + $0x788] sm:$0xff] }
  0xe5   : > { %1619 = vmatmul.mubr.f32.gmra.mrb[56].mxu0 %v398_v17 }
  0xe6   : > { %1623 = vmatprep.mubr.f32.mxu0 %v403_v18 }
  0xe7   : > { %2991 = vmatmul.mubr.f32.gmra.mrb[56].mxu1 %v398_v17  ;;  %v526_v17 = vld [vmem:[%s5991_s7 + $0x780] sm:$0xff] }
  0xe8   : > { %2995 = vmatprep.mubr.f32.mxu1 %v403_v18  ;;  %v531_v18 = vld [vmem:[%s5991_s7 + $0x7a8] sm:$0xff] }
  0xe9   : > { %1624 = vmatmul.mubr.f32.gmra.mrb[58].mxu0 %v402_v19 }
  0xea   : > { %1628 = vmatprep.mubr.f32.mxu0 %v407_v20 }
  0xeb   : > { %2996 = vmatmul.mubr.f32.gmra.mrb[58].mxu1 %v402_v19  ;;  %v530_v19 = vld [vmem:[%s5991_s7 + $0x7a0] sm:$0xff] }
  0xec   : > { %3000 = vmatprep.mubr.f32.mxu1 %v407_v20  ;;  %v535_v20 = vld [vmem:[%s5991_s7 + $0x7c8] sm:$0xff] }
  0xed   : > { %1629 = vmatmul.mubr.f32.gmra.mrb[60].mxu0 %v406_v21 }
  0xee   : > { %1633 = vmatprep.mubr.f32.mxu0 %v411_v22 }
  0xef   : > { %3001 = vmatmul.mubr.f32.gmra.mrb[60].mxu1 %v406_v21  ;;  %v534_v21 = vld [vmem:[%s5991_s7 + $0x7c0] sm:$0xff] }
  0xf0   : > { %3005 = vmatprep.mubr.f32.mxu1 %v411_v22  ;;  %v539_v22 = vld [vmem:[%s5991_s7 + $0x7e8] sm:$0xff] }
  0xf1   : > { %1634 = vmatmul.mubr.f32.gmra.mrb[62].mxu0 %v410_v23 }
  0xf2   : > { %1638 = vmatprep.mubr.f32.mxu0 %v415_v24 }
  0xf3   : > { %3006 = vmatmul.mubr.f32.gmra.mrb[62].mxu1 %v410_v23  ;;  %v538_v23 = vld [vmem:[%s5991_s7 + $0x7e0] sm:$0xff] }
  0xf4   : > { %3010 = vmatprep.mubr.f32.mxu1 %v415_v24  ;;  %v543_v24 = vld [vmem:[%s5991_s7 + $0x808] sm:$0xff] }
  0xf5   : > { %1639 = vmatmul.mubr.f32.gmra.mrb[64].mxu0 %v414_v25 }
  0xf6   : > { %1643 = vmatprep.mubr.f32.mxu0 %v419_v26 }
  0xf7   : > { %3011 = vmatmul.mubr.f32.gmra.mrb[64].mxu1 %v414_v25  ;;  %v542_v25 = vld [vmem:[%s5991_s7 + $0x800] sm:$0xff] }
  0xf8   : > { %3015 = vmatprep.mubr.f32.mxu1 %v419_v26  ;;  %v547_v26 = vld [vmem:[%s5991_s7 + $0x828] sm:$0xff] }
  0xf9   : > { %1644 = vmatmul.mubr.f32.gmra.mrb[66].mxu0 %v418_v27 }
  0xfa   : > { %1648 = vmatprep.mubr.f32.mxu0 %v423_v28 }
  0xfb   : > { %3016 = vmatmul.mubr.f32.gmra.mrb[66].mxu1 %v418_v27  ;;  %v546_v27 = vld [vmem:[%s5991_s7 + $0x820] sm:$0xff] }
  0xfc   : > { %3020 = vmatprep.mubr.f32.mxu1 %v423_v28  ;;  %v551_v28 = vld [vmem:[%s5991_s7 + $0x848] sm:$0xff] }
  0xfd   : > { %1649 = vmatmul.mubr.f32.gmra.mrb[68].mxu0 %v422_v29 }
  0xfe   : > { %1653 = vmatprep.mubr.f32.mxu0 %v427_v30 }
  0xff   : > { %3021 = vmatmul.mubr.f32.gmra.mrb[68].mxu1 %v422_v29  ;;  %v550_v29 = vld [vmem:[%s5991_s7 + $0x840] sm:$0xff] }
 0x100   : > { %3025 = vmatprep.mubr.f32.mxu1 %v427_v30  ;;  %v555_v30 = vld [vmem:[%s5991_s7 + $0x868] sm:$0xff] }
 0x101   : > { %1654 = vmatmul.mubr.f32.gmra.mrb[70].mxu0 %v426_v31 }
 0x102   : > { %1658 = vmatprep.mubr.f32.mxu0 %v431_v32 }
 0x103   : > { %3026 = vmatmul.mubr.f32.gmra.mrb[70].mxu1 %v426_v31  ;;  %v554_v31 = vld [vmem:[%s5991_s7 + $0x860] sm:$0xff] }
 0x104   : > { %3030 = vmatprep.mubr.f32.mxu1 %v431_v32  ;;  %v559_v32 = vld [vmem:[%s5991_s7 + $0x888] sm:$0xff] }
 0x105   : > { %1659 = vmatmul.mubr.f32.gmra.mrb[72].mxu0 %v430_v33 }
 0x106   : > { %1663 = vmatprep.mubr.f32.mxu0 %v435_v34 }
 0x107   : > { %3031 = vmatmul.mubr.f32.gmra.mrb[72].mxu1 %v430_v33  ;;  %v558_v33 = vld [vmem:[%s5991_s7 + $0x880] sm:$0xff] }
 0x108   : > { %3035 = vmatprep.mubr.f32.mxu1 %v435_v34  ;;  %v563_v34 = vld [vmem:[%s5991_s7 + $0x8a8] sm:$0xff] }
 0x109   : > { %1664 = vmatmul.mubr.f32.gmra.mrb[74].mxu0 %v434_v35 }
 0x10a   : > { %1668 = vmatprep.mubr.f32.mxu0 %v439_v36 }
 0x10b   : > { %3036 = vmatmul.mubr.f32.gmra.mrb[74].mxu1 %v434_v35  ;;  %v562_v35 = vld [vmem:[%s5991_s7 + $0x8a0] sm:$0xff] }
 0x10c   : > { %3040 = vmatprep.mubr.f32.mxu1 %v439_v36  ;;  %v567_v36 = vld [vmem:[%s5991_s7 + $0x8c8] sm:$0xff] }
 0x10d   : > { %1669 = vmatmul.mubr.f32.gmra.mrb[76].mxu0 %v438_v37 }
 0x10e   : > { %1673 = vmatprep.mubr.f32.mxu0 %v443_v38 }
 0x10f   : > { %3041 = vmatmul.mubr.f32.gmra.mrb[76].mxu1 %v438_v37  ;;  %v566_v37 = vld [vmem:[%s5991_s7 + $0x8c0] sm:$0xff] }
 0x110   : > { %3045 = vmatprep.mubr.f32.mxu1 %v443_v38  ;;  %v571_v38 = vld [vmem:[%s5991_s7 + $0x8e8] sm:$0xff] }
 0x111   : > { %1674 = vmatmul.mubr.f32.gmra.mrb[78].mxu0 %v442_v39 }
 0x112   : > { %1678 = vmatprep.mubr.f32.mxu0 %v447_v40 }
 0x113   : > { %3046 = vmatmul.mubr.f32.gmra.mrb[78].mxu1 %v442_v39  ;;  %v570_v39 = vld [vmem:[%s5991_s7 + $0x8e0] sm:$0xff] }
 0x114   : > { %3050 = vmatprep.mubr.f32.mxu1 %v447_v40  ;;  %v575_v40 = vld [vmem:[%s5991_s7 + $0x908] sm:$0xff] }
 0x115   : > { %1679 = vmatmul.mubr.f32.gmra.mrb[80].mxu0 %v446_v41 }
 0x116   : > { %1683 = vmatprep.mubr.f32.mxu0 %v451_v42 }
 0x117   : > { %3051 = vmatmul.mubr.f32.gmra.mrb[80].mxu1 %v446_v41  ;;  %v574_v41 = vld [vmem:[%s5991_s7 + $0x900] sm:$0xff] }
 0x118   : > { %3055 = vmatprep.mubr.f32.mxu1 %v451_v42  ;;  %v579_v42 = vld [vmem:[%s5991_s7 + $0x928] sm:$0xff] }
 0x119   : > { %1684 = vmatmul.mubr.f32.gmra.mrb[82].mxu0 %v450_v43 }
 0x11a   : > { %1688 = vmatprep.mubr.f32.mxu0 %v455_v44 }
 0x11b   : > { %3056 = vmatmul.mubr.f32.gmra.mrb[82].mxu1 %v450_v43  ;;  %v578_v43 = vld [vmem:[%s5991_s7 + $0x920] sm:$0xff] }
 0x11c   : > { %3060 = vmatprep.mubr.f32.mxu1 %v455_v44  ;;  %v583_v44 = vld [vmem:[%s5991_s7 + $0x948] sm:$0xff] }
 0x11d   : > { %1689 = vmatmul.mubr.f32.gmra.mrb[84].mxu0 %v454_v45 }
 0x11e   : > { %1693 = vmatprep.mubr.f32.mxu0 %v459_v46 }
 0x11f   : > { %3061 = vmatmul.mubr.f32.gmra.mrb[84].mxu1 %v454_v45  ;;  %v582_v45 = vld [vmem:[%s5991_s7 + $0x940] sm:$0xff] }
 0x120   : > { %3065 = vmatprep.mubr.f32.mxu1 %v459_v46  ;;  %v587_v46 = vld [vmem:[%s5991_s7 + $0x968] sm:$0xff] }
 0x121   : > { %1694 = vmatmul.mubr.f32.gmra.mrb[86].mxu0 %v458_v47 }
 0x122   : > { %1698 = vmatprep.mubr.f32.mxu0 %v463_v48 }
 0x123   : > { %3066 = vmatmul.mubr.f32.gmra.mrb[86].mxu1 %v458_v47  ;;  %v586_v47 = vld [vmem:[%s5991_s7 + $0x960] sm:$0xff] }
 0x124   : > { %3070 = vmatprep.mubr.f32.mxu1 %v463_v48  ;;  %v591_v48 = vld [vmem:[%s5991_s7 + $0x988] sm:$0xff] }
 0x125   : > { %1699 = vmatmul.mubr.f32.gmra.mrb[88].mxu0 %v462_v49 }
 0x126   : > { %1703 = vmatprep.mubr.f32.mxu0 %v467_v50 }
 0x127   : > { %3071 = vmatmul.mubr.f32.gmra.mrb[88].mxu1 %v462_v49  ;;  %v590_v49 = vld [vmem:[%s5991_s7 + $0x980] sm:$0xff] }
 0x128   : > { %3075 = vmatprep.mubr.f32.mxu1 %v467_v50  ;;  %v595_v50 = vld [vmem:[%s5991_s7 + $0x9a8] sm:$0xff] }
 0x129   : > { %1704 = vmatmul.mubr.f32.gmra.mrb[90].mxu0 %v466_v51 }
 0x12a   : > { %1708 = vmatprep.mubr.f32.mxu0 %v471_v52 }
 0x12b   : > { %3076 = vmatmul.mubr.f32.gmra.mrb[90].mxu1 %v466_v51  ;;  %v594_v51 = vld [vmem:[%s5991_s7 + $0x9a0] sm:$0xff] }
 0x12c   : > { %3080 = vmatprep.mubr.f32.mxu1 %v471_v52  ;;  %v599_v52 = vld [vmem:[%s5991_s7 + $0x9c8] sm:$0xff] }
 0x12d   : > { %1709 = vmatmul.mubr.f32.gmra.mrb[92].mxu0 %v470_v53 }
 0x12e   : > { %1713 = vmatprep.mubr.f32.mxu0 %v475_v54 }
 0x12f   : > { %3081 = vmatmul.mubr.f32.gmra.mrb[92].mxu1 %v470_v53  ;;  %v598_v53 = vld [vmem:[%s5991_s7 + $0x9c0] sm:$0xff] }
 0x130   : > { %3085 = vmatprep.mubr.f32.mxu1 %v475_v54  ;;  %v603_v54 = vld [vmem:[%s5991_s7 + $0x9e8] sm:$0xff] }
 0x131   : > { %1714 = vmatmul.mubr.f32.gmra.mrb[94].mxu0 %v474_v55 }
 0x132   : > { %1718 = vmatprep.mubr.f32.mxu0 %v479_v56 }
 0x133   : > { %3086 = vmatmul.mubr.f32.gmra.mrb[94].mxu1 %v474_v55  ;;  %v602_v55 = vld [vmem:[%s5991_s7 + $0x9e0] sm:$0xff] }
 0x134   : > { %3090 = vmatprep.mubr.f32.mxu1 %v479_v56  ;;  %v607_v56 = vld [vmem:[%s5991_s7 + $0xa08] sm:$0xff] }
 0x135   : > { %1719 = vmatmul.mubr.f32.gmra.mrb[96].mxu0 %v478_v57 }
 0x136   : > { %1723 = vmatprep.mubr.f32.mxu0 %v483_v58 }
 0x137   : > { %3091 = vmatmul.mubr.f32.gmra.mrb[96].mxu1 %v478_v57  ;;  %v606_v57 = vld [vmem:[%s5991_s7 + $0xa00] sm:$0xff] }
 0x138   : > { %3095 = vmatprep.mubr.f32.mxu1 %v483_v58  ;;  %v611_v58 = vld [vmem:[%s5991_s7 + $0xa28] sm:$0xff] }
 0x139   : > { %1724 = vmatmul.mubr.f32.gmra.mrb[98].mxu0 %v482_v59 }
 0x13a   : > { %1728 = vmatprep.mubr.f32.mxu0 %v487_v60 }
 0x13b   : > { %3096 = vmatmul.mubr.f32.gmra.mrb[98].mxu1 %v482_v59  ;;  %v610_v59 = vld [vmem:[%s5991_s7 + $0xa20] sm:$0xff] }
 0x13c   : > { %3100 = vmatprep.mubr.f32.mxu1 %v487_v60  ;;  %v615_v60 = vld [vmem:[%s5991_s7 + $0xa48] sm:$0xff] }
 0x13d   : > { %1729 = vmatmul.mubr.f32.gmra.mrb[100].mxu0 %v486_v61 }
 0x13e   : > { %1733 = vmatprep.mubr.f32.mxu0 %v491_v62 }
 0x13f   : > { %3101 = vmatmul.mubr.f32.gmra.mrb[100].mxu1 %v486_v61  ;;  %v614_v61 = vld [vmem:[%s5991_s7 + $0xa40] sm:$0xff] }
 0x140   : > { %3105 = vmatprep.mubr.f32.mxu1 %v491_v62  ;;  %v619_v62 = vld [vmem:[%s5991_s7 + $0xa68] sm:$0xff] }
 0x141   : > { %1734 = vmatmul.mubr.f32.gmra.mrb[102].mxu0 %v490_v63 }
 0x142   : > { %1738 = vmatprep.mubr.f32.mxu0 %v495_v0 }
 0x143   : > { %3106 = vmatmul.mubr.f32.gmra.mrb[102].mxu1 %v490_v63  ;;  %v618_v63 = vld [vmem:[%s5991_s7 + $0xa60] sm:$0xff] }
 0x144   : > { %3110 = vmatprep.mubr.f32.mxu1 %v495_v0  ;;  %v623_v0 = vld [vmem:[%s5991_s7 + $0xa88] sm:$0xff] }
 0x145   : > { %1739 = vmatmul.mubr.f32.gmra.mrb[104].mxu0 %v494_v1 }
 0x146   : > { %1743 = vmatprep.mubr.f32.mxu0 %v499_v2 }
 0x147   : > { %3111 = vmatmul.mubr.f32.gmra.mrb[104].mxu1 %v494_v1  ;;  %v622_v1 = vld [vmem:[%s5991_s7 + $0xa80] sm:$0xff] }
 0x148   : > { %3115 = vmatprep.mubr.f32.mxu1 %v499_v2  ;;  %v627_v2 = vld [vmem:[%s5991_s7 + $0xaa8] sm:$0xff] }
 0x149   : > { %1744 = vmatmul.mubr.f32.gmra.mrb[106].mxu0 %v498_v3 }
 0x14a   : > { %1748 = vmatprep.mubr.f32.mxu0 %v503_v4 }
 0x14b   : > { %3116 = vmatmul.mubr.f32.gmra.mrb[106].mxu1 %v498_v3  ;;  %v626_v3 = vld [vmem:[%s5991_s7 + $0xaa0] sm:$0xff] }
 0x14c   : > { %3120 = vmatprep.mubr.f32.mxu1 %v503_v4  ;;  %v631_v4 = vld [vmem:[%s5991_s7 + $0xac8] sm:$0xff] }
 0x14d   : > { %1749 = vmatmul.mubr.f32.gmra.mrb[108].mxu0 %v502_v5 }
 0x14e   : > { %1753 = vmatprep.mubr.f32.mxu0 %v507_v6 }
 0x14f   : > { %3121 = vmatmul.mubr.f32.gmra.mrb[108].mxu1 %v502_v5  ;;  %v630_v5 = vld [vmem:[%s5991_s7 + $0xac0] sm:$0xff] }
 0x150   : > { %3125 = vmatprep.mubr.f32.mxu1 %v507_v6  ;;  %v635_v6 = vld [vmem:[%s5991_s7 + $0xae8] sm:$0xff] }
 0x151   : > { %1754 = vmatmul.mubr.f32.gmra.mrb[110].mxu0 %v506_v7 }
 0x152   : > { %1758 = vmatprep.mubr.f32.mxu0 %v511_v8 }
 0x153   : > { %3126 = vmatmul.mubr.f32.gmra.mrb[110].mxu1 %v506_v7  ;;  %v634_v7 = vld [vmem:[%s5991_s7 + $0xae0] sm:$0xff] }
 0x154   : > { %3130 = vmatprep.mubr.f32.mxu1 %v511_v8  ;;  %v639_v8 = vld [vmem:[%s5991_s7 + $0xb08] sm:$0xff] }
 0x155   : > { %1759 = vmatmul.mubr.f32.gmra.mrb[112].mxu0 %v510_v9 }
 0x156   : > { %1763 = vmatprep.mubr.f32.mxu0 %v515_v10 }
 0x157   : > { %3131 = vmatmul.mubr.f32.gmra.mrb[112].mxu1 %v510_v9  ;;  %v638_v9 = vld [vmem:[%s5991_s7 + $0xb00] sm:$0xff] }
 0x158   : > { %3135 = vmatprep.mubr.f32.mxu1 %v515_v10  ;;  %v643_v10 = vld [vmem:[%s5991_s7 + $0xb28] sm:$0xff] }
 0x159   : > { %1764 = vmatmul.mubr.f32.gmra.mrb[114].mxu0 %v514_v11 }
 0x15a   : > { %1768 = vmatprep.mubr.f32.mxu0 %v519_v12 }
 0x15b   : > { %3136 = vmatmul.mubr.f32.gmra.mrb[114].mxu1 %v514_v11  ;;  %v642_v11 = vld [vmem:[%s5991_s7 + $0xb20] sm:$0xff] }
 0x15c   : > { %3140 = vmatprep.mubr.f32.mxu1 %v519_v12  ;;  %v647_v12 = vld [vmem:[%s5991_s7 + $0xb48] sm:$0xff] }
 0x15d   : > { %1769 = vmatmul.mubr.f32.gmra.mrb[116].mxu0 %v518_v13 }
 0x15e   : > { %1773 = vmatprep.mubr.f32.mxu0 %v523_v14 }
 0x15f   : > { %3141 = vmatmul.mubr.f32.gmra.mrb[116].mxu1 %v518_v13  ;;  %v646_v13 = vld [vmem:[%s5991_s7 + $0xb40] sm:$0xff] }
 0x160   : > { %3145 = vmatprep.mubr.f32.mxu1 %v523_v14  ;;  %v651_v14 = vld [vmem:[%s5991_s7 + $0xb68] sm:$0xff] }
 0x161   : > { %1774 = vmatmul.mubr.f32.gmra.mrb[118].mxu0 %v522_v15 }
 0x162   : > { %1778 = vmatprep.mubr.f32.mxu0 %v527_v16 }
 0x163   : > { %3146 = vmatmul.mubr.f32.gmra.mrb[118].mxu1 %v522_v15  ;;  %v650_v15 = vld [vmem:[%s5991_s7 + $0xb60] sm:$0xff] }
 0x164   : > { %3150 = vmatprep.mubr.f32.mxu1 %v527_v16  ;;  %v655_v16 = vld [vmem:[%s5991_s7 + $0xb88] sm:$0xff] }
 0x165   : > { %1779 = vmatmul.mubr.f32.gmra.mrb[120].mxu0 %v526_v17 }
 0x166   : > { %1783 = vmatprep.mubr.f32.mxu0 %v531_v18 }
 0x167   : > { %3151 = vmatmul.mubr.f32.gmra.mrb[120].mxu1 %v526_v17  ;;  %v654_v17 = vld [vmem:[%s5991_s7 + $0xb80] sm:$0xff] }
 0x168   : > { %3155 = vmatprep.mubr.f32.mxu1 %v531_v18  ;;  %v659_v18 = vld [vmem:[%s5991_s7 + $0xba8] sm:$0xff] }
 0x169   : > { %1784 = vmatmul.mubr.f32.gmra.mrb[122].mxu0 %v530_v19 }
 0x16a   : > { %1788 = vmatprep.mubr.f32.mxu0 %v535_v20 }
 0x16b   : > { %3156 = vmatmul.mubr.f32.gmra.mrb[122].mxu1 %v530_v19  ;;  %v658_v19 = vld [vmem:[%s5991_s7 + $0xba0] sm:$0xff] }
 0x16c   : > { %3160 = vmatprep.mubr.f32.mxu1 %v535_v20  ;;  %v663_v20 = vld [vmem:[%s5991_s7 + $0xbc8] sm:$0xff] }
 0x16d   : > { %1789 = vmatmul.mubr.f32.gmra.mrb[124].mxu0 %v534_v21 }
 0x16e   : > { %1793 = vmatprep.mubr.f32.mxu0 %v539_v22 }
 0x16f   : > { %3161 = vmatmul.mubr.f32.gmra.mrb[124].mxu1 %v534_v21  ;;  %v662_v21 = vld [vmem:[%s5991_s7 + $0xbc0] sm:$0xff] }
 0x170   : > { %3165 = vmatprep.mubr.f32.mxu1 %v539_v22  ;;  %v667_v22 = vld [vmem:[%s5991_s7 + $0xbe8] sm:$0xff] }
 0x171   : > { %1794 = vmatmul.mubr.f32.gmra.mrb[126].mxu0 %v538_v23 }
 0x172   : > { %1798 = vmatprep.mubr.f32.mxu0 %v543_v24 }
 0x173   : > { %3166 = vmatmul.mubr.f32.gmra.mrb[126].mxu1 %v538_v23  ;;  %v666_v23 = vld [vmem:[%s5991_s7 + $0xbe0] sm:$0xff] }
 0x174   : > { %3170 = vmatprep.mubr.f32.mxu1 %v543_v24  ;;  %v671_v24 = vld [vmem:[%s5991_s7 + $0xc08] sm:$0xff] }
 0x175   : > { %1799 = vmatmul.mubr.f32.gmra.mrb[128].mxu0 %v542_v25 }
 0x176   : > { %1803 = vmatprep.mubr.f32.mxu0 %v547_v26 }
 0x177   : > { %3171 = vmatmul.mubr.f32.gmra.mrb[128].mxu1 %v542_v25  ;;  %v670_v25 = vld [vmem:[%s5991_s7 + $0xc00] sm:$0xff] }
 0x178   : > { %3175 = vmatprep.mubr.f32.mxu1 %v547_v26  ;;  %v675_v26 = vld [vmem:[%s5991_s7 + $0xc28] sm:$0xff] }
 0x179   : > { %1804 = vmatmul.mubr.f32.gmra.mrb[130].mxu0 %v546_v27 }
 0x17a   : > { %1808 = vmatprep.mubr.f32.mxu0 %v551_v28 }
 0x17b   : > { %3176 = vmatmul.mubr.f32.gmra.mrb[130].mxu1 %v546_v27  ;;  %v674_v27 = vld [vmem:[%s5991_s7 + $0xc20] sm:$0xff] }
 0x17c   : > { %3180 = vmatprep.mubr.f32.mxu1 %v551_v28  ;;  %v679_v28 = vld [vmem:[%s5991_s7 + $0xc48] sm:$0xff] }
 0x17d   : > { %1809 = vmatmul.mubr.f32.gmra.mrb[132].mxu0 %v550_v29 }
 0x17e   : > { %1813 = vmatprep.mubr.f32.mxu0 %v555_v30 }
 0x17f   : > { %3181 = vmatmul.mubr.f32.gmra.mrb[132].mxu1 %v550_v29  ;;  %v678_v29 = vld [vmem:[%s5991_s7 + $0xc40] sm:$0xff] }
 0x180   : > { %3185 = vmatprep.mubr.f32.mxu1 %v555_v30  ;;  %v683_v30 = vld [vmem:[%s5991_s7 + $0xc68] sm:$0xff] }
 0x181   : > { %1814 = vmatmul.mubr.f32.gmra.mrb[134].mxu0 %v554_v31 }
 0x182   : > { %1818 = vmatprep.mubr.f32.mxu0 %v559_v32 }
 0x183   : > { %3186 = vmatmul.mubr.f32.gmra.mrb[134].mxu1 %v554_v31  ;;  %v682_v31 = vld [vmem:[%s5991_s7 + $0xc60] sm:$0xff] }
 0x184   : > { %3190 = vmatprep.mubr.f32.mxu1 %v559_v32  ;;  %v687_v32 = vld [vmem:[%s5991_s7 + $0xc88] sm:$0xff] }
 0x185   : > { %1819 = vmatmul.mubr.f32.gmra.mrb[136].mxu0 %v558_v33 }
 0x186   : > { %1823 = vmatprep.mubr.f32.mxu0 %v563_v34 }
 0x187   : > { %3191 = vmatmul.mubr.f32.gmra.mrb[136].mxu1 %v558_v33  ;;  %v686_v33 = vld [vmem:[%s5991_s7 + $0xc80] sm:$0xff] }
 0x188   : > { %3195 = vmatprep.mubr.f32.mxu1 %v563_v34  ;;  %v691_v34 = vld [vmem:[%s5991_s7 + $0xca8] sm:$0xff] }
 0x189   : > { %1824 = vmatmul.mubr.f32.gmra.mrb[138].mxu0 %v562_v35 }
 0x18a   : > { %1828 = vmatprep.mubr.f32.mxu0 %v567_v36 }
 0x18b   : > { %3196 = vmatmul.mubr.f32.gmra.mrb[138].mxu1 %v562_v35  ;;  %v690_v35 = vld [vmem:[%s5991_s7 + $0xca0] sm:$0xff] }
 0x18c   : > { %3200 = vmatprep.mubr.f32.mxu1 %v567_v36  ;;  %v695_v36 = vld [vmem:[%s5991_s7 + $0xcc8] sm:$0xff] }
 0x18d   : > { %1829 = vmatmul.mubr.f32.gmra.mrb[140].mxu0 %v566_v37 }
 0x18e   : > { %1833 = vmatprep.mubr.f32.mxu0 %v571_v38 }
 0x18f   : > { %3201 = vmatmul.mubr.f32.gmra.mrb[140].mxu1 %v566_v37  ;;  %v5824_v37 = vmov 0  }
 0x190   : > { %3205 = vmatprep.mubr.f32.mxu1 %v571_v38  ;;  %5640 = vset.pattern.permute.xlu0 %v5824_v37  ;;  %v734_v38 = vld [vmem:[%s6210_s12] sm:$0xff] }
 0x191   : > { %1834 = vmatmul.mubr.f32.gmra.mrb[142].mxu0 %v570_v39  ;;  %5641 = vset.pattern.permute.xlu1 %v5824_v37  ;;  %v764_v37 = vld [vmem:[%s6210_s12 + $0xf0] sm:$0xff] }
 0x192   : > { %1838 = vmatprep.mubr.f32.mxu0 %v575_v40  ;;  %856 = vperm.xlu0 %5640, %v734_v38   ;;  %v312_v38 = vld [vmem:[%s5991_s7 + $0xd0] sm:$0xff] }
 0x193   : > { %3206 = vmatmul.mubr.f32.gmra.mrb[142].mxu1 %v570_v39  ;;  %v694_v39 = vld [vmem:[%s5991_s7 + $0xcc0] sm:$0xff] }
 0x194   : > { %3210 = vmatprep.mubr.f32.mxu1 %v575_v40  ;;  %v699_v40 = vld [vmem:[%s5991_s7 + $0xce8] sm:$0xff] }
 0x195   : > { %1839 = vmatmul.mubr.f32.gmra.mrb[144].mxu0 %v574_v41 }
 0x196   : > { %1843 = vmatprep.mubr.f32.mxu0 %v579_v42 }
 0x197   : > { %3211 = vmatmul.mubr.f32.gmra.mrb[144].mxu1 %v574_v41  ;;  %v735_v41 = vld [vmem:[%s6210_s12 + $0x8] sm:$0xff] }
 0x198   : > { %3215 = vmatprep.mubr.f32.mxu1 %v579_v42  ;;  %v736_v42 = vld [vmem:[%s6210_s12 + $0x10] sm:$0xff]  ;;  %861 = vperm.xlu0 %5640, %v735_v41   ;;  %v766_v41 = vld [vmem:[%s6210_s12 + $0x100] sm:$0xff] }
 0x199   : > { %1844 = vmatmul.mubr.f32.gmra.mrb[146].mxu0 %v578_v43  ;;  %866 = vperm.xlu1 %5641, %v736_v42   ;;  %v316_v42 = vld [vmem:[%s5991_s7 + $0xf0] sm:$0xff] }
 0x19a   : > { %1848 = vmatprep.mubr.f32.mxu0 %v583_v44 }
 0x19b   : > { %3216 = vmatmul.mubr.f32.gmra.mrb[146].mxu1 %v578_v43  ;;  %v698_v43 = vld [vmem:[%s5991_s7 + $0xce0] sm:$0xff] }
 0x19c   : > { %3220 = vmatprep.mubr.f32.mxu1 %v583_v44  ;;  %v703_v44 = vld [vmem:[%s5991_s7 + $0xd08] sm:$0xff] }
 0x19d   : > { %1849 = vmatmul.mubr.f32.gmra.mrb[148].mxu0 %v582_v45 }
 0x19e   : > { %1853 = vmatprep.mubr.f32.mxu0 %v587_v46 }
 0x19f   : > { %3221 = vmatmul.mubr.f32.gmra.mrb[148].mxu1 %v582_v45  ;;  %v737_v45 = vld [vmem:[%s6210_s12 + $0x18] sm:$0xff] }
 0x1a0   : > { %3225 = vmatprep.mubr.f32.mxu1 %v587_v46  ;;  %v702_v46 = vld [vmem:[%s5991_s7 + $0xd00] sm:$0xff]  ;;  %871 = vperm.xlu1 %5641, %v737_v45   ;;  %v768_v45 = vld [vmem:[%s6210_s12 + $0x110] sm:$0xff] }
 0x1a1   : > { %1854 = vmatmul.mubr.f32.gmra.mrb[150].mxu0 %v586_v47 }
 0x1a2   : > { %1858 = vmatprep.mubr.f32.mxu0 %v591_v48 }
 0x1a3   : > { %3226 = vmatmul.mubr.f32.gmra.mrb[150].mxu1 %v586_v47  ;;  %v707_v47 = vld [vmem:[%s5991_s7 + $0xd28] sm:$0xff] }
 0x1a4   : > { %3230 = vmatprep.mubr.f32.mxu1 %v591_v48  ;;  %v739_v48 = vld [vmem:[%s6210_s12 + $0x28] sm:$0xff] }
 0x1a5   : > { %1859 = vmatmul.mubr.f32.gmra.mrb[152].mxu0 %v590_v49  ;;  %881 = vperm.xlu1 %5641, %v739_v48   ;;  %v771_v48 = vld [vmem:[%s6210_s12 + $0x128] sm:$0xff] }
 0x1a6   : > { %1863 = vmatprep.mubr.f32.mxu0 %v595_v50 }
 0x1a7   : > { %3231 = vmatmul.mubr.f32.gmra.mrb[152].mxu1 %v590_v49  ;;  %v738_v49 = vld [vmem:[%s6210_s12 + $0x20] sm:$0xff] }
 0x1a8   : > { %3235 = vmatprep.mubr.f32.mxu1 %v595_v50  ;;  %v706_v50 = vld [vmem:[%s5991_s7 + $0xd20] sm:$0xff]  ;;  %876 = vperm.xlu0 %5640, %v738_v49  }
 0x1a9   : > { %1864 = vmatmul.mubr.f32.gmra.mrb[154].mxu0 %v594_v51  ;;  %v770_v49 = vld [vmem:[%s6210_s12 + $0x120] sm:$0xff] }
 0x1aa   : > { %1868 = vmatprep.mubr.f32.mxu0 %v599_v52 }
 0x1ab   : > { %3236 = vmatmul.mubr.f32.gmra.mrb[154].mxu1 %v594_v51  ;;  %v711_v51 = vld [vmem:[%s5991_s7 + $0xd48] sm:$0xff] }
 0x1ac   : > { %3240 = vmatprep.mubr.f32.mxu1 %v599_v52  ;;  %v741_v52 = vld [vmem:[%s6210_s12 + $0x38] sm:$0xff] }
 0x1ad   : > { %1869 = vmatmul.mubr.f32.gmra.mrb[156].mxu0 %v598_v53  ;;  %891 = vperm.xlu1 %5641, %v741_v52   ;;  %v773_v52 = vld [vmem:[%s6210_s12 + $0x138] sm:$0xff] }
 0x1ae   : > { %1873 = vmatprep.mubr.f32.mxu0 %v603_v54 }
 0x1af   : > { %3241 = vmatmul.mubr.f32.gmra.mrb[156].mxu1 %v598_v53  ;;  %v740_v53 = vld [vmem:[%s6210_s12 + $0x30] sm:$0xff] }
 0x1b0   : > { %3245 = vmatprep.mubr.f32.mxu1 %v603_v54  ;;  %v710_v54 = vld [vmem:[%s5991_s7 + $0xd40] sm:$0xff]  ;;  %886 = vperm.xlu0 %5640, %v740_v53   ;;  %v772_v53 = vld [vmem:[%s6210_s12 + $0x130] sm:$0xff] }
 0x1b1   : > { %1874 = vmatmul.mubr.f32.gmra.mrb[158].mxu0 %v602_v55 }
 0x1b2   : > { %1878 = vmatprep.mubr.f32.mxu0 %v607_v56 }
 0x1b3   : > { %3246 = vmatmul.mubr.f32.gmra.mrb[158].mxu1 %v602_v55  ;;  %v715_v55 = vld [vmem:[%s5991_s7 + $0xd68] sm:$0xff] }
 0x1b4   : > { %3250 = vmatprep.mubr.f32.mxu1 %v607_v56  ;;  %v743_v56 = vld [vmem:[%s6210_s12 + $0x48] sm:$0xff] }
 0x1b5   : > { %1879 = vmatmul.mubr.f32.gmra.mrb[160].mxu0 %v606_v57  ;;  %901 = vperm.xlu1 %5641, %v743_v56   ;;  %v775_v56 = vld [vmem:[%s6210_s12 + $0x148] sm:$0xff] }
 0x1b6   : > { %1883 = vmatprep.mubr.f32.mxu0 %v611_v58 }
 0x1b7   : > { %3251 = vmatmul.mubr.f32.gmra.mrb[160].mxu1 %v606_v57  ;;  %v742_v57 = vld [vmem:[%s6210_s12 + $0x40] sm:$0xff] }
 0x1b8   : > { %3255 = vmatprep.mubr.f32.mxu1 %v611_v58  ;;  %v714_v58 = vld [vmem:[%s5991_s7 + $0xd60] sm:$0xff]  ;;  %896 = vperm.xlu0 %5640, %v742_v57  }
 0x1b9   : > { %1884 = vmatmul.mubr.f32.gmra.mrb[162].mxu0 %v610_v59  ;;  %v774_v57 = vld [vmem:[%s6210_s12 + $0x140] sm:$0xff] }
 0x1ba   : > { %1888 = vmatprep.mubr.f32.mxu0 %v615_v60 }
 0x1bb   : > { %3256 = vmatmul.mubr.f32.gmra.mrb[162].mxu1 %v610_v59  ;;  %v719_v59 = vld [vmem:[%s5991_s7 + $0xd88] sm:$0xff] }
 0x1bc   : > { %3260 = vmatprep.mubr.f32.mxu1 %v615_v60  ;;  %v745_v60 = vld [vmem:[%s6210_s12 + $0x58] sm:$0xff] }
 0x1bd   : > { %1889 = vmatmul.mubr.f32.gmra.mrb[164].mxu0 %v614_v61  ;;  %911 = vperm.xlu1 %5641, %v745_v60   ;;  %v777_v60 = vld [vmem:[%s6210_s12 + $0x158] sm:$0xff] }
 0x1be   : > { %1893 = vmatprep.mubr.f32.mxu0 %v619_v62 }
 0x1bf   : > { %3261 = vmatmul.mubr.f32.gmra.mrb[164].mxu1 %v614_v61  ;;  %v744_v61 = vld [vmem:[%s6210_s12 + $0x50] sm:$0xff] }
 0x1c0   : > { %3265 = vmatprep.mubr.f32.mxu1 %v619_v62  ;;  %v718_v62 = vld [vmem:[%s5991_s7 + $0xd80] sm:$0xff]  ;;  %906 = vperm.xlu0 %5640, %v744_v61   ;;  %v776_v61 = vld [vmem:[%s6210_s12 + $0x150] sm:$0xff] }
 0x1c1   : > { %1894 = vmatmul.mubr.f32.gmra.mrb[166].mxu0 %v618_v63 }
 0x1c2   : > { %1898 = vmatprep.mubr.f32.mxu0 %v623_v0 }
 0x1c3   : > { %3266 = vmatmul.mubr.f32.gmra.mrb[166].mxu1 %v618_v63  ;;  %v723_v63 = vld [vmem:[%s5991_s7 + $0xda8] sm:$0xff] }
 0x1c4   : > { %3270 = vmatprep.mubr.f32.mxu1 %v623_v0  ;;  %v747_v0 = vld [vmem:[%s6210_s12 + $0x68] sm:$0xff] }
 0x1c5   : > { %1899 = vmatmul.mubr.f32.gmra.mrb[168].mxu0 %v622_v1  ;;  %921 = vperm.xlu1 %5641, %v747_v0   ;;  %v779_v0 = vld [vmem:[%s6210_s12 + $0x168] sm:$0xff] }
 0x1c6   : > { %1903 = vmatprep.mubr.f32.mxu0 %v627_v2 }
 0x1c7   : > { %3271 = vmatmul.mubr.f32.gmra.mrb[168].mxu1 %v622_v1  ;;  %v746_v1 = vld [vmem:[%s6210_s12 + $0x60] sm:$0xff] }
 0x1c8   : > { %3275 = vmatprep.mubr.f32.mxu1 %v627_v2  ;;  %v722_v2 = vld [vmem:[%s5991_s7 + $0xda0] sm:$0xff]  ;;  %916 = vperm.xlu0 %5640, %v746_v1  }
 0x1c9   : > { %1904 = vmatmul.mubr.f32.gmra.mrb[170].mxu0 %v626_v3  ;;  %v778_v1 = vld [vmem:[%s6210_s12 + $0x160] sm:$0xff] }
 0x1ca   : > { %1908 = vmatprep.mubr.f32.mxu0 %v631_v4 }
 0x1cb   : > { %3276 = vmatmul.mubr.f32.gmra.mrb[170].mxu1 %v626_v3  ;;  %v727_v3 = vld [vmem:[%s5991_s7 + $0xdc8] sm:$0xff] }
 0x1cc   : > { %3280 = vmatprep.mubr.f32.mxu1 %v631_v4  ;;  %v749_v4 = vld [vmem:[%s6210_s12 + $0x78] sm:$0xff] }
 0x1cd   : > { %1909 = vmatmul.mubr.f32.gmra.mrb[172].mxu0 %v630_v5  ;;  %931 = vperm.xlu1 %5641, %v749_v4   ;;  %v781_v4 = vld [vmem:[%s6210_s12 + $0x178] sm:$0xff] }
 0x1ce   : > { %1913 = vmatprep.mubr.f32.mxu0 %v635_v6 }
 0x1cf   : > { %3281 = vmatmul.mubr.f32.gmra.mrb[172].mxu1 %v630_v5  ;;  %v748_v5 = vld [vmem:[%s6210_s12 + $0x70] sm:$0xff] }
 0x1d0   : > { %3285 = vmatprep.mubr.f32.mxu1 %v635_v6  ;;  %v726_v6 = vld [vmem:[%s5991_s7 + $0xdc0] sm:$0xff]  ;;  %926 = vperm.xlu0 %5640, %v748_v5   ;;  %v780_v5 = vld [vmem:[%s6210_s12 + $0x170] sm:$0xff] }
 0x1d1   : > { %1914 = vmatmul.mubr.f32.gmra.mrb[174].mxu0 %v634_v7 }
 0x1d2   : > { %1918 = vmatprep.mubr.f32.mxu0 %v639_v8 }
 0x1d3   : > { %3286 = vmatmul.mubr.f32.gmra.mrb[174].mxu1 %v634_v7  ;;  %v731_v7 = vld [vmem:[%s5991_s7 + $0xde8] sm:$0xff] }
 0x1d4   : > { %3290 = vmatprep.mubr.f32.mxu1 %v639_v8  ;;  %v751_v8 = vld [vmem:[%s6210_s12 + $0x88] sm:$0xff] }
 0x1d5   : > { %1919 = vmatmul.mubr.f32.gmra.mrb[176].mxu0 %v638_v9  ;;  %941 = vperm.xlu1 %5641, %v751_v8   ;;  %v783_v8 = vld [vmem:[%s6210_s12 + $0x188] sm:$0xff] }
 0x1d6   : > { %1923 = vmatprep.mubr.f32.mxu0 %v643_v10 }
 0x1d7   : > { %3291 = vmatmul.mubr.f32.gmra.mrb[176].mxu1 %v638_v9  ;;  %v750_v9 = vld [vmem:[%s6210_s12 + $0x80] sm:$0xff] }
 0x1d8   : > { %3295 = vmatprep.mubr.f32.mxu1 %v643_v10  ;;  %v730_v10 = vld [vmem:[%s5991_s7 + $0xde0] sm:$0xff]  ;;  %936 = vperm.xlu0 %5640, %v750_v9  }
 0x1d9   : > { %1924 = vmatmul.mubr.f32.gmra.mrb[178].mxu0 %v642_v11  ;;  %v782_v9 = vld [vmem:[%s6210_s12 + $0x180] sm:$0xff] }
 0x1da   : > { %1928 = vmatprep.mubr.f32.mxu0 %v647_v12 }
 0x1db   : > { %3296 = vmatmul.mubr.f32.gmra.mrb[178].mxu1 %v642_v11  ;;  %v289_v11 = vld [vmem:[%s5991_s7 + $0x18] sm:$0xff] }
 0x1dc   : > { %3300 = vmatprep.mubr.f32.mxu1 %v647_v12  ;;  %v753_v12 = vld [vmem:[%s6210_s12 + $0x98] sm:$0xff] }
 0x1dd   : > { %1929 = vmatmul.mubr.f32.gmra.mrb[180].mxu0 %v646_v13  ;;  %951 = vperm.xlu1 %5641, %v753_v12   ;;  %v785_v12 = vld [vmem:[%s6210_s12 + $0x198] sm:$0xff] }
 0x1de   : > { %1933 = vmatprep.mubr.f32.mxu0 %v651_v14 }
 0x1df   : > { %3301 = vmatmul.mubr.f32.gmra.mrb[180].mxu1 %v646_v13  ;;  %v752_v13 = vld [vmem:[%s6210_s12 + $0x90] sm:$0xff] }
 0x1e0   : > { %3305 = vmatprep.mubr.f32.mxu1 %v651_v14  ;;  %v288_v14 = vld [vmem:[%s5991_s7 + $0x10] sm:$0xff]  ;;  %946 = vperm.xlu0 %5640, %v752_v13  }
 0x1e1   : > { %1934 = vmatmul.mubr.f32.gmra.mrb[182].mxu0 %v650_v15  ;;  %v784_v13 = vld [vmem:[%s6210_s12 + $0x190] sm:$0xff] }
 0x1e2   : > { %1938 = vmatprep.mubr.f32.mxu0 %v655_v16 }
 0x1e3   : > { %3306 = vmatmul.mubr.f32.gmra.mrb[182].mxu1 %v650_v15  ;;  %v293_v15 = vld [vmem:[%s5991_s7 + $0x38] sm:$0xff] }
 0x1e4   : > { %3310 = vmatprep.mubr.f32.mxu1 %v655_v16  ;;  %v755_v16 = vld [vmem:[%s6210_s12 + $0xa8] sm:$0xff] }
 0x1e5   : > { %1939 = vmatmul.mubr.f32.gmra.mrb[184].mxu0 %v654_v17  ;;  %961 = vperm.xlu1 %5641, %v755_v16   ;;  %v787_v16 = vld [vmem:[%s6210_s12 + $0x1a8] sm:$0xff] }
 0x1e6   : > { %1943 = vmatprep.mubr.f32.mxu0 %v659_v18 }
 0x1e7   : > { %3311 = vmatmul.mubr.f32.gmra.mrb[184].mxu1 %v654_v17  ;;  %v754_v17 = vld [vmem:[%s6210_s12 + $0xa0] sm:$0xff] }
 0x1e8   : > { %3315 = vmatprep.mubr.f32.mxu1 %v659_v18  ;;  %v292_v18 = vld [vmem:[%s5991_s7 + $0x30] sm:$0xff]  ;;  %956 = vperm.xlu0 %5640, %v754_v17   ;;  %v786_v17 = vld [vmem:[%s6210_s12 + $0x1a0] sm:$0xff] }
 0x1e9   : > { %1944 = vmatmul.mubr.f32.gmra.mrb[186].mxu0 %v658_v19 }
 0x1ea   : > { %1948 = vmatprep.mubr.f32.mxu0 %v663_v20 }
 0x1eb   : > { %3316 = vmatmul.mubr.f32.gmra.mrb[186].mxu1 %v658_v19  ;;  %v297_v19 = vld [vmem:[%s5991_s7 + $0x58] sm:$0xff] }
 0x1ec   : > { %3320 = vmatprep.mubr.f32.mxu1 %v663_v20  ;;  %v757_v20 = vld [vmem:[%s6210_s12 + $0xb8] sm:$0xff] }
 0x1ed   : > { %1949 = vmatmul.mubr.f32.gmra.mrb[188].mxu0 %v662_v21  ;;  %971 = vperm.xlu1 %5641, %v757_v20   ;;  %v789_v20 = vld [vmem:[%s6210_s12 + $0x1b8] sm:$0xff] }
 0x1ee   : > { %1953 = vmatprep.mubr.f32.mxu0 %v667_v22 }
 0x1ef   : > { %3321 = vmatmul.mubr.f32.gmra.mrb[188].mxu1 %v662_v21  ;;  %v756_v21 = vld [vmem:[%s6210_s12 + $0xb0] sm:$0xff] }
 0x1f0   : > { %3325 = vmatprep.mubr.f32.mxu1 %v667_v22  ;;  %v296_v22 = vld [vmem:[%s5991_s7 + $0x50] sm:$0xff]  ;;  %966 = vperm.xlu0 %5640, %v756_v21  }
 0x1f1   : > { %1954 = vmatmul.mubr.f32.gmra.mrb[190].mxu0 %v666_v23  ;;  %v788_v21 = vld [vmem:[%s6210_s12 + $0x1b0] sm:$0xff] }
 0x1f2   : > { %1958 = vmatprep.mubr.f32.mxu0 %v671_v24 }
 0x1f3   : > { %3326 = vmatmul.mubr.f32.gmra.mrb[190].mxu1 %v666_v23  ;;  %v301_v23 = vld [vmem:[%s5991_s7 + $0x78] sm:$0xff] }
 0x1f4   : > { %3330 = vmatprep.mubr.f32.mxu1 %v671_v24  ;;  %v759_v24 = vld [vmem:[%s6210_s12 + $0xc8] sm:$0xff] }
 0x1f5   : > { %1959 = vmatmul.mubr.f32.gmra.mrb[192].mxu0 %v670_v25  ;;  %981 = vperm.xlu1 %5641, %v759_v24   ;;  %v791_v24 = vld [vmem:[%s6210_s12 + $0x1c8] sm:$0xff] }
 0x1f6   : > { %1963 = vmatprep.mubr.f32.mxu0 %v675_v26 }
 0x1f7   : > { %3331 = vmatmul.mubr.f32.gmra.mrb[192].mxu1 %v670_v25  ;;  %v758_v25 = vld [vmem:[%s6210_s12 + $0xc0] sm:$0xff] }
 0x1f8   : > { %3335 = vmatprep.mubr.f32.mxu1 %v675_v26  ;;  %v300_v26 = vld [vmem:[%s5991_s7 + $0x70] sm:$0xff]  ;;  %976 = vperm.xlu0 %5640, %v758_v25   ;;  %v790_v25 = vld [vmem:[%s6210_s12 + $0x1c0] sm:$0xff] }
 0x1f9   : > { %1964 = vmatmul.mubr.f32.gmra.mrb[194].mxu0 %v674_v27 }
 0x1fa   : > { %1968 = vmatprep.mubr.f32.mxu0 %v679_v28 }
 0x1fb   : > { %3336 = vmatmul.mubr.f32.gmra.mrb[194].mxu1 %v674_v27  ;;  %v305_v27 = vld [vmem:[%s5991_s7 + $0x98] sm:$0xff] }
 0x1fc   : > { %3340 = vmatprep.mubr.f32.mxu1 %v679_v28  ;;  %v761_v28 = vld [vmem:[%s6210_s12 + $0xd8] sm:$0xff] }
 0x1fd   : > { %1969 = vmatmul.mubr.f32.gmra.mrb[196].mxu0 %v678_v29  ;;  %991 = vperm.xlu1 %5641, %v761_v28   ;;  %v793_v28 = vld [vmem:[%s6210_s12 + $0x1d8] sm:$0xff] }
 0x1fe   : > { %1973 = vmatprep.mubr.f32.mxu0 %v683_v30 }
 0x1ff   : > { %3341 = vmatmul.mubr.f32.gmra.mrb[196].mxu1 %v678_v29  ;;  %v760_v29 = vld [vmem:[%s6210_s12 + $0xd0] sm:$0xff] }
 0x200   : > { %3345 = vmatprep.mubr.f32.mxu1 %v683_v30  ;;  %v304_v30 = vld [vmem:[%s5991_s7 + $0x90] sm:$0xff]  ;;  %986 = vperm.xlu0 %5640, %v760_v29  }
 0x201   : > { %1974 = vmatmul.mubr.f32.gmra.mrb[198].mxu0 %v682_v31  ;;  %v792_v29 = vld [vmem:[%s6210_s12 + $0x1d0] sm:$0xff] }
 0x202   : > { %1978 = vmatprep.mubr.f32.mxu0 %v687_v32 }
 0x203   : > { %3346 = vmatmul.mubr.f32.gmra.mrb[198].mxu1 %v682_v31  ;;  %v309_v31 = vld [vmem:[%s5991_s7 + $0xb8] sm:$0xff] }
 0x204   : > { %3350 = vmatprep.mubr.f32.mxu1 %v687_v32  ;;  %v763_v32 = vld [vmem:[%s6210_s12 + $0xe8] sm:$0xff] }
 0x205   : > { %1979 = vmatmul.mubr.f32.gmra.mrb[200].mxu0 %v686_v33  ;;  %1001 = vperm.xlu1 %5641, %v763_v32   ;;  %v795_v32 = vld [vmem:[%s6210_s12 + $0x1e8] sm:$0xff] }
 0x206   : > { %1983 = vmatprep.mubr.f32.mxu0 %v691_v34 }
 0x207   : > { %3351 = vmatmul.mubr.f32.gmra.mrb[200].mxu1 %v686_v33  ;;  %v762_v33 = vld [vmem:[%s6210_s12 + $0xe0] sm:$0xff] }
 0x208   : > { %3355 = vmatprep.mubr.f32.mxu1 %v691_v34  ;;  %v308_v34 = vld [vmem:[%s5991_s7 + $0xb0] sm:$0xff]  ;;  %996 = vperm.xlu0 %5640, %v762_v33   ;;  %v794_v33 = vld [vmem:[%s6210_s12 + $0x1e0] sm:$0xff] }
 0x209   : > { %1984 = vmatmul.mubr.f32.gmra.mrb[202].mxu0 %v690_v35 }
 0x20a   : > { %1988 = vmatprep.mubr.f32.mxu0 %v695_v36 }
 0x20b   : > { %3356 = vmatmul.mubr.f32.gmra.mrb[202].mxu1 %v690_v35  ;;  %v313_v35 = vld [vmem:[%s5991_s7 + $0xd8] sm:$0xff] }
 0x20c   : > { %3360 = vmatprep.mubr.f32.mxu1 %v695_v36  ;;  %v765_v36 = vld [vmem:[%s6210_s12 + $0xf8] sm:$0xff]  ;;  %1006 = vperm.xlu0 %5640, %v764_v37   ;;  %v796_v37 = vld [vmem:[%s6210_s12 + $0x1f0] sm:$0xff] }
 0x20d   : > { %1989 = vmatmul.mubr.f32.gmra.mrb[204].mxu0 %v694_v39  ;;  %1011 = vperm.xlu1 %5641, %v765_v36   ;;  %v797_v36 = vld [vmem:[%s6210_s12 + $0x1f8] sm:$0xff] }
 0x20e   : > { %1993 = vmatprep.mubr.f32.mxu0 %v699_v40 }
 0x20f   : > { %3361 = vmatmul.mubr.f32.gmra.mrb[204].mxu1 %v694_v39  ;;  %v317_v39 = vld [vmem:[%s5991_s7 + $0xf8] sm:$0xff] }
 0x210   : > { %3365 = vmatprep.mubr.f32.mxu1 %v699_v40  ;;  %v767_v40 = vld [vmem:[%s6210_s12 + $0x108] sm:$0xff]  ;;  %1016 = vperm.xlu0 %5640, %v766_v41   ;;  %v798_v41 = vld [vmem:[%s6210_s12 + $0x200] sm:$0xff] }
 0x211   : > { %1994 = vmatmul.mubr.f32.gmra.mrb[206].mxu0 %v698_v43  ;;  %1021 = vperm.xlu1 %5641, %v767_v40   ;;  %v799_v40 = vld [vmem:[%s6210_s12 + $0x208] sm:$0xff] }
 0x212   : > { %1998 = vmatprep.mubr.f32.mxu0 %v703_v44 }
 0x213   : > { %3366 = vmatmul.mubr.f32.gmra.mrb[206].mxu1 %v698_v43  ;;  %v321_v43 = vld [vmem:[%s5991_s7 + $0x118] sm:$0xff] }
 0x214   : > { %3370 = vmatprep.mubr.f32.mxu1 %v703_v44  ;;  %v769_v44 = vld [vmem:[%s6210_s12 + $0x118] sm:$0xff]  ;;  %1026 = vperm.xlu0 %5640, %v768_v45   ;;  %v800_v45 = vld [vmem:[%s6210_s12 + $0x210] sm:$0xff] }
 0x215   : > { %1999 = vmatmul.mubr.f32.gmra.mrb[208].mxu0 %v702_v46  ;;  %1031 = vperm.xlu1 %5641, %v769_v44   ;;  %v801_v44 = vld [vmem:[%s6210_s12 + $0x218] sm:$0xff] }
 0x216   : > { %2003 = vmatprep.mubr.f32.mxu0 %v707_v47 }
 0x217   : > { %3371 = vmatmul.mubr.f32.gmra.mrb[208].mxu1 %v702_v46  ;;  %v320_v46 = vld [vmem:[%s5991_s7 + $0x110] sm:$0xff] }
 0x218   : > { %3375 = vmatprep.mubr.f32.mxu1 %v707_v47  ;;  %v325_v47 = vld [vmem:[%s5991_s7 + $0x138] sm:$0xff]  ;;  %1036 = vperm.xlu0 %5640, %v770_v49   ;;  %v802_v49 = vld [vmem:[%s6210_s12 + $0x220] sm:$0xff] }
 0x219   : > { %2004 = vmatmul.mubr.f32.gmra.mrb[210].mxu0 %v706_v50  ;;  %1041 = vperm.xlu1 %5641, %v771_v48   ;;  %v803_v48 = vld [vmem:[%s6210_s12 + $0x228] sm:$0xff] }
 0x21a   : > { %2008 = vmatprep.mubr.f32.mxu0 %v711_v51 }
 0x21b   : > { %3376 = vmatmul.mubr.f32.gmra.mrb[210].mxu1 %v706_v50  ;;  %v324_v50 = vld [vmem:[%s5991_s7 + $0x130] sm:$0xff] }
 0x21c   : > { %3380 = vmatprep.mubr.f32.mxu1 %v711_v51  ;;  %v329_v51 = vld [vmem:[%s5991_s7 + $0x158] sm:$0xff]  ;;  %1046 = vperm.xlu0 %5640, %v772_v53   ;;  %v804_v53 = vld [vmem:[%s6210_s12 + $0x230] sm:$0xff] }
 0x21d   : > { %2009 = vmatmul.mubr.f32.gmra.mrb[212].mxu0 %v710_v54  ;;  %1051 = vperm.xlu1 %5641, %v773_v52   ;;  %v805_v52 = vld [vmem:[%s6210_s12 + $0x238] sm:$0xff] }
 0x21e   : > { %2013 = vmatprep.mubr.f32.mxu0 %v715_v55 }
 0x21f   : > { %3381 = vmatmul.mubr.f32.gmra.mrb[212].mxu1 %v710_v54  ;;  %v328_v54 = vld [vmem:[%s5991_s7 + $0x150] sm:$0xff] }
 0x220   : > { %3385 = vmatprep.mubr.f32.mxu1 %v715_v55  ;;  %v333_v55 = vld [vmem:[%s5991_s7 + $0x178] sm:$0xff]  ;;  %1056 = vperm.xlu0 %5640, %v774_v57   ;;  %v806_v57 = vld [vmem:[%s6210_s12 + $0x240] sm:$0xff] }
 0x221   : > { %2014 = vmatmul.mubr.f32.gmra.mrb[214].mxu0 %v714_v58  ;;  %1061 = vperm.xlu1 %5641, %v775_v56   ;;  %v807_v56 = vld [vmem:[%s6210_s12 + $0x248] sm:$0xff] }
 0x222   : > { %2018 = vmatprep.mubr.f32.mxu0 %v719_v59 }
 0x223   : > { %3386 = vmatmul.mubr.f32.gmra.mrb[214].mxu1 %v714_v58  ;;  %v332_v58 = vld [vmem:[%s5991_s7 + $0x170] sm:$0xff] }
 0x224   : > { %3390 = vmatprep.mubr.f32.mxu1 %v719_v59  ;;  %v337_v59 = vld [vmem:[%s5991_s7 + $0x198] sm:$0xff]  ;;  %1066 = vperm.xlu0 %5640, %v776_v61   ;;  %v808_v61 = vld [vmem:[%s6210_s12 + $0x250] sm:$0xff] }
 0x225   : > { %2019 = vmatmul.mubr.f32.gmra.mrb[216].mxu0 %v718_v62  ;;  %1071 = vperm.xlu1 %5641, %v777_v60   ;;  %v809_v60 = vld [vmem:[%s6210_s12 + $0x258] sm:$0xff] }
 0x226   : > { %2023 = vmatprep.mubr.f32.mxu0 %v723_v63 }
 0x227   : > { %3391 = vmatmul.mubr.f32.gmra.mrb[216].mxu1 %v718_v62  ;;  %v336_v62 = vld [vmem:[%s5991_s7 + $0x190] sm:$0xff] }
 0x228   : > { %3395 = vmatprep.mubr.f32.mxu1 %v723_v63  ;;  %v341_v63 = vld [vmem:[%s5991_s7 + $0x1b8] sm:$0xff]  ;;  %1076 = vperm.xlu0 %5640, %v778_v1   ;;  %v810_v1 = vld [vmem:[%s6210_s12 + $0x260] sm:$0xff] }
 0x229   : > { %2024 = vmatmul.mubr.f32.gmra.mrb[218].mxu0 %v722_v2  ;;  %1081 = vperm.xlu1 %5641, %v779_v0   ;;  %v811_v0 = vld [vmem:[%s6210_s12 + $0x268] sm:$0xff] }
 0x22a   : > { %2028 = vmatprep.mubr.f32.mxu0 %v727_v3 }
 0x22b   : > { %3396 = vmatmul.mubr.f32.gmra.mrb[218].mxu1 %v722_v2  ;;  %v340_v2 = vld [vmem:[%s5991_s7 + $0x1b0] sm:$0xff] }
 0x22c   : > { %3400 = vmatprep.mubr.f32.mxu1 %v727_v3  ;;  %v345_v3 = vld [vmem:[%s5991_s7 + $0x1d8] sm:$0xff]  ;;  %1086 = vperm.xlu0 %5640, %v780_v5   ;;  %v812_v5 = vld [vmem:[%s6210_s12 + $0x270] sm:$0xff] }
 0x22d   : > { %2029 = vmatmul.mubr.f32.gmra.mrb[220].mxu0 %v726_v6  ;;  %1091 = vperm.xlu1 %5641, %v781_v4   ;;  %v813_v4 = vld [vmem:[%s6210_s12 + $0x278] sm:$0xff] }
 0x22e   : > { %2033 = vmatprep.mubr.f32.mxu0 %v731_v7 }
 0x22f   : > { %3401 = vmatmul.mubr.f32.gmra.mrb[220].mxu1 %v726_v6  ;;  %v344_v6 = vld [vmem:[%s5991_s7 + $0x1d0] sm:$0xff] }
 0x230   : > { %3405 = vmatprep.mubr.f32.mxu1 %v731_v7  ;;  %v349_v7 = vld [vmem:[%s5991_s7 + $0x1f8] sm:$0xff]  ;;  %1096 = vperm.xlu0 %5640, %v782_v9   ;;  %v814_v9 = vld [vmem:[%s6210_s12 + $0x280] sm:$0xff] }
 0x231   : > { %2034 = vmatmul.mubr.f32.gmra.mrb[222].mxu0 %v730_v10  ;;  %1101 = vperm.xlu1 %5641, %v783_v8   ;;  %v815_v8 = vld [vmem:[%s6210_s12 + $0x288] sm:$0xff] }
 0x232   : > { %2103 = vmatprep.mubr.f32.mxu0 %v289_v11 }
 0x233   : > { %3406 = vmatmul.mubr.f32.gmra.mrb[222].mxu1 %v730_v10  ;;  %v348_v10 = vld [vmem:[%s5991_s7 + $0x1f0] sm:$0xff] }
 0x234   : > { %3475 = vmatprep.mubr.f32.mxu1 %v289_v11  ;;  %v353_v11 = vld [vmem:[%s5991_s7 + $0x218] sm:$0xff]  ;;  %1106 = vperm.xlu0 %5640, %v784_v13   ;;  %v816_v13 = vld [vmem:[%s6210_s12 + $0x290] sm:$0xff] }
 0x235   : > { %2104 = vmatmul.mubr.f32.vlgmr.msra.gmra.mrb[0].mxu0 %v288_v14  ;;  %1111 = vperm.xlu1 %5641, %v785_v12   ;;  %v817_v12 = vld [vmem:[%s6210_s12 + $0x298] sm:$0xff] }
 0x236   : > { %2108 = vmatprep.mubr.f32.mxu0 %v293_v15 }
 0x237   : > { %3476 = vmatmul.mubr.f32.vlgmr.msra.gmra.mrb[0].mxu1 %v288_v14  ;;  %v352_v14 = vld [vmem:[%s5991_s7 + $0x210] sm:$0xff] }
 0x238   : > { %3480 = vmatprep.mubr.f32.mxu1 %v293_v15  ;;  %v357_v15 = vld [vmem:[%s5991_s7 + $0x238] sm:$0xff]  ;;  %1116 = vperm.xlu0 %5640, %v786_v17   ;;  %v818_v17 = vld [vmem:[%s6210_s12 + $0x2a0] sm:$0xff] }
 0x239   : > { %2109 = vmatmul.mubr.f32.gmra.mrb[2].mxu0 %v292_v18  ;;  %1121 = vperm.xlu1 %5641, %v787_v16   ;;  %v819_v16 = vld [vmem:[%s6210_s12 + $0x2a8] sm:$0xff] }
 0x23a   : > { %2113 = vmatprep.mubr.f32.mxu0 %v297_v19 }
 0x23b   : > { %3481 = vmatmul.mubr.f32.gmra.mrb[2].mxu1 %v292_v18  ;;  %v356_v18 = vld [vmem:[%s5991_s7 + $0x230] sm:$0xff] }
 0x23c   : > { %3485 = vmatprep.mubr.f32.mxu1 %v297_v19  ;;  %v361_v19 = vld [vmem:[%s5991_s7 + $0x258] sm:$0xff]  ;;  %1126 = vperm.xlu0 %5640, %v788_v21   ;;  %v820_v21 = vld [vmem:[%s6210_s12 + $0x2b0] sm:$0xff] }
 0x23d   : > { %2114 = vmatmul.mubr.f32.gmra.mrb[4].mxu0 %v296_v22  ;;  %1131 = vperm.xlu1 %5641, %v789_v20   ;;  %v821_v20 = vld [vmem:[%s6210_s12 + $0x2b8] sm:$0xff] }
 0x23e   : > { %2118 = vmatprep.mubr.f32.mxu0 %v301_v23 }
 0x23f   : > { %3486 = vmatmul.mubr.f32.gmra.mrb[4].mxu1 %v296_v22  ;;  %v360_v22 = vld [vmem:[%s5991_s7 + $0x250] sm:$0xff] }
 0x240   : > { %3490 = vmatprep.mubr.f32.mxu1 %v301_v23  ;;  %v365_v23 = vld [vmem:[%s5991_s7 + $0x278] sm:$0xff]  ;;  %1136 = vperm.xlu0 %5640, %v790_v25   ;;  %v822_v25 = vld [vmem:[%s6210_s12 + $0x2c0] sm:$0xff] }
 0x241   : > { %2119 = vmatmul.mubr.f32.gmra.mrb[6].mxu0 %v300_v26  ;;  %1141 = vperm.xlu1 %5641, %v791_v24   ;;  %v823_v24 = vld [vmem:[%s6210_s12 + $0x2c8] sm:$0xff] }
 0x242   : > { %2123 = vmatprep.mubr.f32.mxu0 %v305_v27 }
 0x243   : > { %3491 = vmatmul.mubr.f32.gmra.mrb[6].mxu1 %v300_v26  ;;  %v364_v26 = vld [vmem:[%s5991_s7 + $0x270] sm:$0xff] }
 0x244   : > { %3495 = vmatprep.mubr.f32.mxu1 %v305_v27  ;;  %v369_v27 = vld [vmem:[%s5991_s7 + $0x298] sm:$0xff]  ;;  %1146 = vperm.xlu0 %5640, %v792_v29   ;;  %v824_v29 = vld [vmem:[%s6210_s12 + $0x2d0] sm:$0xff] }
 0x245   : > { %2124 = vmatmul.mubr.f32.gmra.mrb[8].mxu0 %v304_v30  ;;  %1151 = vperm.xlu1 %5641, %v793_v28   ;;  %v825_v28 = vld [vmem:[%s6210_s12 + $0x2d8] sm:$0xff] }
 0x246   : > { %2128 = vmatprep.mubr.f32.mxu0 %v309_v31 }
 0x247   : > { %3496 = vmatmul.mubr.f32.gmra.mrb[8].mxu1 %v304_v30  ;;  %v368_v30 = vld [vmem:[%s5991_s7 + $0x290] sm:$0xff] }
 0x248   : > { %3500 = vmatprep.mubr.f32.mxu1 %v309_v31  ;;  %v373_v31 = vld [vmem:[%s5991_s7 + $0x2b8] sm:$0xff]  ;;  %1156 = vperm.xlu0 %5640, %v794_v33   ;;  %v826_v33 = vld [vmem:[%s6210_s12 + $0x2e0] sm:$0xff] }
 0x249   : > { %2129 = vmatmul.mubr.f32.gmra.mrb[10].mxu0 %v308_v34  ;;  %1161 = vperm.xlu1 %5641, %v795_v32   ;;  %v827_v32 = vld [vmem:[%s6210_s12 + $0x2e8] sm:$0xff] }
 0x24a   : > { %2133 = vmatprep.mubr.f32.mxu0 %v313_v35 }
 0x24b   : > { %3501 = vmatmul.mubr.f32.gmra.mrb[10].mxu1 %v308_v34  ;;  %v372_v34 = vld [vmem:[%s5991_s7 + $0x2b0] sm:$0xff] }
 0x24c   : > { %3505 = vmatprep.mubr.f32.mxu1 %v313_v35  ;;  %v377_v35 = vld [vmem:[%s5991_s7 + $0x2d8] sm:$0xff]  ;;  %1166 = vperm.xlu0 %5640, %v796_v37   ;;  %v6404_v37 = vpop.permute.xlu0 %856 }
 0x24d   : > { %2134 = vmatmul.mubr.f32.gmra.mrb[12].mxu0 %v312_v38  ;;  %1171 = vperm.xlu1 %5641, %v797_v36   ;;  %v6402_v36 = vpop.permute.xlu1 %866 }
 0x24e   : > { %2138 = vmatprep.mubr.f32.mxu0 %v317_v39 }
 0x24f   : > { %3506 = vmatmul.mubr.f32.gmra.mrb[12].mxu1 %v312_v38  ;;  %v376_v38 = vld [vmem:[%s5991_s7 + $0x2d0] sm:$0xff] }
 0x250   : > { %3510 = vmatprep.mubr.f32.mxu1 %v317_v39  ;;  %v381_v39 = vld [vmem:[%s5991_s7 + $0x2f8] sm:$0xff]  ;;  %1176 = vperm.xlu0 %5640, %v798_v41  }
 0x251   : > { %2139 = vmatmul.mubr.f32.gmra.mrb[14].mxu0 %v316_v42  ;;  %1181 = vperm.xlu1 %5641, %v799_v40   ;;  %v440_v40 = vld [vmem:[%s5991_s7 + $0x4d0] sm:$0xff]  ;;  %v445_v41 = vld [vmem:[%s5991_s7 + $0x4f8] sm:$0xff] }
 0x252   : > { %2143 = vmatprep.mubr.f32.mxu0 %v321_v43 }
 0x253   : > { %3511 = vmatmul.mubr.f32.gmra.mrb[14].mxu1 %v316_v42  ;;  %v380_v42 = vld [vmem:[%s5991_s7 + $0x2f0] sm:$0xff] }
 0x254   : > { %3515 = vmatprep.mubr.f32.mxu1 %v321_v43  ;;  %v385_v43 = vld [vmem:[%s5991_s7 + $0x318] sm:$0xff]  ;;  %1186 = vperm.xlu0 %5640, %v800_v45   ;;  %v6413_v45 = vpop.permute.xlu1 %871 }
 0x255   : > { %2144 = vmatmul.mubr.f32.gmra.mrb[16].mxu0 %v320_v46  ;;  %1191 = vperm.xlu1 %5641, %v801_v44   ;;  %v444_v44 = vld [vmem:[%s5991_s7 + $0x4f0] sm:$0xff] }
 0x256   : > { %2148 = vmatprep.mubr.f32.mxu0 %v325_v47 }
 0x257   : > { %3516 = vmatmul.mubr.f32.gmra.mrb[16].mxu1 %v320_v46  ;;  %v384_v46 = vld [vmem:[%s5991_s7 + $0x310] sm:$0xff] }
 0x258   : > { %3520 = vmatprep.mubr.f32.mxu1 %v325_v47  ;;  %v389_v47 = vld [vmem:[%s5991_s7 + $0x338] sm:$0xff]  ;;  %1196 = vperm.xlu0 %5640, %v802_v49   ;;  %v832_v49 = vld [vmem:[%s6210_s12 + $0x310] sm:$0xff] }
 0x259   : > { %2149 = vmatmul.mubr.f32.gmra.mrb[18].mxu0 %v324_v50  ;;  %1201 = vperm.xlu1 %5641, %v803_v48   ;;  %v833_v48 = vld [vmem:[%s6210_s12 + $0x318] sm:$0xff] }
 0x25a   : > { %2153 = vmatprep.mubr.f32.mxu0 %v329_v51 }
 0x25b   : > { %3521 = vmatmul.mubr.f32.gmra.mrb[18].mxu1 %v324_v50  ;;  %v388_v50 = vld [vmem:[%s5991_s7 + $0x330] sm:$0xff] }
 0x25c   : > { %3525 = vmatprep.mubr.f32.mxu1 %v329_v51  ;;  %v393_v51 = vld [vmem:[%s5991_s7 + $0x358] sm:$0xff]  ;;  %1206 = vperm.xlu0 %5640, %v804_v53   ;;  %v6424_v53 = vpop.permute.xlu1 %881 }
 0x25d   : > { %2154 = vmatmul.mubr.f32.gmra.mrb[20].mxu0 %v328_v54  ;;  %1211 = vperm.xlu1 %5641, %v805_v52  }
 0x25e   : > { %2158 = vmatprep.mubr.f32.mxu0 %v333_v55 }
 0x25f   : > { %3526 = vmatmul.mubr.f32.gmra.mrb[20].mxu1 %v328_v54  ;;  %v392_v54 = vld [vmem:[%s5991_s7 + $0x350] sm:$0xff] }
 0x260   : > { %3530 = vmatprep.mubr.f32.mxu1 %v333_v55  ;;  %v397_v55 = vld [vmem:[%s5991_s7 + $0x378] sm:$0xff]  ;;  %1216 = vperm.xlu0 %5640, %v806_v57  }
 0x261   : > { %2159 = vmatmul.mubr.f32.gmra.mrb[22].mxu0 %v332_v58  ;;  %1221 = vperm.xlu1 %5641, %v807_v56   ;;  %v452_v56 = vld [vmem:[%s5991_s7 + $0x530] sm:$0xff]  ;;  %v457_v57 = vld [vmem:[%s5991_s7 + $0x558] sm:$0xff] }
 0x262   : > { %2163 = vmatprep.mubr.f32.mxu0 %v337_v59 }
 0x263   : > { %3531 = vmatmul.mubr.f32.gmra.mrb[22].mxu1 %v332_v58  ;;  %v396_v58 = vld [vmem:[%s5991_s7 + $0x370] sm:$0xff] }
 0x264   : > { %3535 = vmatprep.mubr.f32.mxu1 %v337_v59  ;;  %v401_v59 = vld [vmem:[%s5991_s7 + $0x398] sm:$0xff]  ;;  %1226 = vperm.xlu0 %5640, %v808_v61   ;;  %v456_v61 = vld [vmem:[%s5991_s7 + $0x550] sm:$0xff] }
 0x265   : > { %2164 = vmatmul.mubr.f32.gmra.mrb[24].mxu0 %v336_v62  ;;  %1231 = vperm.xlu1 %5641, %v809_v60   ;;  %v836_v60 = vld [vmem:[%s6210_s12 + $0x330] sm:$0xff] }
 0x266   : > { %2168 = vmatprep.mubr.f32.mxu0 %v341_v63 }
 0x267   : > { %3536 = vmatmul.mubr.f32.gmra.mrb[24].mxu1 %v336_v62  ;;  %v400_v62 = vld [vmem:[%s5991_s7 + $0x390] sm:$0xff] }
 0x268   : > { %3540 = vmatprep.mubr.f32.mxu1 %v341_v63  ;;  %v405_v63 = vld [vmem:[%s5991_s7 + $0x3b8] sm:$0xff]  ;;  %1236 = vperm.xlu0 %5640, %v810_v1   ;;  %v838_v1 = vld [vmem:[%s6210_s12 + $0x340] sm:$0xff] }
 0x269   : > { %2169 = vmatmul.mubr.f32.gmra.mrb[26].mxu0 %v340_v2  ;;  %1241 = vperm.xlu1 %5641, %v811_v0   ;;  %v839_v0 = vld [vmem:[%s6210_s12 + $0x348] sm:$0xff] }
 0x26a   : > { %2173 = vmatprep.mubr.f32.mxu0 %v345_v3 }
 0x26b   : > { %3541 = vmatmul.mubr.f32.gmra.mrb[26].mxu1 %v340_v2  ;;  %v404_v2 = vld [vmem:[%s5991_s7 + $0x3b0] sm:$0xff] }
 0x26c   : > { %3545 = vmatprep.mubr.f32.mxu1 %v345_v3  ;;  %v409_v3 = vld [vmem:[%s5991_s7 + $0x3d8] sm:$0xff]  ;;  %1246 = vperm.xlu0 %5640, %v812_v5  }
 0x26d   : > { %2174 = vmatmul.mubr.f32.gmra.mrb[28].mxu0 %v344_v6  ;;  %1251 = vperm.xlu1 %5641, %v813_v4  }
 0x26e   : > { %2178 = vmatprep.mubr.f32.mxu0 %v349_v7 }
 0x26f   : > { %3546 = vmatmul.mubr.f32.gmra.mrb[28].mxu1 %v344_v6  ;;  %v408_v6 = vld [vmem:[%s5991_s7 + $0x3d0] sm:$0xff] }
 0x270   : > { %3550 = vmatprep.mubr.f32.mxu1 %v349_v7  ;;  %v413_v7 = vld [vmem:[%s5991_s7 + $0x3f8] sm:$0xff]  ;;  %1256 = vperm.xlu0 %5640, %v814_v9  }
 0x271   : > { %2179 = vmatmul.mubr.f32.gmra.mrb[30].mxu0 %v348_v10  ;;  %1261 = vperm.xlu1 %5641, %v815_v8   ;;  %v464_v8 = vld [vmem:[%s5991_s7 + $0x590] sm:$0xff]  ;;  %v469_v9 = vld [vmem:[%s5991_s7 + $0x5b8] sm:$0xff] }
 0x272   : > { %2183 = vmatprep.mubr.f32.mxu0 %v353_v11 }
 0x273   : > { %3551 = vmatmul.mubr.f32.gmra.mrb[30].mxu1 %v348_v10  ;;  %v412_v10 = vld [vmem:[%s5991_s7 + $0x3f0] sm:$0xff] }
 0x274   : > { %3555 = vmatprep.mubr.f32.mxu1 %v353_v11  ;;  %v417_v11 = vld [vmem:[%s5991_s7 + $0x418] sm:$0xff]  ;;  %1266 = vperm.xlu0 %5640, %v816_v13   ;;  %v468_v13 = vld [vmem:[%s5991_s7 + $0x5b0] sm:$0xff] }
 0x275   : > { %2184 = vmatmul.mubr.f32.gmra.mrb[32].mxu0 %v352_v14  ;;  %1271 = vperm.xlu1 %5641, %v817_v12   ;;  %v842_v12 = vld [vmem:[%s6210_s12 + $0x360] sm:$0xff] }
 0x276   : > { %2188 = vmatprep.mubr.f32.mxu0 %v357_v15 }
 0x277   : > { %3556 = vmatmul.mubr.f32.gmra.mrb[32].mxu1 %v352_v14  ;;  %v416_v14 = vld [vmem:[%s5991_s7 + $0x410] sm:$0xff] }
 0x278   : > { %3560 = vmatprep.mubr.f32.mxu1 %v357_v15  ;;  %v421_v15 = vld [vmem:[%s5991_s7 + $0x438] sm:$0xff]  ;;  %1276 = vperm.xlu0 %5640, %v818_v17   ;;  %v844_v17 = vld [vmem:[%s6210_s12 + $0x370] sm:$0xff] }
 0x279   : > { %2189 = vmatmul.mubr.f32.gmra.mrb[34].mxu0 %v356_v18  ;;  %1281 = vperm.xlu1 %5641, %v819_v16   ;;  %v845_v16 = vld [vmem:[%s6210_s12 + $0x378] sm:$0xff] }
 0x27a   : > { %2193 = vmatprep.mubr.f32.mxu0 %v361_v19 }
 0x27b   : > { %3561 = vmatmul.mubr.f32.gmra.mrb[34].mxu1 %v356_v18  ;;  %v420_v18 = vld [vmem:[%s5991_s7 + $0x430] sm:$0xff] }
 0x27c   : > { %3565 = vmatprep.mubr.f32.mxu1 %v361_v19  ;;  %v425_v19 = vld [vmem:[%s5991_s7 + $0x458] sm:$0xff]  ;;  %1286 = vperm.xlu0 %5640, %v820_v21  }
 0x27d   : > { %2194 = vmatmul.mubr.f32.gmra.mrb[36].mxu0 %v360_v22  ;;  %1291 = vperm.xlu1 %5641, %v821_v20  }
 0x27e   : > { %2198 = vmatprep.mubr.f32.mxu0 %v365_v23 }
 0x27f   : > { %3566 = vmatmul.mubr.f32.gmra.mrb[36].mxu1 %v360_v22  ;;  %v424_v22 = vld [vmem:[%s5991_s7 + $0x450] sm:$0xff] }
 0x280   : > { %3570 = vmatprep.mubr.f32.mxu1 %v365_v23  ;;  %v429_v23 = vld [vmem:[%s5991_s7 + $0x478] sm:$0xff]  ;;  %1296 = vperm.xlu0 %5640, %v822_v25  }
 0x281   : > { %2199 = vmatmul.mubr.f32.gmra.mrb[38].mxu0 %v364_v26  ;;  %1301 = vperm.xlu1 %5641, %v823_v24   ;;  %v480_v24 = vld [vmem:[%s5991_s7 + $0x610] sm:$0xff]  ;;  %v485_v25 = vld [vmem:[%s5991_s7 + $0x638] sm:$0xff] }
 0x282   : > { %2203 = vmatprep.mubr.f32.mxu0 %v369_v27 }
 0x283   : > { %3571 = vmatmul.mubr.f32.gmra.mrb[38].mxu1 %v364_v26  ;;  %v428_v26 = vld [vmem:[%s5991_s7 + $0x470] sm:$0xff] }
 0x284   : > { %3575 = vmatprep.mubr.f32.mxu1 %v369_v27  ;;  %v433_v27 = vld [vmem:[%s5991_s7 + $0x498] sm:$0xff]  ;;  %1306 = vperm.xlu0 %5640, %v824_v29  }
 0x285   : > { %2204 = vmatmul.mubr.f32.gmra.mrb[40].mxu0 %v368_v30  ;;  %1311 = vperm.xlu1 %5641, %v825_v28   ;;  %v488_v28 = vld [vmem:[%s5991_s7 + $0x650] sm:$0xff]  ;;  %v493_v29 = vld [vmem:[%s5991_s7 + $0x678] sm:$0xff] }
 0x286   : > { %2208 = vmatprep.mubr.f32.mxu0 %v373_v31 }
 0x287   : > { %3576 = vmatmul.mubr.f32.gmra.mrb[40].mxu1 %v368_v30  ;;  %v432_v30 = vld [vmem:[%s5991_s7 + $0x490] sm:$0xff] }
 0x288   : > { %3580 = vmatprep.mubr.f32.mxu1 %v373_v31  ;;  %v437_v31 = vld [vmem:[%s5991_s7 + $0x4b8] sm:$0xff]  ;;  %1316 = vperm.xlu0 %5640, %v826_v33  }
 0x289   : > { %2209 = vmatmul.mubr.f32.gmra.mrb[42].mxu0 %v372_v34  ;;  %1321 = vperm.xlu1 %5641, %v827_v32   ;;  %v496_v32 = vld [vmem:[%s5991_s7 + $0x690] sm:$0xff]  ;;  %v501_v33 = vld [vmem:[%s5991_s7 + $0x6b8] sm:$0xff] }
 0x28a   : > { %2213 = vmatprep.mubr.f32.mxu0 %v377_v35 }
 0x28b   : > { %3581 = vmatmul.mubr.f32.gmra.mrb[42].mxu1 %v372_v34  ;;  %v436_v34 = vld [vmem:[%s5991_s7 + $0x4b0] sm:$0xff] }
 0x28c   : > { %3585 = vmatprep.mubr.f32.mxu1 %v377_v35  ;;  %v441_v35 = vld [vmem:[%s5991_s7 + $0x4d8] sm:$0xff] }
 0x28d   : > { %2214 = vmatmul.mubr.f32.gmra.mrb[44].mxu0 %v376_v38 }
 0x28e   : > { %2218 = vmatprep.mubr.f32.mxu0 %v381_v39 }
 0x28f   : > { %3586 = vmatmul.mubr.f32.gmra.mrb[44].mxu1 %v376_v38  ;;  %v829_v38 = vld [vmem:[%s6210_s12 + $0x2f8] sm:$0xff] }
 0x290   : > { %3590 = vmatprep.mubr.f32.mxu1 %v381_v39  ;;  %v828_v39 = vld [vmem:[%s6210_s12 + $0x2f0] sm:$0xff]  ;;  %1331 = vperm.xlu1 %5641, %v829_v38  }
 0x291   : > { %2219 = vmatmul.mubr.f32.gmra.mrb[46].mxu0 %v380_v42  ;;  %1326 = vperm.xlu0 %5640, %v828_v39  }
 0x292   : > { %2223 = vmatprep.mubr.f32.mxu0 %v385_v43 }
 0x293   : > { %3591 = vmatmul.mubr.f32.gmra.mrb[46].mxu1 %v380_v42  ;;  %v831_v42 = vld [vmem:[%s6210_s12 + $0x308] sm:$0xff] }
 0x294   : > { %3595 = vmatprep.mubr.f32.mxu1 %v385_v43  ;;  %v830_v43 = vld [vmem:[%s6210_s12 + $0x300] sm:$0xff]  ;;  %1341 = vperm.xlu1 %5641, %v831_v42  }
 0x295   : > { %2224 = vmatmul.mubr.f32.gmra.mrb[48].mxu0 %v384_v46  ;;  %1336 = vperm.xlu0 %5640, %v830_v43  }
 0x296   : > { %2228 = vmatprep.mubr.f32.mxu0 %v389_v47 }
 0x297   : > { %3596 = vmatmul.mubr.f32.gmra.mrb[48].mxu1 %v384_v46  ;;  %v449_v46 = vld [vmem:[%s5991_s7 + $0x518] sm:$0xff] }
 0x298   : > { %3600 = vmatprep.mubr.f32.mxu1 %v389_v47  ;;  %v6416_v47 = vpop.permute.xlu0 %861  ;;  %1351 = vperm.xlu1 %5641, %v833_v48  }
 0x299   : > { %2229 = vmatmul.mubr.f32.gmra.mrb[50].mxu0 %v388_v50  ;;  %1346 = vperm.xlu0 %5640, %v832_v49  }
 0x29a   : > { %2233 = vmatprep.mubr.f32.mxu0 %v393_v51 }
 0x29b   : > { %3601 = vmatmul.mubr.f32.gmra.mrb[50].mxu1 %v388_v50  ;;  %v448_v50 = vld [vmem:[%s5991_s7 + $0x510] sm:$0xff] }
 0x29c   : > { %3605 = vmatprep.mubr.f32.mxu1 %v393_v51  ;;  %v453_v51 = vld [vmem:[%s5991_s7 + $0x538] sm:$0xff]  ;;  %v6422_v52 = vpop.permute.xlu0 %876 }
 0x29d   : > { %2234 = vmatmul.mubr.f32.gmra.mrb[52].mxu0 %v392_v54 }
 0x29e   : > { %2238 = vmatprep.mubr.f32.mxu0 %v397_v55 }
 0x29f   : > { %3606 = vmatmul.mubr.f32.gmra.mrb[52].mxu1 %v392_v54  ;;  %v835_v54 = vld [vmem:[%s6210_s12 + $0x328] sm:$0xff] }
 0x2a0   : > { %3610 = vmatprep.mubr.f32.mxu1 %v397_v55  ;;  %v834_v55 = vld [vmem:[%s6210_s12 + $0x320] sm:$0xff]  ;;  %1361 = vperm.xlu1 %5641, %v835_v54  }
 0x2a1   : > { %2239 = vmatmul.mubr.f32.gmra.mrb[54].mxu0 %v396_v58  ;;  %1356 = vperm.xlu0 %5640, %v834_v55   ;;  %v508_v55 = vld [vmem:[%s5991_s7 + $0x6f0] sm:$0xff] }
 0x2a2   : > { %2243 = vmatprep.mubr.f32.mxu0 %v401_v59 }
 0x2a3   : > { %3611 = vmatmul.mubr.f32.gmra.mrb[54].mxu1 %v396_v58  ;;  %v6430_v58 = vpop.permute.xlu0 %886 }
 0x2a4   : > { %3615 = vmatprep.mubr.f32.mxu1 %v401_v59  ;;  %v837_v59 = vld [vmem:[%s6210_s12 + $0x338] sm:$0xff] }
 0x2a5   : > { %2244 = vmatmul.mubr.f32.gmra.mrb[56].mxu0 %v400_v62  ;;  %1366 = vperm.xlu0 %5640, %v836_v60  }
 0x2a6   : > { %2248 = vmatprep.mubr.f32.mxu0 %v405_v63  ;;  %1371 = vperm.xlu1 %5641, %v837_v59  }
 0x2a7   : > { %3616 = vmatmul.mubr.f32.gmra.mrb[56].mxu1 %v400_v62  ;;  %v6435_v62 = vpop.permute.xlu1 %891  ;;  %v6442_v4 = vpop.permute.xlu0 %896 }
 0x2a8   : > { %3620 = vmatprep.mubr.f32.mxu1 %v405_v63  ;;  %v461_v63 = vld [vmem:[%s5991_s7 + $0x578] sm:$0xff] }
 0x2a9   : > { %2249 = vmatmul.mubr.f32.gmra.mrb[58].mxu0 %v404_v2  ;;  %1376 = vperm.xlu0 %5640, %v838_v1   ;;  %v517_v1 = vld [vmem:[%s5991_s7 + $0x738] sm:$0xff] }
 0x2aa   : > { %2253 = vmatprep.mubr.f32.mxu0 %v409_v3  ;;  %1381 = vperm.xlu1 %5641, %v839_v0   ;;  %v512_v0 = vld [vmem:[%s5991_s7 + $0x710] sm:$0xff] }
 0x2ab   : > { %3621 = vmatmul.mubr.f32.gmra.mrb[58].mxu1 %v404_v2  ;;  %v460_v2 = vld [vmem:[%s5991_s7 + $0x570] sm:$0xff]  ;;  %v6444_v5 = vpop.permute.xlu1 %901 }
 0x2ac   : > { %3625 = vmatprep.mubr.f32.mxu1 %v409_v3  ;;  %v465_v3 = vld [vmem:[%s5991_s7 + $0x598] sm:$0xff] }
 0x2ad   : > { %2254 = vmatmul.mubr.f32.gmra.mrb[60].mxu0 %v408_v6 }
 0x2ae   : > { %2258 = vmatprep.mubr.f32.mxu0 %v413_v7 }
 0x2af   : > { %3626 = vmatmul.mubr.f32.gmra.mrb[60].mxu1 %v408_v6  ;;  %v841_v6 = vld [vmem:[%s6210_s12 + $0x358] sm:$0xff] }
 0x2b0   : > { %3630 = vmatprep.mubr.f32.mxu1 %v413_v7  ;;  %v840_v7 = vld [vmem:[%s6210_s12 + $0x350] sm:$0xff]  ;;  %1391 = vperm.xlu1 %5641, %v841_v6  }
 0x2b1   : > { %2259 = vmatmul.mubr.f32.gmra.mrb[62].mxu0 %v412_v10  ;;  %1386 = vperm.xlu0 %5640, %v840_v7  }
 0x2b2   : > { %2263 = vmatprep.mubr.f32.mxu0 %v417_v11 }
 0x2b3   : > { %3631 = vmatmul.mubr.f32.gmra.mrb[62].mxu1 %v412_v10  ;;  %v6450_v10 = vpop.permute.xlu0 %906 }
 0x2b4   : > { %3635 = vmatprep.mubr.f32.mxu1 %v417_v11  ;;  %v843_v11 = vld [vmem:[%s6210_s12 + $0x368] sm:$0xff] }
 0x2b5   : > { %2264 = vmatmul.mubr.f32.gmra.mrb[64].mxu0 %v416_v14  ;;  %1396 = vperm.xlu0 %5640, %v842_v12  }
 0x2b6   : > { %2268 = vmatprep.mubr.f32.mxu0 %v421_v15 }
 0x2b7   : > { %3636 = vmatmul.mubr.f32.gmra.mrb[64].mxu1 %v416_v14  ;;  %v6455_v14 = vpop.permute.xlu1 %911  ;;  %1401 = vperm.xlu1 %5641, %v843_v11   ;;  %v6462_v20 = vpop.permute.xlu0 %916  ;;  %v521_v11 = vld [vmem:[%s5991_s7 + $0x758] sm:$0xff] }
 0x2b8   : > { %3640 = vmatprep.mubr.f32.mxu1 %v421_v15  ;;  %v473_v15 = vld [vmem:[%s5991_s7 + $0x5d8] sm:$0xff] }
 0x2b9   : > { %2269 = vmatmul.mubr.f32.gmra.mrb[66].mxu0 %v420_v18  ;;  %1406 = vperm.xlu0 %5640, %v844_v17  }
 0x2ba   : > { %2273 = vmatprep.mubr.f32.mxu0 %v425_v19 }
 0x2bb   : > { %3641 = vmatmul.mubr.f32.gmra.mrb[66].mxu1 %v420_v18  ;;  %v472_v18 = vld [vmem:[%s5991_s7 + $0x5d0] sm:$0xff]  ;;  %v6464_v21 = vpop.permute.xlu1 %921  ;;  %1411 = vperm.xlu1 %5641, %v845_v16  }
 0x2bc   : > { %3645 = vmatprep.mubr.f32.mxu1 %v425_v19  ;;  %v477_v19 = vld [vmem:[%s5991_s7 + $0x5f8] sm:$0xff] }
 0x2bd   : > { %2274 = vmatmul.mubr.f32.gmra.mrb[68].mxu0 %v424_v22 }
 0x2be   : > { %2278 = vmatprep.mubr.f32.mxu0 %v429_v23 }
 0x2bf   : > { %3646 = vmatmul.mubr.f32.gmra.mrb[68].mxu1 %v424_v22  ;;  %v476_v22 = vld [vmem:[%s5991_s7 + $0x5f0] sm:$0xff] }
 0x2c0   : > { %3650 = vmatprep.mubr.f32.mxu1 %v429_v23  ;;  %v481_v23 = vld [vmem:[%s5991_s7 + $0x618] sm:$0xff] }
 0x2c1   : > { %2279 = vmatmul.mubr.f32.gmra.mrb[70].mxu0 %v428_v26 }
 0x2c2   : > { %2283 = vmatprep.mubr.f32.mxu0 %v433_v27 }
 0x2c3   : > { %3651 = vmatmul.mubr.f32.gmra.mrb[70].mxu1 %v428_v26  ;;  %v484_v26 = vld [vmem:[%s5991_s7 + $0x630] sm:$0xff] }
 0x2c4   : > { %3655 = vmatprep.mubr.f32.mxu1 %v433_v27  ;;  %v489_v27 = vld [vmem:[%s5991_s7 + $0x658] sm:$0xff] }
 0x2c5   : > { %2284 = vmatmul.mubr.f32.gmra.mrb[72].mxu0 %v432_v30 }
 0x2c6   : > { %2288 = vmatprep.mubr.f32.mxu0 %v437_v31 }
 0x2c7   : > { %3656 = vmatmul.mubr.f32.gmra.mrb[72].mxu1 %v432_v30  ;;  %v492_v30 = vld [vmem:[%s5991_s7 + $0x670] sm:$0xff] }
 0x2c8   : > { %3660 = vmatprep.mubr.f32.mxu1 %v437_v31  ;;  %v497_v31 = vld [vmem:[%s5991_s7 + $0x698] sm:$0xff] }
 0x2c9   : > { %2289 = vmatmul.mubr.f32.gmra.mrb[74].mxu0 %v436_v34 }
 0x2ca   : > { %2293 = vmatprep.mubr.f32.mxu0 %v441_v35 }
 0x2cb   : > { %3661 = vmatmul.mubr.f32.gmra.mrb[74].mxu1 %v436_v34  ;;  %v500_v34 = vld [vmem:[%s5991_s7 + $0x6b0] sm:$0xff] }
 0x2cc   : > { %3665 = vmatprep.mubr.f32.mxu1 %v441_v35  ;;  %v505_v35 = vld [vmem:[%s5991_s7 + $0x6d8] sm:$0xff] }
 0x2cd   : > { %2294 = vmatmul.mubr.f32.gmra.mrb[76].mxu0 %v440_v40 }
 0x2ce   : > { %2298 = vmatprep.mubr.f32.mxu0 %v445_v41 }
 0x2cf   : > { %3666 = vmatmul.mubr.f32.gmra.mrb[76].mxu1 %v440_v40 }
 0x2d0   : > { %3670 = vmatprep.mubr.f32.mxu1 %v445_v41 }
 0x2d1   : > { %2299 = vmatmul.mubr.f32.gmra.mrb[78].mxu0 %v444_v44 }
 0x2d2   : > { %2303 = vmatprep.mubr.f32.mxu0 %v449_v46 }
 0x2d3   : > { %3671 = vmatmul.mubr.f32.gmra.mrb[78].mxu1 %v444_v44  ;;  %v504_v44 = vld [vmem:[%s5991_s7 + $0x6d0] sm:$0xff] }
 0x2d4   : > { %3675 = vmatprep.mubr.f32.mxu1 %v449_v46  ;;  %v509_v46 = vld [vmem:[%s5991_s7 + $0x6f8] sm:$0xff] }
 0x2d5   : > { %2304 = vmatmul.mubr.f32.gmra.mrb[80].mxu0 %v448_v50 }
 0x2d6   : > { %2308 = vmatprep.mubr.f32.mxu0 %v453_v51 }
 0x2d7   : > { %3676 = vmatmul.mubr.f32.gmra.mrb[80].mxu1 %v448_v50 }
 0x2d8   : > { %3680 = vmatprep.mubr.f32.mxu1 %v453_v51 }
 0x2d9   : > { %2309 = vmatmul.mubr.f32.gmra.mrb[82].mxu0 %v452_v56 }
 0x2da   : > { %2313 = vmatprep.mubr.f32.mxu0 %v457_v57 }
 0x2db   : > { %3681 = vmatmul.mubr.f32.gmra.mrb[82].mxu1 %v452_v56  ;;  %v513_v56 = vld [vmem:[%s5991_s7 + $0x718] sm:$0xff] }
 0x2dc   : > { %3685 = vmatprep.mubr.f32.mxu1 %v457_v57 }
 0x2dd   : > { %2314 = vmatmul.mubr.f32.gmra.mrb[84].mxu0 %v456_v61 }
 0x2de   : > { %2318 = vmatprep.mubr.f32.mxu0 %v461_v63 }
 0x2df   : > { %3686 = vmatmul.mubr.f32.gmra.mrb[84].mxu1 %v456_v61 }
 0x2e0   : > { %3690 = vmatprep.mubr.f32.mxu1 %v461_v63 }
 0x2e1   : > { %2319 = vmatmul.mubr.f32.gmra.mrb[86].mxu0 %v460_v2 }
 0x2e2   : > { %2323 = vmatprep.mubr.f32.mxu0 %v465_v3 }
 0x2e3   : > { %3691 = vmatmul.mubr.f32.gmra.mrb[86].mxu1 %v460_v2 }
 0x2e4   : > { %3695 = vmatprep.mubr.f32.mxu1 %v465_v3 }
 0x2e5   : > { %2324 = vmatmul.mubr.f32.gmra.mrb[88].mxu0 %v464_v8 }
 0x2e6   : > { %2328 = vmatprep.mubr.f32.mxu0 %v469_v9 }
 0x2e7   : > { %3696 = vmatmul.mubr.f32.gmra.mrb[88].mxu1 %v464_v8 }
 0x2e8   : > { %3700 = vmatprep.mubr.f32.mxu1 %v469_v9  ;;  %v516_v9 = vld [vmem:[%s5991_s7 + $0x730] sm:$0xff] }
 0x2e9   : > { %2329 = vmatmul.mubr.f32.gmra.mrb[90].mxu0 %v468_v13 }
 0x2ea   : > { %2333 = vmatprep.mubr.f32.mxu0 %v473_v15 }
 0x2eb   : > { %3701 = vmatmul.mubr.f32.gmra.mrb[90].mxu1 %v468_v13 }
 0x2ec   : > { %3705 = vmatprep.mubr.f32.mxu1 %v473_v15 }
 0x2ed   : > { %2334 = vmatmul.mubr.f32.gmra.mrb[92].mxu0 %v472_v18 }
 0x2ee   : > { %2338 = vmatprep.mubr.f32.mxu0 %v477_v19 }
 0x2ef   : > { %3706 = vmatmul.mubr.f32.gmra.mrb[92].mxu1 %v472_v18  ;;  %v520_v18 = vld [vmem:[%s5991_s7 + $0x750] sm:$0xff] }
 0x2f0   : > { %3710 = vmatprep.mubr.f32.mxu1 %v477_v19  ;;  %v525_v19 = vld [vmem:[%s5991_s7 + $0x778] sm:$0xff] }
 0x2f1   : > { %2339 = vmatmul.mubr.f32.gmra.mrb[94].mxu0 %v476_v22 }
 0x2f2   : > { %2343 = vmatprep.mubr.f32.mxu0 %v481_v23 }
 0x2f3   : > { %3711 = vmatmul.mubr.f32.gmra.mrb[94].mxu1 %v476_v22 }
 0x2f4   : > { %3715 = vmatprep.mubr.f32.mxu1 %v481_v23 }
 0x2f5   : > { %2344 = vmatmul.mubr.f32.gmra.mrb[96].mxu0 %v480_v24 }
 0x2f6   : > { %2348 = vmatprep.mubr.f32.mxu0 %v485_v25 }
 0x2f7   : > { %3716 = vmatmul.mubr.f32.gmra.mrb[96].mxu1 %v480_v24 }
 0x2f8   : > { %3720 = vmatprep.mubr.f32.mxu1 %v485_v25 }
 0x2f9   : > { %2349 = vmatmul.mubr.f32.gmra.mrb[98].mxu0 %v484_v26 }
 0x2fa   : > { %2353 = vmatprep.mubr.f32.mxu0 %v489_v27 }
 0x2fb   : > { %3721 = vmatmul.mubr.f32.gmra.mrb[98].mxu1 %v484_v26 }
 0x2fc   : > { %3725 = vmatprep.mubr.f32.mxu1 %v489_v27  ;;  %v524_v27 = vld [vmem:[%s5991_s7 + $0x770] sm:$0xff] }
 0x2fd   : > { %2354 = vmatmul.mubr.f32.gmra.mrb[100].mxu0 %v488_v28 }
 0x2fe   : > { %2358 = vmatprep.mubr.f32.mxu0 %v493_v29 }
 0x2ff   : > { %3726 = vmatmul.mubr.f32.gmra.mrb[100].mxu1 %v488_v28  ;;  %v529_v28 = vld [vmem:[%s5991_s7 + $0x798] sm:$0xff] }
 0x300   : > { %3730 = vmatprep.mubr.f32.mxu1 %v493_v29 }
 0x301   : > { %2359 = vmatmul.mubr.f32.gmra.mrb[102].mxu0 %v492_v30 }
 0x302   : > { %2363 = vmatprep.mubr.f32.mxu0 %v497_v31 }
 0x303   : > { %3731 = vmatmul.mubr.f32.gmra.mrb[102].mxu1 %v492_v30 }
 0x304   : > { %3735 = vmatprep.mubr.f32.mxu1 %v497_v31 }
 0x305   : > { %2364 = vmatmul.mubr.f32.gmra.mrb[104].mxu0 %v496_v32 }
 0x306   : > { %2368 = vmatprep.mubr.f32.mxu0 %v501_v33 }
 0x307   : > { %3736 = vmatmul.mubr.f32.gmra.mrb[104].mxu1 %v496_v32 }
 0x308   : > { %3740 = vmatprep.mubr.f32.mxu1 %v501_v33  ;;  %v2105_v38 = vpop.f32.mrb[0].mxu0 }
 0x309   : > { %v4836_v39 = vadd.f32 %v2105_v38, %v6404_v37  ;;  %v2107_v41 = vpop.f32.mrb[1].mxu0  ;;  %2369 = vmatmul.mubr.f32.gmra.mrb[106].mxu0 %v500_v34 }
 0x30a   : > { %v3477_v40 = vpop.f32.mrb[0].mxu1  ;;  %2373 = vmatprep.mubr.f32.mxu0 %v505_v35 }
 0x30b   : > { %v4948_v42 = vadd.f32 %v3477_v40, %v6404_v37  ;;  %v3479_v43 = vpop.f32.mrb[1].mxu1  ;;  %3741 = vmatmul.mubr.f32.gmra.mrb[106].mxu1 %v500_v34  ;;  %2665 = vst.msk [vmem:[%s6484_s4] sm:$0xff] %vm2664_vm0, %v4836_v39  ;;  %v528_v34 = vld [vmem:[%s5991_s7 + $0x790] sm:$0xff] }
 0x30c   : > { %3745 = vmatprep.mubr.f32.mxu1 %v505_v35  ;;  %v2110_v48 = vpop.f32.mrb[2].mxu0  ;;  %v533_v35 = vld [vmem:[%s5991_s7 + $0x7b8] sm:$0xff]  ;;  %v532_v43 = vld [vmem:[%s5991_s7 + $0x7b0] sm:$0xff] }
 0x30d   : > { %4686 = vst.msk [vmem:[%s6484_s4 + $0x380] sm:$0xff] %vm2664_vm0, %v4948_v42  ;;  %v4837_v37 = vadd.f32 %v2110_v48, %v6416_v47  ;;  %v2112_v50 = vpop.f32.mrb[3].mxu0  ;;  %2374 = vmatmul.mubr.f32.gmra.mrb[108].mxu0 %v504_v44 }
 0x30e   : > { %v3482_v49 = vpop.f32.mrb[2].mxu1  ;;  %2378 = vmatprep.mubr.f32.mxu0 %v509_v46 }
 0x30f   : > { %v4949_v51 = vadd.f32 %v3482_v49, %v6416_v47  ;;  %v3484_v54 = vpop.f32.mrb[3].mxu1  ;;  %3746 = vmatmul.mubr.f32.gmra.mrb[108].mxu1 %v504_v44  ;;  %2666 = vst.msk [vmem:[%s6484_s4 + $0x8] sm:$0xff] %vm2664_vm0, %v4837_v37  ;;  %v537_v44 = vld [vmem:[%s5991_s7 + $0x7d8] sm:$0xff] }
 0x310   : > { %3750 = vmatprep.mubr.f32.mxu1 %v509_v46  ;;  %v2115_v57 = vpop.f32.mrb[4].mxu0  ;;  %v541_v54 = vld [vmem:[%s5991_s7 + $0x7f8] sm:$0xff] }
 0x311   : > { %4687 = vst.msk [vmem:[%s6484_s4 + $0x388] sm:$0xff] %vm2664_vm0, %v4949_v51  ;;  %v4838_v59 = vadd.f32 %v2115_v57, %v6402_v36  ;;  %v2117_v61 = vpop.f32.mrb[5].mxu0  ;;  %2379 = vmatmul.mubr.f32.gmra.mrb[110].mxu0 %v508_v55  ;;  %v536_v51 = vld [vmem:[%s5991_s7 + $0x7d0] sm:$0xff] }
 0x312   : > { %v3487_v60 = vpop.f32.mrb[4].mxu1  ;;  %2383 = vmatprep.mubr.f32.mxu0 %v513_v56  ;;  %v540_v61 = vld [vmem:[%s5991_s7 + $0x7f0] sm:$0xff] }
 0x313   : > { %v4950_v47 = vadd.f32 %v3487_v60, %v6402_v36  ;;  %v3489_v63 = vpop.f32.mrb[5].mxu1  ;;  %3751 = vmatmul.mubr.f32.gmra.mrb[110].mxu1 %v508_v55  ;;  %2667 = vst.msk [vmem:[%s6484_s4 + $0x10] sm:$0xff] %vm2664_vm0, %v4838_v59 }
 0x314   : > { %3755 = vmatprep.mubr.f32.mxu1 %v513_v56  ;;  %v2120_v2 = vpop.f32.mrb[6].mxu0 }
 0x315   : > { %4688 = vst.msk [vmem:[%s6484_s4 + $0x390] sm:$0xff] %vm2664_vm0, %v4950_v47  ;;  %v4839_v3 = vadd.f32 %v2120_v2, %v6413_v45  ;;  %v2122_v7 = vpop.f32.mrb[7].mxu0  ;;  %2384 = vmatmul.mubr.f32.gmra.mrb[112].mxu0 %v512_v0  ;;  %v545_v47 = vld [vmem:[%s5991_s7 + $0x818] sm:$0xff] }
 0x316   : > { %v3492_v6 = vpop.f32.mrb[6].mxu1  ;;  %2388 = vmatprep.mubr.f32.mxu0 %v517_v1  ;;  %v549_v7 = vld [vmem:[%s5991_s7 + $0x838] sm:$0xff] }
 0x317   : > { %v4951_v36 = vadd.f32 %v3492_v6, %v6413_v45  ;;  %v3494_v8 = vpop.f32.mrb[7].mxu1  ;;  %3756 = vmatmul.mubr.f32.gmra.mrb[112].mxu1 %v512_v0  ;;  %2668 = vst.msk [vmem:[%s6484_s4 + $0x18] sm:$0xff] %vm2664_vm0, %v4839_v3  ;;  %v544_v6 = vld [vmem:[%s5991_s7 + $0x810] sm:$0xff] }
 0x318   : > { %3760 = vmatprep.mubr.f32.mxu1 %v517_v1  ;;  %v2125_v12 = vpop.f32.mrb[8].mxu0 }
 0x319   : > { %4689 = vst.msk [vmem:[%s6484_s4 + $0x398] sm:$0xff] %vm2664_vm0, %v4951_v36  ;;  %v4840_v13 = vadd.f32 %v2125_v12, %v6422_v52  ;;  %v2127_v16 = vpop.f32.mrb[9].mxu0  ;;  %2389 = vmatmul.mubr.f32.gmra.mrb[114].mxu0 %v516_v9 }
 0x31a   : > { %v3497_v15 = vpop.f32.mrb[8].mxu1  ;;  %2393 = vmatprep.mubr.f32.mxu0 %v521_v11 }
 0x31b   : > { %v4952_v45 = vadd.f32 %v3497_v15, %v6422_v52  ;;  %v3499_v17 = vpop.f32.mrb[9].mxu1  ;;  %3761 = vmatmul.mubr.f32.gmra.mrb[114].mxu1 %v516_v9  ;;  %2669 = vst.msk [vmem:[%s6484_s4 + $0x20] sm:$0xff] %vm2664_vm0, %v4840_v13  ;;  %v548_v13 = vld [vmem:[%s5991_s7 + $0x830] sm:$0xff]  ;;  %v553_v15 = vld [vmem:[%s5991_s7 + $0x858] sm:$0xff] }
 0x31c   : > { %3765 = vmatprep.mubr.f32.mxu1 %v521_v11  ;;  %v2130_v22 = vpop.f32.mrb[10].mxu0 }
 0x31d   : > { %4690 = vst.msk [vmem:[%s6484_s4 + $0x3a0] sm:$0xff] %vm2664_vm0, %v4952_v45  ;;  %v4841_v23 = vadd.f32 %v2130_v22, %v6424_v53  ;;  %v2132_v25 = vpop.f32.mrb[11].mxu0  ;;  %2394 = vmatmul.mubr.f32.gmra.mrb[116].mxu0 %v520_v18  ;;  %v552_v22 = vld [vmem:[%s5991_s7 + $0x850] sm:$0xff] }
 0x31e   : > { %v3502_v24 = vpop.f32.mrb[10].mxu1  ;;  %2398 = vmatprep.mubr.f32.mxu0 %v525_v19 }
 0x31f   : > { %v4953_v52 = vadd.f32 %v3502_v24, %v6424_v53  ;;  %v3504_v26 = vpop.f32.mrb[11].mxu1  ;;  %3766 = vmatmul.mubr.f32.gmra.mrb[116].mxu1 %v520_v18  ;;  %2670 = vst.msk [vmem:[%s6484_s4 + $0x28] sm:$0xff] %vm2664_vm0, %v4841_v23  ;;  %v557_v23 = vld [vmem:[%s5991_s7 + $0x878] sm:$0xff] }
 0x320   : > { %3770 = vmatprep.mubr.f32.mxu1 %v525_v19  ;;  %v2135_v29 = vpop.f32.mrb[12].mxu0 }
 0x321   : > { %4691 = vst.msk [vmem:[%s6484_s4 + $0x3a8] sm:$0xff] %vm2664_vm0, %v4953_v52  ;;  %v4842_v30 = vadd.f32 %v2135_v29, %v6430_v58  ;;  %v2137_v32 = vpop.f32.mrb[13].mxu0  ;;  %2399 = vmatmul.mubr.f32.gmra.mrb[118].mxu0 %v524_v27  ;;  %v561_v29 = vld [vmem:[%s5991_s7 + $0x898] sm:$0xff] }
 0x322   : > { %v3507_v31 = vpop.f32.mrb[12].mxu1  ;;  %2403 = vmatprep.mubr.f32.mxu0 %v529_v28 }
 0x323   : > { %v4954_v53 = vadd.f32 %v3507_v31, %v6430_v58  ;;  %v3509_v33 = vpop.f32.mrb[13].mxu1  ;;  %3771 = vmatmul.mubr.f32.gmra.mrb[118].mxu1 %v524_v27  ;;  %2671 = vst.msk [vmem:[%s6484_s4 + $0x30] sm:$0xff] %vm2664_vm0, %v4842_v30  ;;  %v927_v30 = vpop.permute.xlu0 %926 }
 0x324   : > { %3775 = vmatprep.mubr.f32.mxu1 %v529_v28  ;;  %v2140_v38 = vpop.f32.mrb[14].mxu0  ;;  %v556_v28 = vld [vmem:[%s5991_s7 + $0x870] sm:$0xff] }
 0x325   : > { %4692 = vst.msk [vmem:[%s6484_s4 + $0x3b0] sm:$0xff] %vm2664_vm0, %v4954_v53  ;;  %v4843_v39 = vadd.f32 %v2140_v38, %v6435_v62  ;;  %v2142_v41 = vpop.f32.mrb[15].mxu0  ;;  %2404 = vmatmul.mubr.f32.gmra.mrb[120].mxu0 %v528_v34  ;;  %v565_v38 = vld [vmem:[%s5991_s7 + $0x8b8] sm:$0xff] }
 0x326   : > { %v3512_v40 = vpop.f32.mrb[14].mxu1  ;;  %2408 = vmatprep.mubr.f32.mxu0 %v533_v35 }
 0x327   : > { %v4955_v58 = vadd.f32 %v3512_v40, %v6435_v62  ;;  %v3514_v42 = vpop.f32.mrb[15].mxu1  ;;  %3776 = vmatmul.mubr.f32.gmra.mrb[120].mxu1 %v528_v34  ;;  %2672 = vst.msk [vmem:[%s6484_s4 + $0x38] sm:$0xff] %vm2664_vm0, %v4843_v39  ;;  %v932_v39 = vpop.permute.xlu1 %931 }
 0x328   : > { %3780 = vmatprep.mubr.f32.mxu1 %v533_v35  ;;  %v2145_v46 = vpop.f32.mrb[16].mxu0  ;;  %v560_v35 = vld [vmem:[%s5991_s7 + $0x890] sm:$0xff] }
 0x329   : > { %4693 = vst.msk [vmem:[%s6484_s4 + $0x3b8] sm:$0xff] %vm2664_vm0, %v4955_v58  ;;  %v4844_v48 = vadd.f32 %v2145_v46, %v6442_v4  ;;  %v2147_v49 = vpop.f32.mrb[17].mxu0  ;;  %2409 = vmatmul.mubr.f32.gmra.mrb[122].mxu0 %v532_v43  ;;  %v564_v46 = vld [vmem:[%s5991_s7 + $0x8b0] sm:$0xff] }
 0x32a   : > { %v3517_v37 = vpop.f32.mrb[16].mxu1  ;;  %2413 = vmatprep.mubr.f32.mxu0 %v537_v44 }
 0x32b   : > { %v4956_v62 = vadd.f32 %v3517_v37, %v6442_v4  ;;  %v3519_v50 = vpop.f32.mrb[17].mxu1  ;;  %3781 = vmatmul.mubr.f32.gmra.mrb[122].mxu1 %v532_v43  ;;  %2673 = vst.msk [vmem:[%s6484_s4 + $0x40] sm:$0xff] %vm2664_vm0, %v4844_v48  ;;  %v569_v48 = vld [vmem:[%s5991_s7 + $0x8d8] sm:$0xff]  ;;  %v937_v37 = vpop.permute.xlu0 %936 }
 0x32c   : > { %3785 = vmatprep.mubr.f32.mxu1 %v537_v44  ;;  %v2150_v55 = vpop.f32.mrb[18].mxu0 }
 0x32d   : > { %4694 = vst.msk [vmem:[%s6484_s4 + $0x3c0] sm:$0xff] %vm2664_vm0, %v4956_v62  ;;  %v4845_v56 = vadd.f32 %v2150_v55, %v6444_v5  ;;  %v2152_v59 = vpop.f32.mrb[19].mxu0  ;;  %2414 = vmatmul.mubr.f32.gmra.mrb[124].mxu0 %v536_v51 }
 0x32e   : > { %v3522_v57 = vpop.f32.mrb[18].mxu1  ;;  %2418 = vmatprep.mubr.f32.mxu0 %v541_v54  ;;  %v942_v59 = vpop.permute.xlu1 %941 }
 0x32f   : > { %v4957_v4 = vadd.f32 %v3522_v57, %v6444_v5  ;;  %v3524_v60 = vpop.f32.mrb[19].mxu1  ;;  %3786 = vmatmul.mubr.f32.gmra.mrb[124].mxu1 %v536_v51  ;;  %2674 = vst.msk [vmem:[%s6484_s4 + $0x48] sm:$0xff] %vm2664_vm0, %v4845_v56  ;;  %v568_v56 = vld [vmem:[%s5991_s7 + $0x8d0] sm:$0xff]  ;;  %v573_v57 = vld [vmem:[%s5991_s7 + $0x8f8] sm:$0xff] }
 0x330   : > { %3790 = vmatprep.mubr.f32.mxu1 %v541_v54  ;;  %v2155_v63 = vpop.f32.mrb[20].mxu0 }
 0x331   : > { %4695 = vst.msk [vmem:[%s6484_s4 + $0x3c8] sm:$0xff] %vm2664_vm0, %v4957_v4  ;;  %v4846_v0 = vadd.f32 %v2155_v63, %v6450_v10  ;;  %v2157_v2 = vpop.f32.mrb[21].mxu0  ;;  %2419 = vmatmul.mubr.f32.gmra.mrb[126].mxu0 %v540_v61 }
 0x332   : > { %v3527_v1 = vpop.f32.mrb[20].mxu1  ;;  %2423 = vmatprep.mubr.f32.mxu0 %v545_v47  ;;  %v577_v2 = vld [vmem:[%s5991_s7 + $0x918] sm:$0xff] }
 0x333   : > { %v4958_v5 = vadd.f32 %v3527_v1, %v6450_v10  ;;  %v3529_v3 = vpop.f32.mrb[21].mxu1  ;;  %3791 = vmatmul.mubr.f32.gmra.mrb[126].mxu1 %v540_v61  ;;  %2675 = vst.msk [vmem:[%s6484_s4 + $0x50] sm:$0xff] %vm2664_vm0, %v4846_v0  ;;  %v572_v1 = vld [vmem:[%s5991_s7 + $0x8f0] sm:$0xff] }
 0x334   : > { %3795 = vmatprep.mubr.f32.mxu1 %v545_v47  ;;  %v2160_v36 = vpop.f32.mrb[22].mxu0 }
 0x335   : > { %4696 = vst.msk [vmem:[%s6484_s4 + $0x3d0] sm:$0xff] %vm2664_vm0, %v4958_v5  ;;  %v4847_v8 = vadd.f32 %v2160_v36, %v6455_v14  ;;  %v2162_v11 = vpop.f32.mrb[23].mxu0  ;;  %2424 = vmatmul.mubr.f32.gmra.mrb[128].mxu0 %v544_v6  ;;  %v947_v5 = vpop.permute.xlu0 %946 }
 0x336   : > { %v3532_v9 = vpop.f32.mrb[22].mxu1  ;;  %2428 = vmatprep.mubr.f32.mxu0 %v549_v7  ;;  %v576_v11 = vld [vmem:[%s5991_s7 + $0x910] sm:$0xff] }
 0x337   : > { %v4959_v10 = vadd.f32 %v3532_v9, %v6455_v14  ;;  %v3534_v12 = vpop.f32.mrb[23].mxu1  ;;  %3796 = vmatmul.mubr.f32.gmra.mrb[128].mxu1 %v544_v6  ;;  %2676 = vst.msk [vmem:[%s6484_s4 + $0x58] sm:$0xff] %vm2664_vm0, %v4847_v8 }
 0x338   : > { %3800 = vmatprep.mubr.f32.mxu1 %v549_v7  ;;  %v2165_v16 = vpop.f32.mrb[24].mxu0  ;;  %v952_v12 = vpop.permute.xlu1 %951 }
 0x339   : > { %4697 = vst.msk [vmem:[%s6484_s4 + $0x3d8] sm:$0xff] %vm2664_vm0, %v4959_v10  ;;  %v4848_v45 = vadd.f32 %v2165_v16, %v6462_v20  ;;  %v2167_v18 = vpop.f32.mrb[25].mxu0  ;;  %2429 = vmatmul.mubr.f32.gmra.mrb[130].mxu0 %v548_v13  ;;  %v581_v10 = vld [vmem:[%s5991_s7 + $0x938] sm:$0xff] }
 0x33a   : > { %v3537_v17 = vpop.f32.mrb[24].mxu1  ;;  %2433 = vmatprep.mubr.f32.mxu0 %v553_v15 }
 0x33b   : > { %v4960_v14 = vadd.f32 %v3537_v17, %v6462_v20  ;;  %v3539_v19 = vpop.f32.mrb[25].mxu1  ;;  %3801 = vmatmul.mubr.f32.gmra.mrb[130].mxu1 %v548_v13  ;;  %2677 = vst.msk [vmem:[%s6484_s4 + $0x60] sm:$0xff] %vm2664_vm0, %v4848_v45 }
 0x33c   : > { %3805 = vmatprep.mubr.f32.mxu1 %v553_v15  ;;  %v2170_v24 = vpop.f32.mrb[26].mxu0  ;;  %v585_v19 = vld [vmem:[%s5991_s7 + $0x958] sm:$0xff] }
 0x33d   : > { %4698 = vst.msk [vmem:[%s6484_s4 + $0x3e0] sm:$0xff] %vm2664_vm0, %v4960_v14  ;;  %v4849_v25 = vadd.f32 %v2170_v24, %v6464_v21  ;;  %v2172_v26 = vpop.f32.mrb[27].mxu0  ;;  %2434 = vmatmul.mubr.f32.gmra.mrb[132].mxu0 %v552_v22  ;;  %v580_v14 = vld [vmem:[%s5991_s7 + $0x930] sm:$0xff] }
 0x33e   : > { %v3542_v52 = vpop.f32.mrb[26].mxu1  ;;  %2438 = vmatprep.mubr.f32.mxu0 %v557_v23 }
 0x33f   : > { %v4961_v20 = vadd.f32 %v3542_v52, %v6464_v21  ;;  %v3544_v27 = vpop.f32.mrb[27].mxu1  ;;  %3806 = vmatmul.mubr.f32.gmra.mrb[132].mxu1 %v552_v22  ;;  %2678 = vst.msk [vmem:[%s6484_s4 + $0x68] sm:$0xff] %vm2664_vm0, %v4849_v25  ;;  %v957_v22 = vpop.permute.xlu0 %956 }
 0x340   : > { %3810 = vmatprep.mubr.f32.mxu1 %v557_v23  ;;  %v2175_v31 = vpop.f32.mrb[28].mxu0  ;;  %v584_v27 = vld [vmem:[%s5991_s7 + $0x950] sm:$0xff] }
 0x341   : > { %4699 = vst.msk [vmem:[%s6484_s4 + $0x3e8] sm:$0xff] %vm2664_vm0, %v4961_v20  ;;  %v4850_v32 = vadd.f32 %v2175_v31, %v927_v30  ;;  %v2177_v33 = vpop.f32.mrb[29].mxu0  ;;  %2439 = vmatmul.mubr.f32.gmra.mrb[134].mxu0 %v556_v28 }
 0x342   : > { %v3547_v53 = vpop.f32.mrb[28].mxu1  ;;  %2443 = vmatprep.mubr.f32.mxu0 %v561_v29 }
 0x343   : > { %v4962_v21 = vadd.f32 %v3547_v53, %v927_v30  ;;  %v3549_v34 = vpop.f32.mrb[29].mxu1  ;;  %3811 = vmatmul.mubr.f32.gmra.mrb[134].mxu1 %v556_v28  ;;  %2679 = vst.msk [vmem:[%s6484_s4 + $0x70] sm:$0xff] %vm2664_vm0, %v4850_v32  ;;  %v589_v28 = vld [vmem:[%s5991_s7 + $0x978] sm:$0xff] }
 0x344   : > { %3815 = vmatprep.mubr.f32.mxu1 %v561_v29  ;;  %v2180_v40 = vpop.f32.mrb[30].mxu0  ;;  %v962_v29 = vpop.permute.xlu1 %961  ;;  %v588_v34 = vld [vmem:[%s5991_s7 + $0x970] sm:$0xff] }
 0x345   : > { %4700 = vst.msk [vmem:[%s6484_s4 + $0x3f0] sm:$0xff] %vm2664_vm0, %v4962_v21  ;;  %v4851_v41 = vadd.f32 %v2180_v40, %v932_v39  ;;  %v2182_v42 = vpop.f32.mrb[31].mxu0  ;;  %2444 = vmatmul.mubr.f32.gmra.mrb[136].mxu0 %v560_v35 }
 0x346   : > { %v3552_v58 = vpop.f32.mrb[30].mxu1  ;;  %2448 = vmatprep.mubr.f32.mxu0 %v565_v38 }
 0x347   : > { %v4963_v43 = vadd.f32 %v3552_v58, %v932_v39  ;;  %v3554_v44 = vpop.f32.mrb[31].mxu1  ;;  %3816 = vmatmul.mubr.f32.gmra.mrb[136].mxu1 %v560_v35  ;;  %2680 = vst.msk [vmem:[%s6484_s4 + $0x78] sm:$0xff] %vm2664_vm0, %v4851_v41  ;;  %v593_v35 = vld [vmem:[%s5991_s7 + $0x998] sm:$0xff] }
 0x348   : > { %3820 = vmatprep.mubr.f32.mxu1 %v565_v38  ;;  %v2185_v49 = vpop.f32.mrb[32].mxu0  ;;  %v967_v38 = vpop.permute.xlu0 %966  ;;  %v592_v44 = vld [vmem:[%s5991_s7 + $0x990] sm:$0xff] }
 0x349   : > { %4701 = vst.msk [vmem:[%s6484_s4 + $0x3f8] sm:$0xff] %vm2664_vm0, %v4963_v43  ;;  %v4852_v62 = vadd.f32 %v2185_v49, %v937_v37  ;;  %v2187_v51 = vpop.f32.mrb[33].mxu0  ;;  %2449 = vmatmul.mubr.f32.gmra.mrb[138].mxu0 %v564_v46 }
 0x34a   : > { %v3557_v50 = vpop.f32.mrb[32].mxu1  ;;  %2453 = vmatprep.mubr.f32.mxu0 %v569_v48 }
 0x34b   : > { %v4964_v54 = vadd.f32 %v3557_v50, %v937_v37  ;;  %v3559_v55 = vpop.f32.mrb[33].mxu1  ;;  %3821 = vmatmul.mubr.f32.gmra.mrb[138].mxu1 %v564_v46  ;;  %2681 = vst.msk [vmem:[%s6484_s4 + $0x80] sm:$0xff] %vm2664_vm0, %v4852_v62  ;;  %v597_v46 = vld [vmem:[%s5991_s7 + $0x9b8] sm:$0xff] }
 0x34c   : > { %3825 = vmatprep.mubr.f32.mxu1 %v569_v48  ;;  %v2190_v4 = vpop.f32.mrb[34].mxu0  ;;  %v972_v48 = vpop.permute.xlu1 %971  ;;  %v596_v55 = vld [vmem:[%s5991_s7 + $0x9b0] sm:$0xff] }
 0x34d   : > { %4702 = vst.msk [vmem:[%s6484_s4 + $0x400] sm:$0xff] %vm2664_vm0, %v4964_v54  ;;  %v4853_v60 = vadd.f32 %v2190_v4, %v942_v59  ;;  %v2192_v47 = vpop.f32.mrb[35].mxu0  ;;  %2454 = vmatmul.mubr.f32.gmra.mrb[140].mxu0 %v568_v56 }
 0x34e   : > { %v3562_v61 = vpop.f32.mrb[34].mxu1  ;;  %2458 = vmatprep.mubr.f32.mxu0 %v573_v57 }
 0x34f   : > { %v4965_v63 = vadd.f32 %v3562_v61, %v942_v59  ;;  %v3564_v0 = vpop.f32.mrb[35].mxu1  ;;  %3826 = vmatmul.mubr.f32.gmra.mrb[140].mxu1 %v568_v56  ;;  %2682 = vst.msk [vmem:[%s6484_s4 + $0x88] sm:$0xff] %vm2664_vm0, %v4853_v60  ;;  %v601_v56 = vld [vmem:[%s5991_s7 + $0x9d8] sm:$0xff] }
 0x350   : > { %3830 = vmatprep.mubr.f32.mxu1 %v573_v57  ;;  %v2195_v3 = vpop.f32.mrb[36].mxu0  ;;  %v977_v57 = vpop.permute.xlu0 %976  ;;  %v600_v0 = vld [vmem:[%s5991_s7 + $0x9d0] sm:$0xff] }
 0x351   : > { %4703 = vst.msk [vmem:[%s6484_s4 + $0x408] sm:$0xff] %vm2664_vm0, %v4965_v63  ;;  %v4854_v6 = vadd.f32 %v2195_v3, %v947_v5  ;;  %v2197_v36 = vpop.f32.mrb[37].mxu0  ;;  %2459 = vmatmul.mubr.f32.gmra.mrb[142].mxu0 %v572_v1 }
 0x352   : > { %v3567_v7 = vpop.f32.mrb[36].mxu1  ;;  %2463 = vmatprep.mubr.f32.mxu0 %v577_v2 }
 0x353   : > { %v4966_v8 = vadd.f32 %v3567_v7, %v947_v5  ;;  %v3569_v9 = vpop.f32.mrb[37].mxu1  ;;  %3831 = vmatmul.mubr.f32.gmra.mrb[142].mxu1 %v572_v1  ;;  %2683 = vst.msk [vmem:[%s6484_s4 + $0x90] sm:$0xff] %vm2664_vm0, %v4854_v6  ;;  %v605_v1 = vld [vmem:[%s5991_s7 + $0x9f8] sm:$0xff] }
 0x354   : > { %3835 = vmatprep.mubr.f32.mxu1 %v577_v2  ;;  %v2200_v13 = vpop.f32.mrb[38].mxu0  ;;  %v982_v2 = vpop.permute.xlu1 %981  ;;  %v604_v9 = vld [vmem:[%s5991_s7 + $0x9f0] sm:$0xff] }
 0x355   : > { %4704 = vst.msk [vmem:[%s6484_s4 + $0x410] sm:$0xff] %vm2664_vm0, %v4966_v8  ;;  %v4855_v15 = vadd.f32 %v2200_v13, %v952_v12  ;;  %v2202_v45 = vpop.f32.mrb[39].mxu0  ;;  %2464 = vmatmul.mubr.f32.gmra.mrb[144].mxu0 %v576_v11 }
 0x356   : > { %v3572_v16 = vpop.f32.mrb[38].mxu1  ;;  %2468 = vmatprep.mubr.f32.mxu0 %v581_v10 }
 0x357   : > { %v4967_v17 = vadd.f32 %v3572_v16, %v952_v12  ;;  %v3574_v18 = vpop.f32.mrb[39].mxu1  ;;  %3836 = vmatmul.mubr.f32.gmra.mrb[144].mxu1 %v576_v11  ;;  %2684 = vst.msk [vmem:[%s6484_s4 + $0x98] sm:$0xff] %vm2664_vm0, %v4855_v15  ;;  %v609_v11 = vld [vmem:[%s5991_s7 + $0xa18] sm:$0xff] }
 0x358   : > { %3840 = vmatprep.mubr.f32.mxu1 %v581_v10  ;;  %v2205_v23 = vpop.f32.mrb[40].mxu0  ;;  %v987_v10 = vpop.permute.xlu0 %986  ;;  %v608_v18 = vld [vmem:[%s5991_s7 + $0xa10] sm:$0xff] }
 0x359   : > { %4705 = vst.msk [vmem:[%s6484_s4 + $0x418] sm:$0xff] %vm2664_vm0, %v4967_v17  ;;  %v4856_v24 = vadd.f32 %v2205_v23, %v957_v22  ;;  %v2207_v52 = vpop.f32.mrb[41].mxu0  ;;  %2469 = vmatmul.mubr.f32.gmra.mrb[146].mxu0 %v580_v14 }
 0x35a   : > { %v3577_v25 = vpop.f32.mrb[40].mxu1  ;;  %2473 = vmatprep.mubr.f32.mxu0 %v585_v19 }
 0x35b   : > { %v4968_v26 = vadd.f32 %v3577_v25, %v957_v22  ;;  %v3579_v20 = vpop.f32.mrb[41].mxu1  ;;  %3841 = vmatmul.mubr.f32.gmra.mrb[146].mxu1 %v580_v14  ;;  %2685 = vst.msk [vmem:[%s6484_s4 + $0xa0] sm:$0xff] %vm2664_vm0, %v4856_v24  ;;  %v613_v14 = vld [vmem:[%s5991_s7 + $0xa38] sm:$0xff] }
 0x35c   : > { %3845 = vmatprep.mubr.f32.mxu1 %v585_v19  ;;  %v2210_v30 = vpop.f32.mrb[42].mxu0  ;;  %v992_v19 = vpop.permute.xlu1 %991  ;;  %v612_v20 = vld [vmem:[%s5991_s7 + $0xa30] sm:$0xff] }
 0x35d   : > { %4706 = vst.msk [vmem:[%s6484_s4 + $0x420] sm:$0xff] %vm2664_vm0, %v4968_v26  ;;  %v4857_v31 = vadd.f32 %v2210_v30, %v962_v29  ;;  %v2212_v53 = vpop.f32.mrb[43].mxu0  ;;  %2474 = vmatmul.mubr.f32.gmra.mrb[148].mxu0 %v584_v27 }
 0x35e   : > { %v3582_v32 = vpop.f32.mrb[42].mxu1  ;;  %2478 = vmatprep.mubr.f32.mxu0 %v589_v28 }
 0x35f   : > { %v4969_v33 = vadd.f32 %v3582_v32, %v962_v29  ;;  %v3584_v21 = vpop.f32.mrb[43].mxu1  ;;  %3846 = vmatmul.mubr.f32.gmra.mrb[148].mxu1 %v584_v27  ;;  %2686 = vst.msk [vmem:[%s6484_s4 + $0xa8] sm:$0xff] %vm2664_vm0, %v4857_v31  ;;  %v617_v27 = vld [vmem:[%s5991_s7 + $0xa58] sm:$0xff] }
 0x360   : > { %3850 = vmatprep.mubr.f32.mxu1 %v589_v28  ;;  %v2215_v39 = vpop.f32.mrb[44].mxu0  ;;  %v997_v28 = vpop.permute.xlu0 %996  ;;  %v616_v21 = vld [vmem:[%s5991_s7 + $0xa50] sm:$0xff] }
 0x361   : > { %4707 = vst.msk [vmem:[%s6484_s4 + $0x428] sm:$0xff] %vm2664_vm0, %v4969_v33  ;;  %v4858_v40 = vadd.f32 %v2215_v39, %v967_v38  ;;  %v2217_v58 = vpop.f32.mrb[45].mxu0  ;;  %2479 = vmatmul.mubr.f32.gmra.mrb[150].mxu0 %v588_v34 }
 0x362   : > { %v3587_v41 = vpop.f32.mrb[44].mxu1  ;;  %2483 = vmatprep.mubr.f32.mxu0 %v593_v35 }
 0x363   : > { %v4970_v42 = vadd.f32 %v3587_v41, %v967_v38  ;;  %v3589_v43 = vpop.f32.mrb[45].mxu1  ;;  %3851 = vmatmul.mubr.f32.gmra.mrb[150].mxu1 %v588_v34  ;;  %2687 = vst.msk [vmem:[%s6484_s4 + $0xb0] sm:$0xff] %vm2664_vm0, %v4858_v40  ;;  %v621_v34 = vld [vmem:[%s5991_s7 + $0xa78] sm:$0xff] }
 0x364   : > { %3855 = vmatprep.mubr.f32.mxu1 %v593_v35  ;;  %v2220_v37 = vpop.f32.mrb[46].mxu0  ;;  %v1002_v35 = vpop.permute.xlu1 %1001  ;;  %v620_v43 = vld [vmem:[%s5991_s7 + $0xa70] sm:$0xff] }
 0x365   : > { %4708 = vst.msk [vmem:[%s6484_s4 + $0x430] sm:$0xff] %vm2664_vm0, %v4970_v42  ;;  %v4859_v49 = vadd.f32 %v2220_v37, %v972_v48  ;;  %v2222_v50 = vpop.f32.mrb[47].mxu0  ;;  %2484 = vmatmul.mubr.f32.gmra.mrb[152].mxu0 %v592_v44 }
 0x366   : > { %v3592_v62 = vpop.f32.mrb[46].mxu1  ;;  %2488 = vmatprep.mubr.f32.mxu0 %v597_v46 }
 0x367   : > { %v4971_v51 = vadd.f32 %v3592_v62, %v972_v48  ;;  %v3594_v54 = vpop.f32.mrb[47].mxu1  ;;  %3856 = vmatmul.mubr.f32.gmra.mrb[152].mxu1 %v592_v44  ;;  %2688 = vst.msk [vmem:[%s6484_s4 + $0xb8] sm:$0xff] %vm2664_vm0, %v4859_v49  ;;  %v625_v44 = vld [vmem:[%s5991_s7 + $0xa98] sm:$0xff] }
 0x368   : > { %3860 = vmatprep.mubr.f32.mxu1 %v597_v46  ;;  %v2225_v59 = vpop.f32.mrb[48].mxu0  ;;  %v1007_v46 = vpop.permute.xlu0 %1006  ;;  %v624_v54 = vld [vmem:[%s5991_s7 + $0xa90] sm:$0xff] }
 0x369   : > { %4709 = vst.msk [vmem:[%s6484_s4 + $0x438] sm:$0xff] %vm2664_vm0, %v4971_v51  ;;  %v4860_v4 = vadd.f32 %v2225_v59, %v977_v57  ;;  %v2227_v61 = vpop.f32.mrb[49].mxu0  ;;  %2489 = vmatmul.mubr.f32.gmra.mrb[154].mxu0 %v596_v55 }
 0x36a   : > { %v3597_v60 = vpop.f32.mrb[48].mxu1  ;;  %2493 = vmatprep.mubr.f32.mxu0 %v601_v56 }
 0x36b   : > { %v4972_v47 = vadd.f32 %v3597_v60, %v977_v57  ;;  %v3599_v63 = vpop.f32.mrb[49].mxu1  ;;  %3861 = vmatmul.mubr.f32.gmra.mrb[154].mxu1 %v596_v55  ;;  %2689 = vst.msk [vmem:[%s6484_s4 + $0xc0] sm:$0xff] %vm2664_vm0, %v4860_v4  ;;  %v629_v55 = vld [vmem:[%s5991_s7 + $0xab8] sm:$0xff] }
 0x36c   : > { %3865 = vmatprep.mubr.f32.mxu1 %v601_v56  ;;  %v2230_v5 = vpop.f32.mrb[50].mxu0  ;;  %v1012_v56 = vpop.permute.xlu1 %1011  ;;  %v628_v63 = vld [vmem:[%s5991_s7 + $0xab0] sm:$0xff] }
 0x36d   : > { %4710 = vst.msk [vmem:[%s6484_s4 + $0x440] sm:$0xff] %vm2664_vm0, %v4972_v47  ;;  %v4861_v3 = vadd.f32 %v2230_v5, %v982_v2  ;;  %v2232_v7 = vpop.f32.mrb[51].mxu0  ;;  %2494 = vmatmul.mubr.f32.gmra.mrb[156].mxu0 %v600_v0 }
 0x36e   : > { %v3602_v6 = vpop.f32.mrb[50].mxu1  ;;  %2498 = vmatprep.mubr.f32.mxu0 %v605_v1 }
 0x36f   : > { %v4973_v36 = vadd.f32 %v3602_v6, %v982_v2  ;;  %v3604_v8 = vpop.f32.mrb[51].mxu1  ;;  %3866 = vmatmul.mubr.f32.gmra.mrb[156].mxu1 %v600_v0  ;;  %2690 = vst.msk [vmem:[%s6484_s4 + $0xc8] sm:$0xff] %vm2664_vm0, %v4861_v3  ;;  %v633_v0 = vld [vmem:[%s5991_s7 + $0xad8] sm:$0xff] }
 0x370   : > { %3870 = vmatprep.mubr.f32.mxu1 %v605_v1  ;;  %v2235_v12 = vpop.f32.mrb[52].mxu0  ;;  %v1017_v1 = vpop.permute.xlu0 %1016  ;;  %v632_v8 = vld [vmem:[%s5991_s7 + $0xad0] sm:$0xff] }
 0x371   : > { %4711 = vst.msk [vmem:[%s6484_s4 + $0x448] sm:$0xff] %vm2664_vm0, %v4973_v36  ;;  %v4862_v13 = vadd.f32 %v2235_v12, %v987_v10  ;;  %v2237_v16 = vpop.f32.mrb[53].mxu0  ;;  %2499 = vmatmul.mubr.f32.gmra.mrb[158].mxu0 %v604_v9 }
 0x372   : > { %v3607_v15 = vpop.f32.mrb[52].mxu1  ;;  %2503 = vmatprep.mubr.f32.mxu0 %v609_v11 }
 0x373   : > { %v4974_v45 = vadd.f32 %v3607_v15, %v987_v10  ;;  %v3609_v17 = vpop.f32.mrb[53].mxu1  ;;  %3871 = vmatmul.mubr.f32.gmra.mrb[158].mxu1 %v604_v9  ;;  %2691 = vst.msk [vmem:[%s6484_s4 + $0xd0] sm:$0xff] %vm2664_vm0, %v4862_v13  ;;  %v637_v9 = vld [vmem:[%s5991_s7 + $0xaf8] sm:$0xff] }
 0x374   : > { %3875 = vmatprep.mubr.f32.mxu1 %v609_v11  ;;  %v2240_v22 = vpop.f32.mrb[54].mxu0  ;;  %v1022_v11 = vpop.permute.xlu1 %1021  ;;  %v636_v17 = vld [vmem:[%s5991_s7 + $0xaf0] sm:$0xff] }
 0x375   : > { %4712 = vst.msk [vmem:[%s6484_s4 + $0x450] sm:$0xff] %vm2664_vm0, %v4974_v45  ;;  %v4863_v23 = vadd.f32 %v2240_v22, %v992_v19  ;;  %v2242_v25 = vpop.f32.mrb[55].mxu0  ;;  %2504 = vmatmul.mubr.f32.gmra.mrb[160].mxu0 %v608_v18 }
 0x376   : > { %v3612_v24 = vpop.f32.mrb[54].mxu1  ;;  %2508 = vmatprep.mubr.f32.mxu0 %v613_v14 }
 0x377   : > { %v4975_v52 = vadd.f32 %v3612_v24, %v992_v19  ;;  %v3614_v26 = vpop.f32.mrb[55].mxu1  ;;  %3876 = vmatmul.mubr.f32.gmra.mrb[160].mxu1 %v608_v18  ;;  %2692 = vst.msk [vmem:[%s6484_s4 + $0xd8] sm:$0xff] %vm2664_vm0, %v4863_v23  ;;  %v641_v18 = vld [vmem:[%s5991_s7 + $0xb18] sm:$0xff] }
 0x378   : > { %3880 = vmatprep.mubr.f32.mxu1 %v613_v14  ;;  %v2245_v29 = vpop.f32.mrb[56].mxu0  ;;  %v1027_v14 = vpop.permute.xlu0 %1026  ;;  %v640_v26 = vld [vmem:[%s5991_s7 + $0xb10] sm:$0xff] }
 0x379   : > { %4713 = vst.msk [vmem:[%s6484_s4 + $0x458] sm:$0xff] %vm2664_vm0, %v4975_v52  ;;  %v4864_v30 = vadd.f32 %v2245_v29, %v997_v28  ;;  %v2247_v32 = vpop.f32.mrb[57].mxu0  ;;  %2509 = vmatmul.mubr.f32.gmra.mrb[162].mxu0 %v612_v20 }
 0x37a   : > { %v3617_v31 = vpop.f32.mrb[56].mxu1  ;;  %2513 = vmatprep.mubr.f32.mxu0 %v617_v27 }
 0x37b   : > { %v4976_v53 = vadd.f32 %v3617_v31, %v997_v28  ;;  %v3619_v33 = vpop.f32.mrb[57].mxu1  ;;  %3881 = vmatmul.mubr.f32.gmra.mrb[162].mxu1 %v612_v20  ;;  %2693 = vst.msk [vmem:[%s6484_s4 + $0xe0] sm:$0xff] %vm2664_vm0, %v4864_v30  ;;  %v645_v20 = vld [vmem:[%s5991_s7 + $0xb38] sm:$0xff] }
 0x37c   : > { %3885 = vmatprep.mubr.f32.mxu1 %v617_v27  ;;  %v2250_v38 = vpop.f32.mrb[58].mxu0  ;;  %v1032_v27 = vpop.permute.xlu1 %1031  ;;  %v644_v33 = vld [vmem:[%s5991_s7 + $0xb30] sm:$0xff] }
 0x37d   : > { %4714 = vst.msk [vmem:[%s6484_s4 + $0x460] sm:$0xff] %vm2664_vm0, %v4976_v53  ;;  %v4865_v39 = vadd.f32 %v2250_v38, %v1002_v35  ;;  %v2252_v41 = vpop.f32.mrb[59].mxu0  ;;  %2514 = vmatmul.mubr.f32.gmra.mrb[164].mxu0 %v616_v21 }
 0x37e   : > { %v3622_v40 = vpop.f32.mrb[58].mxu1  ;;  %2518 = vmatprep.mubr.f32.mxu0 %v621_v34 }
 0x37f   : > { %v4977_v58 = vadd.f32 %v3622_v40, %v1002_v35  ;;  %v3624_v42 = vpop.f32.mrb[59].mxu1  ;;  %3886 = vmatmul.mubr.f32.gmra.mrb[164].mxu1 %v616_v21  ;;  %2694 = vst.msk [vmem:[%s6484_s4 + $0xe8] sm:$0xff] %vm2664_vm0, %v4865_v39  ;;  %v649_v21 = vld [vmem:[%s5991_s7 + $0xb58] sm:$0xff] }
 0x380   : > { %3890 = vmatprep.mubr.f32.mxu1 %v621_v34  ;;  %v2255_v48 = vpop.f32.mrb[60].mxu0  ;;  %v1037_v34 = vpop.permute.xlu0 %1036  ;;  %v648_v42 = vld [vmem:[%s5991_s7 + $0xb50] sm:$0xff] }
 0x381   : > { %4715 = vst.msk [vmem:[%s6484_s4 + $0x468] sm:$0xff] %vm2664_vm0, %v4977_v58  ;;  %v4866_v37 = vadd.f32 %v2255_v48, %v1007_v46  ;;  %v2257_v62 = vpop.f32.mrb[61].mxu0  ;;  %2519 = vmatmul.mubr.f32.gmra.mrb[166].mxu0 %v620_v43 }
 0x382   : > { %v3627_v49 = vpop.f32.mrb[60].mxu1  ;;  %2523 = vmatprep.mubr.f32.mxu0 %v625_v44 }
 0x383   : > { %v4978_v50 = vadd.f32 %v3627_v49, %v1007_v46  ;;  %v3629_v51 = vpop.f32.mrb[61].mxu1  ;;  %3891 = vmatmul.mubr.f32.gmra.mrb[166].mxu1 %v620_v43  ;;  %2695 = vst.msk [vmem:[%s6484_s4 + $0xf0] sm:$0xff] %vm2664_vm0, %v4866_v37  ;;  %v653_v43 = vld [vmem:[%s5991_s7 + $0xb78] sm:$0xff] }
 0x384   : > { %3895 = vmatprep.mubr.f32.mxu1 %v625_v44  ;;  %v2260_v57 = vpop.f32.mrb[62].mxu0  ;;  %v1042_v44 = vpop.permute.xlu1 %1041  ;;  %v652_v51 = vld [vmem:[%s5991_s7 + $0xb70] sm:$0xff] }
 0x385   : > { %4716 = vst.msk [vmem:[%s6484_s4 + $0x470] sm:$0xff] %vm2664_vm0, %v4978_v50  ;;  %v4867_v59 = vadd.f32 %v2260_v57, %v1012_v56  ;;  %v2262_v60 = vpop.f32.mrb[63].mxu0  ;;  %2524 = vmatmul.mubr.f32.gmra.mrb[168].mxu0 %v624_v54 }
 0x386   : > { %v3632_v4 = vpop.f32.mrb[62].mxu1  ;;  %2528 = vmatprep.mubr.f32.mxu0 %v629_v55 }
 0x387   : > { %v4979_v61 = vadd.f32 %v3632_v4, %v1012_v56  ;;  %v3634_v47 = vpop.f32.mrb[63].mxu1  ;;  %3896 = vmatmul.mubr.f32.gmra.mrb[168].mxu1 %v624_v54  ;;  %2696 = vst.msk [vmem:[%s6484_s4 + $0xf8] sm:$0xff] %vm2664_vm0, %v4867_v59  ;;  %v657_v54 = vld [vmem:[%s5991_s7 + $0xb98] sm:$0xff] }
 0x388   : > { %3900 = vmatprep.mubr.f32.mxu1 %v629_v55  ;;  %v2265_v2 = vpop.f32.mrb[64].mxu0  ;;  %v1047_v55 = vpop.permute.xlu0 %1046  ;;  %v656_v47 = vld [vmem:[%s5991_s7 + $0xb90] sm:$0xff] }
 0x389   : > { %4717 = vst.msk [vmem:[%s6484_s4 + $0x478] sm:$0xff] %vm2664_vm0, %v4979_v61  ;;  %v4868_v5 = vadd.f32 %v2265_v2, %v1017_v1  ;;  %v2267_v6 = vpop.f32.mrb[65].mxu0  ;;  %2529 = vmatmul.mubr.f32.gmra.mrb[170].mxu0 %v628_v63 }
 0x38a   : > { %v3637_v3 = vpop.f32.mrb[64].mxu1  ;;  %2533 = vmatprep.mubr.f32.mxu0 %v633_v0 }
 0x38b   : > { %v4980_v7 = vadd.f32 %v3637_v3, %v1017_v1  ;;  %v3639_v36 = vpop.f32.mrb[65].mxu1  ;;  %3901 = vmatmul.mubr.f32.gmra.mrb[170].mxu1 %v628_v63  ;;  %2697 = vst.msk [vmem:[%s6484_s4 + $0x100] sm:$0xff] %vm2664_vm0, %v4868_v5  ;;  %v661_v63 = vld [vmem:[%s5991_s7 + $0xbb8] sm:$0xff] }
 0x38c   : > { %3905 = vmatprep.mubr.f32.mxu1 %v633_v0  ;;  %v2270_v10 = vpop.f32.mrb[66].mxu0  ;;  %v1052_v0 = vpop.permute.xlu1 %1051  ;;  %v660_v36 = vld [vmem:[%s5991_s7 + $0xbb0] sm:$0xff] }
 0x38d   : > { %4718 = vst.msk [vmem:[%s6484_s4 + $0x480] sm:$0xff] %vm2664_vm0, %v4980_v7  ;;  %v4869_v12 = vadd.f32 %v2270_v10, %v1022_v11  ;;  %v2272_v15 = vpop.f32.mrb[67].mxu0  ;;  %2534 = vmatmul.mubr.f32.gmra.mrb[172].mxu0 %v632_v8 }
 0x38e   : > { %v3642_v13 = vpop.f32.mrb[66].mxu1  ;;  %2538 = vmatprep.mubr.f32.mxu0 %v637_v9 }
 0x38f   : > { %v4981_v16 = vadd.f32 %v3642_v13, %v1022_v11  ;;  %v3644_v45 = vpop.f32.mrb[67].mxu1  ;;  %3906 = vmatmul.mubr.f32.gmra.mrb[172].mxu1 %v632_v8  ;;  %2698 = vst.msk [vmem:[%s6484_s4 + $0x108] sm:$0xff] %vm2664_vm0, %v4869_v12  ;;  %v665_v8 = vld [vmem:[%s5991_s7 + $0xbd8] sm:$0xff] }
 0x390   : > { %3910 = vmatprep.mubr.f32.mxu1 %v637_v9  ;;  %v2275_v19 = vpop.f32.mrb[68].mxu0  ;;  %v1057_v9 = vpop.permute.xlu0 %1056  ;;  %v664_v45 = vld [vmem:[%s5991_s7 + $0xbd0] sm:$0xff] }
 0x391   : > { %4719 = vst.msk [vmem:[%s6484_s4 + $0x488] sm:$0xff] %vm2664_vm0, %v4981_v16  ;;  %v4870_v22 = vadd.f32 %v2275_v19, %v1027_v14  ;;  %v2277_v24 = vpop.f32.mrb[69].mxu0  ;;  %2539 = vmatmul.mubr.f32.gmra.mrb[174].mxu0 %v636_v17 }
 0x392   : > { %v3647_v23 = vpop.f32.mrb[68].mxu1  ;;  %2543 = vmatprep.mubr.f32.mxu0 %v641_v18 }
 0x393   : > { %v4982_v25 = vadd.f32 %v3647_v23, %v1027_v14  ;;  %v3649_v52 = vpop.f32.mrb[69].mxu1  ;;  %3911 = vmatmul.mubr.f32.gmra.mrb[174].mxu1 %v636_v17  ;;  %2699 = vst.msk [vmem:[%s6484_s4 + $0x110] sm:$0xff] %vm2664_vm0, %v4870_v22  ;;  %v669_v17 = vld [vmem:[%s5991_s7 + $0xbf8] sm:$0xff] }
 0x394   : > { %3915 = vmatprep.mubr.f32.mxu1 %v641_v18  ;;  %v2280_v28 = vpop.f32.mrb[70].mxu0  ;;  %v1062_v18 = vpop.permute.xlu1 %1061  ;;  %v668_v52 = vld [vmem:[%s5991_s7 + $0xbf0] sm:$0xff] }
 0x395   : > { %4720 = vst.msk [vmem:[%s6484_s4 + $0x490] sm:$0xff] %vm2664_vm0, %v4982_v25  ;;  %v4871_v29 = vadd.f32 %v2280_v28, %v1032_v27  ;;  %v2282_v31 = vpop.f32.mrb[71].mxu0  ;;  %2544 = vmatmul.mubr.f32.gmra.mrb[176].mxu0 %v640_v26 }
 0x396   : > { %v3652_v30 = vpop.f32.mrb[70].mxu1  ;;  %2548 = vmatprep.mubr.f32.mxu0 %v645_v20 }
 0x397   : > { %v4983_v32 = vadd.f32 %v3652_v30, %v1032_v27  ;;  %v3654_v53 = vpop.f32.mrb[71].mxu1  ;;  %3916 = vmatmul.mubr.f32.gmra.mrb[176].mxu1 %v640_v26  ;;  %2700 = vst.msk [vmem:[%s6484_s4 + $0x118] sm:$0xff] %vm2664_vm0, %v4871_v29  ;;  %v673_v26 = vld [vmem:[%s5991_s7 + $0xc18] sm:$0xff] }
 0x398   : > { %3920 = vmatprep.mubr.f32.mxu1 %v645_v20  ;;  %v2285_v35 = vpop.f32.mrb[72].mxu0  ;;  %v1067_v20 = vpop.permute.xlu0 %1066  ;;  %v672_v53 = vld [vmem:[%s5991_s7 + $0xc10] sm:$0xff] }
 0x399   : > { %4721 = vst.msk [vmem:[%s6484_s4 + $0x498] sm:$0xff] %vm2664_vm0, %v4983_v32  ;;  %v4872_v38 = vadd.f32 %v2285_v35, %v1037_v34  ;;  %v2287_v40 = vpop.f32.mrb[73].mxu0  ;;  %2549 = vmatmul.mubr.f32.gmra.mrb[178].mxu0 %v644_v33 }
 0x39a   : > { %v3657_v39 = vpop.f32.mrb[72].mxu1  ;;  %2553 = vmatprep.mubr.f32.mxu0 %v649_v21 }
 0x39b   : > { %v4984_v41 = vadd.f32 %v3657_v39, %v1037_v34  ;;  %v3659_v58 = vpop.f32.mrb[73].mxu1  ;;  %3921 = vmatmul.mubr.f32.gmra.mrb[178].mxu1 %v644_v33  ;;  %2701 = vst.msk [vmem:[%s6484_s4 + $0x120] sm:$0xff] %vm2664_vm0, %v4872_v38  ;;  %v677_v33 = vld [vmem:[%s5991_s7 + $0xc38] sm:$0xff] }
 0x39c   : > { %3925 = vmatprep.mubr.f32.mxu1 %v649_v21  ;;  %v2290_v46 = vpop.f32.mrb[74].mxu0  ;;  %v1072_v21 = vpop.permute.xlu1 %1071  ;;  %v676_v58 = vld [vmem:[%s5991_s7 + $0xc30] sm:$0xff] }
 0x39d   : > { %4722 = vst.msk [vmem:[%s6484_s4 + $0x4a0] sm:$0xff] %vm2664_vm0, %v4984_v41  ;;  %v4873_v48 = vadd.f32 %v2290_v46, %v1042_v44  ;;  %v2292_v49 = vpop.f32.mrb[75].mxu0  ;;  %2554 = vmatmul.mubr.f32.gmra.mrb[180].mxu0 %v648_v42 }
 0x39e   : > { %v3662_v37 = vpop.f32.mrb[74].mxu1  ;;  %2558 = vmatprep.mubr.f32.mxu0 %v653_v43 }
 0x39f   : > { %v4985_v62 = vadd.f32 %v3662_v37, %v1042_v44  ;;  %v3664_v50 = vpop.f32.mrb[75].mxu1  ;;  %3926 = vmatmul.mubr.f32.gmra.mrb[180].mxu1 %v648_v42  ;;  %2702 = vst.msk [vmem:[%s6484_s4 + $0x128] sm:$0xff] %vm2664_vm0, %v4873_v48  ;;  %v681_v42 = vld [vmem:[%s5991_s7 + $0xc58] sm:$0xff] }
 0x3a0   : > { %3930 = vmatprep.mubr.f32.mxu1 %v653_v43  ;;  %v2295_v56 = vpop.f32.mrb[76].mxu0  ;;  %v1077_v43 = vpop.permute.xlu0 %1076  ;;  %v680_v50 = vld [vmem:[%s5991_s7 + $0xc50] sm:$0xff] }
 0x3a1   : > { %4723 = vst.msk [vmem:[%s6484_s4 + $0x4a8] sm:$0xff] %vm2664_vm0, %v4985_v62  ;;  %v4874_v57 = vadd.f32 %v2295_v56, %v1047_v55  ;;  %v2297_v4 = vpop.f32.mrb[77].mxu0  ;;  %2559 = vmatmul.mubr.f32.gmra.mrb[182].mxu0 %v652_v51 }
 0x3a2   : > { %v3667_v59 = vpop.f32.mrb[76].mxu1  ;;  %2563 = vmatprep.mubr.f32.mxu0 %v657_v54 }
 0x3a3   : > { %v4986_v60 = vadd.f32 %v3667_v59, %v1047_v55  ;;  %v3669_v61 = vpop.f32.mrb[77].mxu1  ;;  %3931 = vmatmul.mubr.f32.gmra.mrb[182].mxu1 %v652_v51  ;;  %2703 = vst.msk [vmem:[%s6484_s4 + $0x130] sm:$0xff] %vm2664_vm0, %v4874_v57  ;;  %v685_v51 = vld [vmem:[%s5991_s7 + $0xc78] sm:$0xff] }
 0x3a4   : > { %3935 = vmatprep.mubr.f32.mxu1 %v657_v54  ;;  %v2300_v1 = vpop.f32.mrb[78].mxu0  ;;  %v1082_v54 = vpop.permute.xlu1 %1081  ;;  %v684_v61 = vld [vmem:[%s5991_s7 + $0xc70] sm:$0xff] }
 0x3a5   : > { %4724 = vst.msk [vmem:[%s6484_s4 + $0x4b0] sm:$0xff] %vm2664_vm0, %v4986_v60  ;;  %v4875_v2 = vadd.f32 %v2300_v1, %v1052_v0  ;;  %v2302_v3 = vpop.f32.mrb[79].mxu0  ;;  %2564 = vmatmul.mubr.f32.gmra.mrb[184].mxu0 %v656_v47 }
 0x3a6   : > { %v3672_v5 = vpop.f32.mrb[78].mxu1  ;;  %2568 = vmatprep.mubr.f32.mxu0 %v661_v63 }
 0x3a7   : > { %v4987_v6 = vadd.f32 %v3672_v5, %v1052_v0  ;;  %v3674_v7 = vpop.f32.mrb[79].mxu1  ;;  %3936 = vmatmul.mubr.f32.gmra.mrb[184].mxu1 %v656_v47  ;;  %2704 = vst.msk [vmem:[%s6484_s4 + $0x138] sm:$0xff] %vm2664_vm0, %v4875_v2  ;;  %v689_v47 = vld [vmem:[%s5991_s7 + $0xc98] sm:$0xff] }
 0x3a8   : > { %3940 = vmatprep.mubr.f32.mxu1 %v661_v63  ;;  %v2305_v11 = vpop.f32.mrb[80].mxu0  ;;  %v1087_v63 = vpop.permute.xlu0 %1086  ;;  %v688_v7 = vld [vmem:[%s5991_s7 + $0xc90] sm:$0xff] }
 0x3a9   : > { %4725 = vst.msk [vmem:[%s6484_s4 + $0x4b8] sm:$0xff] %vm2664_vm0, %v4987_v6  ;;  %v4876_v10 = vadd.f32 %v2305_v11, %v1057_v9  ;;  %v2307_v13 = vpop.f32.mrb[81].mxu0  ;;  %2569 = vmatmul.mubr.f32.gmra.mrb[186].mxu0 %v660_v36 }
 0x3aa   : > { %v3677_v12 = vpop.f32.mrb[80].mxu1  ;;  %2573 = vmatprep.mubr.f32.mxu0 %v665_v8 }
 0x3ab   : > { %v4988_v15 = vadd.f32 %v3677_v12, %v1057_v9  ;;  %v3679_v16 = vpop.f32.mrb[81].mxu1  ;;  %3941 = vmatmul.mubr.f32.gmra.mrb[186].mxu1 %v660_v36  ;;  %2705 = vst.msk [vmem:[%s6484_s4 + $0x140] sm:$0xff] %vm2664_vm0, %v4876_v10  ;;  %v693_v36 = vld [vmem:[%s5991_s7 + $0xcb8] sm:$0xff] }
 0x3ac   : > { %3945 = vmatprep.mubr.f32.mxu1 %v665_v8  ;;  %v2310_v14 = vpop.f32.mrb[82].mxu0  ;;  %v1092_v8 = vpop.permute.xlu1 %1091  ;;  %v692_v16 = vld [vmem:[%s5991_s7 + $0xcb0] sm:$0xff] }
 0x3ad   : > { %4726 = vst.msk [vmem:[%s6484_s4 + $0x4c0] sm:$0xff] %vm2664_vm0, %v4988_v15  ;;  %v4877_v19 = vadd.f32 %v2310_v14, %v1062_v18  ;;  %v2312_v23 = vpop.f32.mrb[83].mxu0  ;;  %2574 = vmatmul.mubr.f32.gmra.mrb[188].mxu0 %v664_v45 }
 0x3ae   : > { %v3682_v22 = vpop.f32.mrb[82].mxu1  ;;  %2578 = vmatprep.mubr.f32.mxu0 %v669_v17 }
 0x3af   : > { %v4989_v24 = vadd.f32 %v3682_v22, %v1062_v18  ;;  %v3684_v25 = vpop.f32.mrb[83].mxu1  ;;  %3946 = vmatmul.mubr.f32.gmra.mrb[188].mxu1 %v664_v45  ;;  %2706 = vst.msk [vmem:[%s6484_s4 + $0x148] sm:$0xff] %vm2664_vm0, %v4877_v19  ;;  %v697_v45 = vld [vmem:[%s5991_s7 + $0xcd8] sm:$0xff] }
 0x3b0   : > { %3950 = vmatprep.mubr.f32.mxu1 %v669_v17  ;;  %v2315_v27 = vpop.f32.mrb[84].mxu0  ;;  %v1097_v17 = vpop.permute.xlu0 %1096  ;;  %v696_v25 = vld [vmem:[%s5991_s7 + $0xcd0] sm:$0xff] }
 0x3b1   : > { %4727 = vst.msk [vmem:[%s6484_s4 + $0x4c8] sm:$0xff] %vm2664_vm0, %v4989_v24  ;;  %v4878_v28 = vadd.f32 %v2315_v27, %v1067_v20  ;;  %v2317_v30 = vpop.f32.mrb[85].mxu0  ;;  %2579 = vmatmul.mubr.f32.gmra.mrb[190].mxu0 %v668_v52 }
 0x3b2   : > { %v3687_v29 = vpop.f32.mrb[84].mxu1  ;;  %2583 = vmatprep.mubr.f32.mxu0 %v673_v26 }
 0x3b3   : > { %v4990_v31 = vadd.f32 %v3687_v29, %v1067_v20  ;;  %v3689_v32 = vpop.f32.mrb[85].mxu1  ;;  %3951 = vmatmul.mubr.f32.gmra.mrb[190].mxu1 %v668_v52  ;;  %2707 = vst.msk [vmem:[%s6484_s4 + $0x150] sm:$0xff] %vm2664_vm0, %v4878_v28  ;;  %v701_v52 = vld [vmem:[%s5991_s7 + $0xcf8] sm:$0xff] }
 0x3b4   : > { %3955 = vmatprep.mubr.f32.mxu1 %v673_v26  ;;  %v2320_v34 = vpop.f32.mrb[86].mxu0  ;;  %v1102_v26 = vpop.permute.xlu1 %1101  ;;  %v700_v32 = vld [vmem:[%s5991_s7 + $0xcf0] sm:$0xff] }
 0x3b5   : > { %4728 = vst.msk [vmem:[%s6484_s4 + $0x4d0] sm:$0xff] %vm2664_vm0, %v4990_v31  ;;  %v4879_v35 = vadd.f32 %v2320_v34, %v1072_v21  ;;  %v2322_v39 = vpop.f32.mrb[87].mxu0  ;;  %2584 = vmatmul.mubr.f32.gmra.mrb[192].mxu0 %v672_v53 }
 0x3b6   : > { %v3692_v38 = vpop.f32.mrb[86].mxu1  ;;  %2588 = vmatprep.mubr.f32.mxu0 %v677_v33 }
 0x3b7   : > { %v4991_v40 = vadd.f32 %v3692_v38, %v1072_v21  ;;  %v3694_v41 = vpop.f32.mrb[87].mxu1  ;;  %3956 = vmatmul.mubr.f32.gmra.mrb[192].mxu1 %v672_v53  ;;  %2708 = vst.msk [vmem:[%s6484_s4 + $0x158] sm:$0xff] %vm2664_vm0, %v4879_v35  ;;  %v705_v53 = vld [vmem:[%s5991_s7 + $0xd18] sm:$0xff] }
 0x3b8   : > { %3960 = vmatprep.mubr.f32.mxu1 %v677_v33  ;;  %v2325_v44 = vpop.f32.mrb[88].mxu0  ;;  %v1107_v33 = vpop.permute.xlu0 %1106  ;;  %v704_v41 = vld [vmem:[%s5991_s7 + $0xd10] sm:$0xff] }
 0x3b9   : > { %4729 = vst.msk [vmem:[%s6484_s4 + $0x4d8] sm:$0xff] %vm2664_vm0, %v4991_v40  ;;  %v4880_v46 = vadd.f32 %v2325_v44, %v1077_v43  ;;  %v2327_v37 = vpop.f32.mrb[89].mxu0  ;;  %2589 = vmatmul.mubr.f32.gmra.mrb[194].mxu0 %v676_v58 }
 0x3ba   : > { %v3697_v48 = vpop.f32.mrb[88].mxu1  ;;  %2593 = vmatprep.mubr.f32.mxu0 %v681_v42 }
 0x3bb   : > { %v4992_v49 = vadd.f32 %v3697_v48, %v1077_v43  ;;  %v3699_v62 = vpop.f32.mrb[89].mxu1  ;;  %3961 = vmatmul.mubr.f32.gmra.mrb[194].mxu1 %v676_v58  ;;  %2709 = vst.msk [vmem:[%s6484_s4 + $0x160] sm:$0xff] %vm2664_vm0, %v4880_v46  ;;  %v709_v58 = vld [vmem:[%s5991_s7 + $0xd38] sm:$0xff] }
 0x3bc   : > { %3965 = vmatprep.mubr.f32.mxu1 %v681_v42  ;;  %v2330_v55 = vpop.f32.mrb[90].mxu0  ;;  %v1112_v42 = vpop.permute.xlu1 %1111  ;;  %v708_v62 = vld [vmem:[%s5991_s7 + $0xd30] sm:$0xff] }
 0x3bd   : > { %4730 = vst.msk [vmem:[%s6484_s4 + $0x4e0] sm:$0xff] %vm2664_vm0, %v4992_v49  ;;  %v4881_v56 = vadd.f32 %v2330_v55, %v1082_v54  ;;  %v2332_v59 = vpop.f32.mrb[91].mxu0  ;;  %2594 = vmatmul.mubr.f32.gmra.mrb[196].mxu0 %v680_v50 }
 0x3be   : > { %v3702_v57 = vpop.f32.mrb[90].mxu1  ;;  %2598 = vmatprep.mubr.f32.mxu0 %v685_v51 }
 0x3bf   : > { %v4993_v4 = vadd.f32 %v3702_v57, %v1082_v54  ;;  %v3704_v60 = vpop.f32.mrb[91].mxu1  ;;  %3966 = vmatmul.mubr.f32.gmra.mrb[196].mxu1 %v680_v50  ;;  %2710 = vst.msk [vmem:[%s6484_s4 + $0x168] sm:$0xff] %vm2664_vm0, %v4881_v56  ;;  %v713_v50 = vld [vmem:[%s5991_s7 + $0xd58] sm:$0xff] }
 0x3c0   : > { %3970 = vmatprep.mubr.f32.mxu1 %v685_v51  ;;  %v2335_v0 = vpop.f32.mrb[92].mxu0  ;;  %v1117_v51 = vpop.permute.xlu0 %1116  ;;  %v712_v60 = vld [vmem:[%s5991_s7 + $0xd50] sm:$0xff] }
 0x3c1   : > { %4731 = vst.msk [vmem:[%s6484_s4 + $0x4e8] sm:$0xff] %vm2664_vm0, %v4993_v4  ;;  %v4882_v1 = vadd.f32 %v2335_v0, %v1087_v63  ;;  %v2337_v5 = vpop.f32.mrb[93].mxu0  ;;  %2599 = vmatmul.mubr.f32.gmra.mrb[198].mxu0 %v684_v61 }
 0x3c2   : > { %v3707_v2 = vpop.f32.mrb[92].mxu1  ;;  %2603 = vmatprep.mubr.f32.mxu0 %v689_v47 }
 0x3c3   : > { %v4994_v3 = vadd.f32 %v3707_v2, %v1087_v63  ;;  %v3709_v6 = vpop.f32.mrb[93].mxu1  ;;  %3971 = vmatmul.mubr.f32.gmra.mrb[198].mxu1 %v684_v61  ;;  %2711 = vst.msk [vmem:[%s6484_s4 + $0x170] sm:$0xff] %vm2664_vm0, %v4882_v1  ;;  %v717_v61 = vld [vmem:[%s5991_s7 + $0xd78] sm:$0xff] }
 0x3c4   : > { %3975 = vmatprep.mubr.f32.mxu1 %v689_v47  ;;  %v2340_v9 = vpop.f32.mrb[94].mxu0  ;;  %v1122_v47 = vpop.permute.xlu1 %1121  ;;  %v716_v6 = vld [vmem:[%s5991_s7 + $0xd70] sm:$0xff] }
 0x3c5   : > { %4732 = vst.msk [vmem:[%s6484_s4 + $0x4f0] sm:$0xff] %vm2664_vm0, %v4994_v3  ;;  %v4883_v11 = vadd.f32 %v2340_v9, %v1092_v8  ;;  %v2342_v12 = vpop.f32.mrb[95].mxu0  ;;  %2604 = vmatmul.mubr.f32.gmra.mrb[200].mxu0 %v688_v7 }
 0x3c6   : > { %v3712_v10 = vpop.f32.mrb[94].mxu1  ;;  %2608 = vmatprep.mubr.f32.mxu0 %v693_v36 }
 0x3c7   : > { %v4995_v13 = vadd.f32 %v3712_v10, %v1092_v8  ;;  %v3714_v15 = vpop.f32.mrb[95].mxu1  ;;  %3976 = vmatmul.mubr.f32.gmra.mrb[200].mxu1 %v688_v7  ;;  %2712 = vst.msk [vmem:[%s6484_s4 + $0x178] sm:$0xff] %vm2664_vm0, %v4883_v11  ;;  %v721_v7 = vld [vmem:[%s5991_s7 + $0xd98] sm:$0xff] }
 0x3c8   : > { %3980 = vmatprep.mubr.f32.mxu1 %v693_v36  ;;  %v2345_v18 = vpop.f32.mrb[96].mxu0  ;;  %v1127_v36 = vpop.permute.xlu0 %1126  ;;  %v720_v15 = vld [vmem:[%s5991_s7 + $0xd90] sm:$0xff] }
 0x3c9   : > { %4733 = vst.msk [vmem:[%s6484_s4 + $0x4f8] sm:$0xff] %vm2664_vm0, %v4995_v13  ;;  %v4884_v14 = vadd.f32 %v2345_v18, %v1097_v17  ;;  %v2347_v22 = vpop.f32.mrb[97].mxu0  ;;  %2609 = vmatmul.mubr.f32.gmra.mrb[202].mxu0 %v692_v16 }
 0x3ca   : > { %v3717_v19 = vpop.f32.mrb[96].mxu1  ;;  %2613 = vmatprep.mubr.f32.mxu0 %v697_v45 }
 0x3cb   : > { %v4996_v23 = vadd.f32 %v3717_v19, %v1097_v17  ;;  %v3719_v24 = vpop.f32.mrb[97].mxu1  ;;  %3981 = vmatmul.mubr.f32.gmra.mrb[202].mxu1 %v692_v16  ;;  %2713 = vst.msk [vmem:[%s6484_s4 + $0x180] sm:$0xff] %vm2664_vm0, %v4884_v14  ;;  %v725_v16 = vld [vmem:[%s5991_s7 + $0xdb8] sm:$0xff] }
 0x3cc   : > { %3985 = vmatprep.mubr.f32.mxu1 %v697_v45  ;;  %v2350_v20 = vpop.f32.mrb[98].mxu0  ;;  %v1132_v45 = vpop.permute.xlu1 %1131  ;;  %v724_v24 = vld [vmem:[%s5991_s7 + $0xdb0] sm:$0xff] }
 0x3cd   : > { %4734 = vst.msk [vmem:[%s6484_s4 + $0x500] sm:$0xff] %vm2664_vm0, %v4996_v23  ;;  %v4885_v27 = vadd.f32 %v2350_v20, %v1102_v26  ;;  %v2352_v29 = vpop.f32.mrb[99].mxu0  ;;  %2614 = vmatmul.mubr.f32.gmra.mrb[204].mxu0 %v696_v25 }
 0x3ce   : > { %v3722_v28 = vpop.f32.mrb[98].mxu1  ;;  %2618 = vmatprep.mubr.f32.mxu0 %v701_v52 }
 0x3cf   : > { %v4997_v30 = vadd.f32 %v3722_v28, %v1102_v26  ;;  %v3724_v31 = vpop.f32.mrb[99].mxu1  ;;  %3986 = vmatmul.mubr.f32.gmra.mrb[204].mxu1 %v696_v25  ;;  %2714 = vst.msk [vmem:[%s6484_s4 + $0x188] sm:$0xff] %vm2664_vm0, %v4885_v27  ;;  %v729_v25 = vld [vmem:[%s5991_s7 + $0xdd8] sm:$0xff] }
 0x3d0   : > { %3990 = vmatprep.mubr.f32.mxu1 %v701_v52  ;;  %v2355_v21 = vpop.f32.mrb[100].mxu0  ;;  %v1137_v52 = vpop.permute.xlu0 %1136  ;;  %v728_v31 = vld [vmem:[%s5991_s7 + $0xdd0] sm:$0xff] }
 0x3d1   : > { %4735 = vst.msk [vmem:[%s6484_s4 + $0x508] sm:$0xff] %vm2664_vm0, %v4997_v30  ;;  %v4886_v34 = vadd.f32 %v2355_v21, %v1107_v33  ;;  %v2357_v38 = vpop.f32.mrb[101].mxu0  ;;  %2619 = vmatmul.mubr.f32.gmra.mrb[206].mxu0 %v700_v32 }
 0x3d2   : > { %v3727_v35 = vpop.f32.mrb[100].mxu1  ;;  %2623 = vmatprep.mubr.f32.mxu0 %v705_v53 }
 0x3d3   : > { %v4998_v39 = vadd.f32 %v3727_v35, %v1107_v33  ;;  %v3729_v40 = vpop.f32.mrb[101].mxu1  ;;  %3991 = vmatmul.mubr.f32.gmra.mrb[206].mxu1 %v700_v32  ;;  %2715 = vst.msk [vmem:[%s6484_s4 + $0x190] sm:$0xff] %vm2664_vm0, %v4886_v34  ;;  %v733_v32 = vld [vmem:[%s5991_s7 + $0xdf8] sm:$0xff] }
 0x3d4   : > { %3995 = vmatprep.mubr.f32.mxu1 %v705_v53  ;;  %v2360_v43 = vpop.f32.mrb[102].mxu0  ;;  %v1142_v53 = vpop.permute.xlu1 %1141  ;;  %v732_v40 = vld [vmem:[%s5991_s7 + $0xdf0] sm:$0xff] }
 0x3d5   : > { %4736 = vst.msk [vmem:[%s6484_s4 + $0x510] sm:$0xff] %vm2664_vm0, %v4998_v39  ;;  %v4887_v44 = vadd.f32 %v2360_v43, %v1112_v42  ;;  %v2362_v48 = vpop.f32.mrb[103].mxu0  ;;  %2624 = vmatmul.mubr.f32.gmra.mrb[208].mxu0 %v704_v41 }
 0x3d6   : > { %v3732_v46 = vpop.f32.mrb[102].mxu1  ;;  %2628 = vmatprep.mubr.f32.mxu0 %v709_v58 }
 0x3d7   : > { %v4999_v37 = vadd.f32 %v3732_v46, %v1112_v42  ;;  %v3734_v49 = vpop.f32.mrb[103].mxu1  ;;  %3996 = vmatmul.mubr.f32.gmra.mrb[208].mxu1 %v704_v41  ;;  %2716 = vst.msk [vmem:[%s6484_s4 + $0x198] sm:$0xff] %vm2664_vm0, %v4887_v44  ;;  %v1147_v41 = vpop.permute.xlu0 %1146 }
 0x3d8   : > { %4000 = vmatprep.mubr.f32.mxu1 %v709_v58  ;;  %v2365_v54 = vpop.f32.mrb[104].mxu0 }
 0x3d9   : > { %4737 = vst.msk [vmem:[%s6484_s4 + $0x518] sm:$0xff] %vm2664_vm0, %v4999_v37  ;;  %v4888_v55 = vadd.f32 %v2365_v54, %v1117_v51  ;;  %v2367_v57 = vpop.f32.mrb[105].mxu0  ;;  %2629 = vmatmul.mubr.f32.gmra.mrb[210].mxu0 %v708_v62  ;;  %v1152_v37 = vpop.permute.xlu1 %1151 }
 0x3da   : > { %v3737_v56 = vpop.f32.mrb[104].mxu1  ;;  %2633 = vmatprep.mubr.f32.mxu0 %v713_v50 }
 0x3db   : > { %v5000_v59 = vadd.f32 %v3737_v56, %v1117_v51  ;;  %v3739_v4 = vpop.f32.mrb[105].mxu1  ;;  %4001 = vmatmul.mubr.f32.gmra.mrb[210].mxu1 %v708_v62  ;;  %2717 = vst.msk [vmem:[%s6484_s4 + $0x1a0] sm:$0xff] %vm2664_vm0, %v4888_v55  ;;  %v1157_v56 = vpop.permute.xlu0 %1156 }
 0x3dc   : > { %4005 = vmatprep.mubr.f32.mxu1 %v713_v50  ;;  %v2370_v63 = vpop.f32.mrb[106].mxu0 }
 0x3dd   : > { %4738 = vst.msk [vmem:[%s6484_s4 + $0x520] sm:$0xff] %vm2664_vm0, %v5000_v59  ;;  %v4889_v0 = vadd.f32 %v2370_v63, %v1122_v47  ;;  %v2372_v2 = vpop.f32.mrb[107].mxu0  ;;  %2634 = vmatmul.mubr.f32.gmra.mrb[212].mxu0 %v712_v60  ;;  %v1162_v63 = vpop.permute.xlu1 %1161 }
 0x3de   : > { %v3742_v1 = vpop.f32.mrb[106].mxu1  ;;  %2638 = vmatprep.mubr.f32.mxu0 %v717_v61 }
 0x3df   : > { %v5001_v5 = vadd.f32 %v3742_v1, %v1122_v47  ;;  %v3744_v3 = vpop.f32.mrb[107].mxu1  ;;  %4006 = vmatmul.mubr.f32.gmra.mrb[212].mxu1 %v712_v60  ;;  %2718 = vst.msk [vmem:[%s6484_s4 + $0x1a8] sm:$0xff] %vm2664_vm0, %v4889_v0 }
 0x3e0   : > { %4010 = vmatprep.mubr.f32.mxu1 %v717_v61  ;;  %v2375_v8 = vpop.f32.mrb[108].mxu0 }
 0x3e1   : > { %4739 = vst.msk [vmem:[%s6484_s4 + $0x528] sm:$0xff] %vm2664_vm0, %v5001_v5  ;;  %v4890_v9 = vadd.f32 %v2375_v8, %v1127_v36  ;;  %v2377_v10 = vpop.f32.mrb[109].mxu0  ;;  %2639 = vmatmul.mubr.f32.gmra.mrb[214].mxu0 %v716_v6 }
 0x3e2   : > { %v3747_v11 = vpop.f32.mrb[108].mxu1  ;;  %2643 = vmatprep.mubr.f32.mxu0 %v721_v7 }
 0x3e3   : > { %v5002_v12 = vadd.f32 %v3747_v11, %v1127_v36  ;;  %v3749_v13 = vpop.f32.mrb[109].mxu1  ;;  %4011 = vmatmul.mubr.f32.gmra.mrb[214].mxu1 %v716_v6  ;;  %2719 = vst.msk [vmem:[%s6484_s4 + $0x1b0] sm:$0xff] %vm2664_vm0, %v4890_v9 }
 0x3e4   : > { %4015 = vmatprep.mubr.f32.mxu1 %v721_v7  ;;  %v2380_v17 = vpop.f32.mrb[110].mxu0  ;;  %v1167_v7 = vpop.permute.xlu0 %1166 }
 0x3e5   : > { %4740 = vst.msk [vmem:[%s6484_s4 + $0x530] sm:$0xff] %vm2664_vm0, %v5002_v12  ;;  %v4891_v18 = vadd.f32 %v2380_v17, %v1132_v45  ;;  %v2382_v19 = vpop.f32.mrb[111].mxu0  ;;  %2644 = vmatmul.mubr.f32.gmra.mrb[216].mxu0 %v720_v15  ;;  %v1172_v13 = vpop.permute.xlu1 %1171 }
 0x3e6   : > { %v3752_v14 = vpop.f32.mrb[110].mxu1  ;;  %2648 = vmatprep.mubr.f32.mxu0 %v725_v16 }
 0x3e7   : > { %v5003_v22 = vadd.f32 %v3752_v14, %v1132_v45  ;;  %v3754_v23 = vpop.f32.mrb[111].mxu1  ;;  %4016 = vmatmul.mubr.f32.gmra.mrb[216].mxu1 %v720_v15  ;;  %2720 = vst.msk [vmem:[%s6484_s4 + $0x1b8] sm:$0xff] %vm2664_vm0, %v4891_v18 }
 0x3e8   : > { %4020 = vmatprep.mubr.f32.mxu1 %v725_v16  ;;  %v2385_v26 = vpop.f32.mrb[112].mxu0  ;;  %v1177_v19 = vpop.permute.xlu0 %1176 }
 0x3e9   : > { %4741 = vst.msk [vmem:[%s6484_s4 + $0x538] sm:$0xff] %vm2664_vm0, %v5003_v22  ;;  %v4892_v20 = vadd.f32 %v2385_v26, %v1137_v52  ;;  %v2387_v28 = vpop.f32.mrb[113].mxu0  ;;  %2649 = vmatmul.mubr.f32.gmra.mrb[218].mxu0 %v724_v24 }
 0x3ea   : > { %v3757_v27 = vpop.f32.mrb[112].mxu1  ;;  %2653 = vmatprep.mubr.f32.mxu0 %v729_v25 }
 0x3eb   : > { %v5004_v29 = vadd.f32 %v3757_v27, %v1137_v52  ;;  %v3759_v30 = vpop.f32.mrb[113].mxu1  ;;  %4021 = vmatmul.mubr.f32.gmra.mrb[218].mxu1 %v724_v24  ;;  %2721 = vst.msk [vmem:[%s6484_s4 + $0x1c0] sm:$0xff] %vm2664_vm0, %v4892_v20  ;;  %v1182_v20 = vpop.permute.xlu1 %1181 }
 0x3ec   : > { %4025 = vmatprep.mubr.f32.mxu1 %v729_v25  ;;  %v2390_v33 = vpop.f32.mrb[114].mxu0 }
 0x3ed   : > { %4742 = vst.msk [vmem:[%s6484_s4 + $0x540] sm:$0xff] %vm2664_vm0, %v5004_v29  ;;  %v4893_v21 = vadd.f32 %v2390_v33, %v1142_v53  ;;  %v2392_v35 = vpop.f32.mrb[115].mxu0  ;;  %2654 = vmatmul.mubr.f32.gmra.mrb[220].mxu0 %v728_v31 }
 0x3ee   : > { %v3762_v34 = vpop.f32.mrb[114].mxu1  ;;  %2658 = vmatprep.mubr.f32.mxu0 %v733_v32 }
 0x3ef   : > { %v5005_v38 = vadd.f32 %v3762_v34, %v1142_v53  ;;  %v3764_v39 = vpop.f32.mrb[115].mxu1  ;;  %4026 = vmatmul.mubr.f32.gmra.mrb[220].mxu1 %v728_v31  ;;  %2722 = vst.msk [vmem:[%s6484_s4 + $0x1c8] sm:$0xff] %vm2664_vm0, %v4893_v21  ;;  %v1187_v53 = vpop.permute.xlu0 %1186 }
 0x3f0   : > { %4030 = vmatprep.mubr.f32.mxu1 %v733_v32  ;;  %v2395_v58 = vpop.f32.mrb[116].mxu0 }
 0x3f1   : > { %4743 = vst.msk [vmem:[%s6484_s4 + $0x548] sm:$0xff] %vm2664_vm0, %v5005_v38  ;;  %v4894_v42 = vadd.f32 %v2395_v58, %v1147_v41  ;;  %v2397_v44 = vpop.f32.mrb[117].mxu0  ;;  %2659 = vmatmul.mubr.f32.gmra.mrb[222].mxu0 %v732_v40 }
 0x3f2   : > { %v3767_v43 = vpop.f32.mrb[116].mxu1 }
 0x3f3   : > { %v5006_v46 = vadd.f32 %v3767_v43, %v1147_v41  ;;  %v3769_v48 = vpop.f32.mrb[117].mxu1  ;;  %4031 = vmatmul.mubr.f32.gmra.mrb[222].mxu1 %v732_v40  ;;  %2723 = vst.msk [vmem:[%s6484_s4 + $0x1d0] sm:$0xff] %vm2664_vm0, %v4894_v42  ;;  %v1192_v40 = vpop.permute.xlu1 %1191 }
 0x3f4   : > { %v2400_v49 = vpop.f32.mrb[118].mxu0  ;;  %v1197_v48 = vpop.permute.xlu0 %1196 }
 0x3f5   : > { %4744 = vst.msk [vmem:[%s6484_s4 + $0x550] sm:$0xff] %vm2664_vm0, %v5006_v46  ;;  %v4895_v62 = vadd.f32 %v2400_v49, %v1152_v37  ;;  %v2402_v51 = vpop.f32.mrb[119].mxu0 }
 0x3f6   : > { %v3772_v50 = vpop.f32.mrb[118].mxu1 }
 0x3f7   : > { %v5007_v54 = vadd.f32 %v3772_v50, %v1152_v37  ;;  %v3774_v55 = vpop.f32.mrb[119].mxu1  ;;  %2724 = vst.msk [vmem:[%s6484_s4 + $0x1d8] sm:$0xff] %vm2664_vm0, %v4895_v62 }
 0x3f8   : > { %v2405_v57 = vpop.f32.mrb[120].mxu0  ;;  %v1202_v55 = vpop.permute.xlu1 %1201 }
 0x3f9   : > { %4745 = vst.msk [vmem:[%s6484_s4 + $0x558] sm:$0xff] %vm2664_vm0, %v5007_v54  ;;  %v4896_v59 = vadd.f32 %v2405_v57, %v1157_v56  ;;  %v2407_v60 = vpop.f32.mrb[121].mxu0 }
 0x3fa   : > { %v3777_v4 = vpop.f32.mrb[120].mxu1 }
 0x3fb   : > { %v5008_v61 = vadd.f32 %v3777_v4, %v1157_v56  ;;  %v3779_v47 = vpop.f32.mrb[121].mxu1  ;;  %2725 = vst.msk [vmem:[%s6484_s4 + $0x1e0] sm:$0xff] %vm2664_vm0, %v4896_v59 }
 0x3fc   : > { %v2410_v0 = vpop.f32.mrb[122].mxu0  ;;  %v1207_v47 = vpop.permute.xlu0 %1206 }
 0x3fd   : > { %4746 = vst.msk [vmem:[%s6484_s4 + $0x560] sm:$0xff] %vm2664_vm0, %v5008_v61  ;;  %v4897_v1 = vadd.f32 %v2410_v0, %v1162_v63  ;;  %v2412_v5 = vpop.f32.mrb[123].mxu0 }
 0x3fe   : > { %v3782_v2 = vpop.f32.mrb[122].mxu1 }
 0x3ff   : > { %v5009_v3 = vadd.f32 %v3782_v2, %v1162_v63  ;;  %v3784_v6 = vpop.f32.mrb[123].mxu1  ;;  %2726 = vst.msk [vmem:[%s6484_s4 + $0x1e8] sm:$0xff] %vm2664_vm0, %v4897_v1 }
 0x400   : > { %v2415_v36 = vpop.f32.mrb[124].mxu0  ;;  %v1212_v6 = vpop.permute.xlu1 %1211 }
 0x401   : > { %4747 = vst.msk [vmem:[%s6484_s4 + $0x568] sm:$0xff] %vm2664_vm0, %v5009_v3  ;;  %v4898_v8 = vadd.f32 %v2415_v36, %v1167_v7  ;;  %v2417_v11 = vpop.f32.mrb[125].mxu0 }
 0x402   : > { %v3787_v9 = vpop.f32.mrb[124].mxu1 }
 0x403   : > { %v5010_v10 = vadd.f32 %v3787_v9, %v1167_v7  ;;  %v3789_v12 = vpop.f32.mrb[125].mxu1  ;;  %2727 = vst.msk [vmem:[%s6484_s4 + $0x1f0] sm:$0xff] %vm2664_vm0, %v4898_v8 }
 0x404   : > { %v2420_v15 = vpop.f32.mrb[126].mxu0  ;;  %v1217_v12 = vpop.permute.xlu0 %1216 }
 0x405   : > { %4748 = vst.msk [vmem:[%s6484_s4 + $0x570] sm:$0xff] %vm2664_vm0, %v5010_v10  ;;  %v4899_v16 = vadd.f32 %v2420_v15, %v1172_v13  ;;  %v2422_v17 = vpop.f32.mrb[127].mxu0 }
 0x406   : > { %v3792_v45 = vpop.f32.mrb[126].mxu1 }
 0x407   : > { %v5011_v18 = vadd.f32 %v3792_v45, %v1172_v13  ;;  %v3794_v14 = vpop.f32.mrb[127].mxu1  ;;  %2728 = vst.msk [vmem:[%s6484_s4 + $0x1f8] sm:$0xff] %vm2664_vm0, %v4899_v16 }
 0x408   : > { %v2425_v22 = vpop.f32.mrb[128].mxu0  ;;  %v1222_v14 = vpop.permute.xlu1 %1221 }
 0x409   : > { %4749 = vst.msk [vmem:[%s6484_s4 + $0x578] sm:$0xff] %vm2664_vm0, %v5011_v18  ;;  %v4900_v23 = vadd.f32 %v2425_v22, %v1177_v19  ;;  %v2427_v25 = vpop.f32.mrb[129].mxu0 }
 0x40a   : > { %v3797_v24 = vpop.f32.mrb[128].mxu1 }
 0x40b   : > { %v5012_v52 = vadd.f32 %v3797_v24, %v1177_v19  ;;  %v3799_v26 = vpop.f32.mrb[129].mxu1  ;;  %2729 = vst.msk [vmem:[%s6484_s4 + $0x200] sm:$0xff] %vm2664_vm0, %v4900_v23 }
 0x40c   : > { %v2430_v27 = vpop.f32.mrb[130].mxu0  ;;  %v1227_v26 = vpop.permute.xlu0 %1226 }
 0x40d   : > { %4750 = vst.msk [vmem:[%s6484_s4 + $0x580] sm:$0xff] %vm2664_vm0, %v5012_v52  ;;  %v4901_v28 = vadd.f32 %v2430_v27, %v1182_v20  ;;  %v2432_v30 = vpop.f32.mrb[131].mxu0 }
 0x40e   : > { %v3802_v29 = vpop.f32.mrb[130].mxu1 }
 0x40f   : > { %v5013_v31 = vadd.f32 %v3802_v29, %v1182_v20  ;;  %v3804_v32 = vpop.f32.mrb[131].mxu1  ;;  %2730 = vst.msk [vmem:[%s6484_s4 + $0x208] sm:$0xff] %vm2664_vm0, %v4901_v28 }
 0x410   : > { %v2435_v33 = vpop.f32.mrb[132].mxu0  ;;  %v1232_v32 = vpop.permute.xlu1 %1231 }
 0x411   : > { %4751 = vst.msk [vmem:[%s6484_s4 + $0x588] sm:$0xff] %vm2664_vm0, %v5013_v31  ;;  %v4902_v21 = vadd.f32 %v2435_v33, %v1187_v53  ;;  %v2437_v35 = vpop.f32.mrb[133].mxu0 }
 0x412   : > { %v3807_v34 = vpop.f32.mrb[132].mxu1 }
 0x413   : > { %v5014_v38 = vadd.f32 %v3807_v34, %v1187_v53  ;;  %v3809_v39 = vpop.f32.mrb[133].mxu1  ;;  %2731 = vst.msk [vmem:[%s6484_s4 + $0x210] sm:$0xff] %vm2664_vm0, %v4902_v21 }
 0x414   : > { %v2440_v41 = vpop.f32.mrb[134].mxu0  ;;  %v1237_v39 = vpop.permute.xlu0 %1236 }
 0x415   : > { %4752 = vst.msk [vmem:[%s6484_s4 + $0x590] sm:$0xff] %vm2664_vm0, %v5014_v38  ;;  %v4903_v58 = vadd.f32 %v2440_v41, %v1192_v40  ;;  %v2442_v43 = vpop.f32.mrb[135].mxu0 }
 0x416   : > { %v3812_v42 = vpop.f32.mrb[134].mxu1 }
 0x417   : > { %v5015_v44 = vadd.f32 %v3812_v42, %v1192_v40  ;;  %v3814_v46 = vpop.f32.mrb[135].mxu1  ;;  %2732 = vst.msk [vmem:[%s6484_s4 + $0x218] sm:$0xff] %vm2664_vm0, %v4903_v58 }
 0x418   : > { %v2445_v37 = vpop.f32.mrb[136].mxu0  ;;  %v1242_v46 = vpop.permute.xlu1 %1241 }
 0x419   : > { %4753 = vst.msk [vmem:[%s6484_s4 + $0x598] sm:$0xff] %vm2664_vm0, %v5015_v44  ;;  %v4904_v49 = vadd.f32 %v2445_v37, %v1197_v48  ;;  %v2447_v50 = vpop.f32.mrb[137].mxu0 }
 0x41a   : > { %v3817_v62 = vpop.f32.mrb[136].mxu1 }
 0x41b   : > { %v5016_v51 = vadd.f32 %v3817_v62, %v1197_v48  ;;  %v3819_v54 = vpop.f32.mrb[137].mxu1  ;;  %2733 = vst.msk [vmem:[%s6484_s4 + $0x220] sm:$0xff] %vm2664_vm0, %v4904_v49 }
 0x41c   : > { %v2450_v56 = vpop.f32.mrb[138].mxu0  ;;  %v1247_v54 = vpop.permute.xlu0 %1246 }
 0x41d   : > { %4754 = vst.msk [vmem:[%s6484_s4 + $0x5a0] sm:$0xff] %vm2664_vm0, %v5016_v51  ;;  %v4905_v57 = vadd.f32 %v2450_v56, %v1202_v55  ;;  %v2452_v4 = vpop.f32.mrb[139].mxu0 }
 0x41e   : > { %v3822_v59 = vpop.f32.mrb[138].mxu1 }
 0x41f   : > { %v5017_v60 = vadd.f32 %v3822_v59, %v1202_v55  ;;  %v3824_v61 = vpop.f32.mrb[139].mxu1  ;;  %2734 = vst.msk [vmem:[%s6484_s4 + $0x228] sm:$0xff] %vm2664_vm0, %v4905_v57 }
 0x420   : > { %v2455_v63 = vpop.f32.mrb[140].mxu0  ;;  %v1252_v61 = vpop.permute.xlu1 %1251 }
 0x421   : > { %4755 = vst.msk [vmem:[%s6484_s4 + $0x5a8] sm:$0xff] %vm2664_vm0, %v5017_v60  ;;  %v4906_v0 = vadd.f32 %v2455_v63, %v1207_v47  ;;  %v2457_v2 = vpop.f32.mrb[141].mxu0 }
 0x422   : > { %v3827_v1 = vpop.f32.mrb[140].mxu1 }
 0x423   : > { %v5018_v5 = vadd.f32 %v3827_v1, %v1207_v47  ;;  %v3829_v3 = vpop.f32.mrb[141].mxu1  ;;  %2735 = vst.msk [vmem:[%s6484_s4 + $0x230] sm:$0xff] %vm2664_vm0, %v4906_v0 }
 0x424   : > { %v2460_v7 = vpop.f32.mrb[142].mxu0  ;;  %v1257_v3 = vpop.permute.xlu0 %1256 }
 0x425   : > { %4756 = vst.msk [vmem:[%s6484_s4 + $0x5b0] sm:$0xff] %vm2664_vm0, %v5018_v5  ;;  %v4907_v36 = vadd.f32 %v2460_v7, %v1212_v6  ;;  %v2462_v9 = vpop.f32.mrb[143].mxu0 }
 0x426   : > { %v3832_v8 = vpop.f32.mrb[142].mxu1 }
 0x427   : > { %v5019_v11 = vadd.f32 %v3832_v8, %v1212_v6  ;;  %v3834_v10 = vpop.f32.mrb[143].mxu1  ;;  %2736 = vst.msk [vmem:[%s6484_s4 + $0x238] sm:$0xff] %vm2664_vm0, %v4907_v36 }
 0x428   : > { %v2465_v13 = vpop.f32.mrb[144].mxu0  ;;  %v1262_v10 = vpop.permute.xlu1 %1261 }
 0x429   : > { %4757 = vst.msk [vmem:[%s6484_s4 + $0x5b8] sm:$0xff] %vm2664_vm0, %v5019_v11  ;;  %v4908_v15 = vadd.f32 %v2465_v13, %v1217_v12  ;;  %v2467_v45 = vpop.f32.mrb[145].mxu0 }
 0x42a   : > { %v3837_v16 = vpop.f32.mrb[144].mxu1 }
 0x42b   : > { %v5020_v17 = vadd.f32 %v3837_v16, %v1217_v12  ;;  %v3839_v18 = vpop.f32.mrb[145].mxu1  ;;  %2737 = vst.msk [vmem:[%s6484_s4 + $0x240] sm:$0xff] %vm2664_vm0, %v4908_v15 }
 0x42c   : > { %v2470_v19 = vpop.f32.mrb[146].mxu0  ;;  %v1267_v18 = vpop.permute.xlu0 %1266 }
 0x42d   : > { %4758 = vst.msk [vmem:[%s6484_s4 + $0x5c0] sm:$0xff] %vm2664_vm0, %v5020_v17  ;;  %v4909_v22 = vadd.f32 %v2470_v19, %v1222_v14  ;;  %v2472_v24 = vpop.f32.mrb[147].mxu0 }
 0x42e   : > { %v3842_v23 = vpop.f32.mrb[146].mxu1 }
 0x42f   : > { %v5021_v25 = vadd.f32 %v3842_v23, %v1222_v14  ;;  %v3844_v52 = vpop.f32.mrb[147].mxu1  ;;  %2738 = vst.msk [vmem:[%s6484_s4 + $0x248] sm:$0xff] %vm2664_vm0, %v4909_v22 }
 0x430   : > { %v2475_v20 = vpop.f32.mrb[148].mxu0  ;;  %v1272_v52 = vpop.permute.xlu1 %1271 }
 0x431   : > { %4759 = vst.msk [vmem:[%s6484_s4 + $0x5c8] sm:$0xff] %vm2664_vm0, %v5021_v25  ;;  %v4910_v27 = vadd.f32 %v2475_v20, %v1227_v26  ;;  %v2477_v29 = vpop.f32.mrb[149].mxu0 }
 0x432   : > { %v3847_v28 = vpop.f32.mrb[148].mxu1 }
 0x433   : > { %v5022_v30 = vadd.f32 %v3847_v28, %v1227_v26  ;;  %v3849_v31 = vpop.f32.mrb[149].mxu1  ;;  %2739 = vst.msk [vmem:[%s6484_s4 + $0x250] sm:$0xff] %vm2664_vm0, %v4910_v27 }
 0x434   : > { %v2480_v53 = vpop.f32.mrb[150].mxu0  ;;  %v1277_v31 = vpop.permute.xlu0 %1276 }
 0x435   : > { %4760 = vst.msk [vmem:[%s6484_s4 + $0x5d0] sm:$0xff] %vm2664_vm0, %v5022_v30  ;;  %v4911_v33 = vadd.f32 %v2480_v53, %v1232_v32  ;;  %v2482_v34 = vpop.f32.mrb[151].mxu0 }
 0x436   : > { %v3852_v21 = vpop.f32.mrb[150].mxu1 }
 0x437   : > { %v5023_v35 = vadd.f32 %v3852_v21, %v1232_v32  ;;  %v3854_v38 = vpop.f32.mrb[151].mxu1  ;;  %2740 = vst.msk [vmem:[%s6484_s4 + $0x258] sm:$0xff] %vm2664_vm0, %v4911_v33 }
 0x438   : > { %v2485_v40 = vpop.f32.mrb[152].mxu0  ;;  %v1282_v38 = vpop.permute.xlu1 %1281 }
 0x439   : > { %4761 = vst.msk [vmem:[%s6484_s4 + $0x5d8] sm:$0xff] %vm2664_vm0, %v5023_v35  ;;  %v4912_v41 = vadd.f32 %v2485_v40, %v1237_v39  ;;  %v2487_v42 = vpop.f32.mrb[153].mxu0 }
 0x43a   : > { %v3857_v58 = vpop.f32.mrb[152].mxu1 }
 0x43b   : > { %v5024_v43 = vadd.f32 %v3857_v58, %v1237_v39  ;;  %v3859_v44 = vpop.f32.mrb[153].mxu1  ;;  %2741 = vst.msk [vmem:[%s6484_s4 + $0x260] sm:$0xff] %vm2664_vm0, %v4912_v41 }
 0x43c   : > { %v2490_v48 = vpop.f32.mrb[154].mxu0  ;;  %v1287_v44 = vpop.permute.xlu0 %1286 }
 0x43d   : > { %4762 = vst.msk [vmem:[%s6484_s4 + $0x5e0] sm:$0xff] %vm2664_vm0, %v5024_v43  ;;  %v4913_v37 = vadd.f32 %v2490_v48, %v1242_v46  ;;  %v2492_v62 = vpop.f32.mrb[155].mxu0 }
 0x43e   : > { %v3862_v49 = vpop.f32.mrb[154].mxu1 }
 0x43f   : > { %v5025_v50 = vadd.f32 %v3862_v49, %v1242_v46  ;;  %v3864_v51 = vpop.f32.mrb[155].mxu1  ;;  %2742 = vst.msk [vmem:[%s6484_s4 + $0x268] sm:$0xff] %vm2664_vm0, %v4913_v37 }
 0x440   : > { %v2495_v55 = vpop.f32.mrb[156].mxu0  ;;  %v1292_v51 = vpop.permute.xlu1 %1291 }
 0x441   : > { %4763 = vst.msk [vmem:[%s6484_s4 + $0x5e8] sm:$0xff] %vm2664_vm0, %v5025_v50  ;;  %v4914_v56 = vadd.f32 %v2495_v55, %v1247_v54  ;;  %v2497_v59 = vpop.f32.mrb[157].mxu0 }
 0x442   : > { %v3867_v57 = vpop.f32.mrb[156].mxu1 }
 0x443   : > { %v5026_v4 = vadd.f32 %v3867_v57, %v1247_v54  ;;  %v3869_v60 = vpop.f32.mrb[157].mxu1  ;;  %2743 = vst.msk [vmem:[%s6484_s4 + $0x270] sm:$0xff] %vm2664_vm0, %v4914_v56 }
 0x444   : > { %v2500_v47 = vpop.f32.mrb[158].mxu0  ;;  %v1297_v60 = vpop.permute.xlu0 %1296 }
 0x445   : > { %4764 = vst.msk [vmem:[%s6484_s4 + $0x5f0] sm:$0xff] %vm2664_vm0, %v5026_v4  ;;  %v4915_v63 = vadd.f32 %v2500_v47, %v1252_v61  ;;  %v2502_v1 = vpop.f32.mrb[159].mxu0 }
 0x446   : > { %v3872_v0 = vpop.f32.mrb[158].mxu1 }
 0x447   : > { %v5027_v2 = vadd.f32 %v3872_v0, %v1252_v61  ;;  %v3874_v5 = vpop.f32.mrb[159].mxu1  ;;  %2744 = vst.msk [vmem:[%s6484_s4 + $0x278] sm:$0xff] %vm2664_vm0, %v4915_v63 }
 0x448   : > { %v2505_v6 = vpop.f32.mrb[160].mxu0  ;;  %v1302_v5 = vpop.permute.xlu1 %1301 }
 0x449   : > { %4765 = vst.msk [vmem:[%s6484_s4 + $0x5f8] sm:$0xff] %vm2664_vm0, %v5027_v2  ;;  %v4916_v7 = vadd.f32 %v2505_v6, %v1257_v3  ;;  %v2507_v8 = vpop.f32.mrb[161].mxu0 }
 0x44a   : > { %v3877_v36 = vpop.f32.mrb[160].mxu1 }
 0x44b   : > { %v5028_v9 = vadd.f32 %v3877_v36, %v1257_v3  ;;  %v3879_v11 = vpop.f32.mrb[161].mxu1  ;;  %2745 = vst.msk [vmem:[%s6484_s4 + $0x280] sm:$0xff] %vm2664_vm0, %v4916_v7 }
 0x44c   : > { %v2510_v12 = vpop.f32.mrb[162].mxu0  ;;  %v1307_v11 = vpop.permute.xlu0 %1306 }
 0x44d   : > { %4766 = vst.msk [vmem:[%s6484_s4 + $0x600] sm:$0xff] %vm2664_vm0, %v5028_v9  ;;  %v4917_v13 = vadd.f32 %v2510_v12, %v1262_v10  ;;  %v2512_v16 = vpop.f32.mrb[163].mxu0 }
 0x44e   : > { %v3882_v15 = vpop.f32.mrb[162].mxu1 }
 0x44f   : > { %v5029_v45 = vadd.f32 %v3882_v15, %v1262_v10  ;;  %v3884_v17 = vpop.f32.mrb[163].mxu1  ;;  %2746 = vst.msk [vmem:[%s6484_s4 + $0x288] sm:$0xff] %vm2664_vm0, %v4917_v13 }
 0x450   : > { %v2515_v14 = vpop.f32.mrb[164].mxu0  ;;  %v1312_v17 = vpop.permute.xlu1 %1311 }
 0x451   : > { %4767 = vst.msk [vmem:[%s6484_s4 + $0x608] sm:$0xff] %vm2664_vm0, %v5029_v45  ;;  %v4918_v19 = vadd.f32 %v2515_v14, %v1267_v18  ;;  %v2517_v23 = vpop.f32.mrb[165].mxu0 }
 0x452   : > { %v3887_v22 = vpop.f32.mrb[164].mxu1 }
 0x453   : > { %v5030_v24 = vadd.f32 %v3887_v22, %v1267_v18  ;;  %v3889_v25 = vpop.f32.mrb[165].mxu1  ;;  %2747 = vst.msk [vmem:[%s6484_s4 + $0x290] sm:$0xff] %vm2664_vm0, %v4918_v19 }
 0x454   : > { %v2520_v26 = vpop.f32.mrb[166].mxu0  ;;  %v1317_v25 = vpop.permute.xlu0 %1316 }
 0x455   : > { %4768 = vst.msk [vmem:[%s6484_s4 + $0x610] sm:$0xff] %vm2664_vm0, %v5030_v24  ;;  %v4919_v20 = vadd.f32 %v2520_v26, %v1272_v52  ;;  %v2522_v28 = vpop.f32.mrb[167].mxu0 }
 0x456   : > { %v3892_v27 = vpop.f32.mrb[166].mxu1 }
 0x457   : > { %v5031_v29 = vadd.f32 %v3892_v27, %v1272_v52  ;;  %v3894_v30 = vpop.f32.mrb[167].mxu1  ;;  %2748 = vst.msk [vmem:[%s6484_s4 + $0x298] sm:$0xff] %vm2664_vm0, %v4919_v20 }
 0x458   : > { %v2525_v32 = vpop.f32.mrb[168].mxu0  ;;  %v1322_v30 = vpop.permute.xlu1 %1321 }
 0x459   : > { %4769 = vst.msk [vmem:[%s6484_s4 + $0x618] sm:$0xff] %vm2664_vm0, %v5031_v29  ;;  %v4920_v53 = vadd.f32 %v2525_v32, %v1277_v31  ;;  %v2527_v21 = vpop.f32.mrb[169].mxu0 }
 0x45a   : > { %v3897_v33 = vpop.f32.mrb[168].mxu1 }
 0x45b   : > { %v5032_v34 = vadd.f32 %v3897_v33, %v1277_v31  ;;  %v3899_v35 = vpop.f32.mrb[169].mxu1  ;;  %2749 = vst.msk [vmem:[%s6484_s4 + $0x2a0] sm:$0xff] %vm2664_vm0, %v4920_v53 }
 0x45c   : > { %v2530_v39 = vpop.f32.mrb[170].mxu0  ;;  %v1327_v35 = vpop.permute.xlu0 %1326 }
 0x45d   : > { %4770 = vst.msk [vmem:[%s6484_s4 + $0x620] sm:$0xff] %vm2664_vm0, %v5032_v34  ;;  %v4921_v40 = vadd.f32 %v2530_v39, %v1282_v38  ;;  %v2532_v58 = vpop.f32.mrb[171].mxu0 }
 0x45e   : > { %v3902_v41 = vpop.f32.mrb[170].mxu1 }
 0x45f   : > { %v5033_v42 = vadd.f32 %v3902_v41, %v1282_v38  ;;  %v3904_v43 = vpop.f32.mrb[171].mxu1  ;;  %2750 = vst.msk [vmem:[%s6484_s4 + $0x2a8] sm:$0xff] %vm2664_vm0, %v4921_v40 }
 0x460   : > { %v2535_v46 = vpop.f32.mrb[172].mxu0  ;;  %v1332_v43 = vpop.permute.xlu1 %1331 }
 0x461   : > { %4771 = vst.msk [vmem:[%s6484_s4 + $0x628] sm:$0xff] %vm2664_vm0, %v5033_v42  ;;  %v4922_v48 = vadd.f32 %v2535_v46, %v1287_v44  ;;  %v2537_v49 = vpop.f32.mrb[173].mxu0 }
 0x462   : > { %v3907_v37 = vpop.f32.mrb[172].mxu1 }
 0x463   : > { %v5034_v62 = vadd.f32 %v3907_v37, %v1287_v44  ;;  %v3909_v50 = vpop.f32.mrb[173].mxu1  ;;  %2751 = vst.msk [vmem:[%s6484_s4 + $0x2b0] sm:$0xff] %vm2664_vm0, %v4922_v48 }
 0x464   : > { %v2540_v54 = vpop.f32.mrb[174].mxu0  ;;  %v1337_v50 = vpop.permute.xlu0 %1336 }
 0x465   : > { %4772 = vst.msk [vmem:[%s6484_s4 + $0x630] sm:$0xff] %vm2664_vm0, %v5034_v62  ;;  %v4923_v55 = vadd.f32 %v2540_v54, %v1292_v51  ;;  %v2542_v57 = vpop.f32.mrb[175].mxu0 }
 0x466   : > { %v3912_v56 = vpop.f32.mrb[174].mxu1 }
 0x467   : > { %v5035_v59 = vadd.f32 %v3912_v56, %v1292_v51  ;;  %v3914_v4 = vpop.f32.mrb[175].mxu1  ;;  %2752 = vst.msk [vmem:[%s6484_s4 + $0x2b8] sm:$0xff] %vm2664_vm0, %v4923_v55 }
 0x468   : > { %v2545_v61 = vpop.f32.mrb[176].mxu0  ;;  %v1342_v4 = vpop.permute.xlu1 %1341 }
 0x469   : > { %4773 = vst.msk [vmem:[%s6484_s4 + $0x638] sm:$0xff] %vm2664_vm0, %v5035_v59  ;;  %v4924_v47 = vadd.f32 %v2545_v61, %v1297_v60  ;;  %v2547_v0 = vpop.f32.mrb[177].mxu0 }
 0x46a   : > { %v3917_v63 = vpop.f32.mrb[176].mxu1 }
 0x46b   : > { %v5036_v1 = vadd.f32 %v3917_v63, %v1297_v60  ;;  %v3919_v2 = vpop.f32.mrb[177].mxu1  ;;  %2753 = vst.msk [vmem:[%s6484_s4 + $0x2c0] sm:$0xff] %vm2664_vm0, %v4924_v47 }
 0x46c   : > { %v2550_v3 = vpop.f32.mrb[178].mxu0  ;;  %v1347_v2 = vpop.permute.xlu0 %1346 }
 0x46d   : > { %4774 = vst.msk [vmem:[%s6484_s4 + $0x640] sm:$0xff] %vm2664_vm0, %v5036_v1  ;;  %v4925_v6 = vadd.f32 %v2550_v3, %v1302_v5  ;;  %v2552_v36 = vpop.f32.mrb[179].mxu0 }
 0x46e   : > { %v3922_v7 = vpop.f32.mrb[178].mxu1 }
 0x46f   : > { %v5037_v8 = vadd.f32 %v3922_v7, %v1302_v5  ;;  %v3924_v9 = vpop.f32.mrb[179].mxu1  ;;  %2754 = vst.msk [vmem:[%s6484_s4 + $0x2c8] sm:$0xff] %vm2664_vm0, %v4925_v6 }
 0x470   : > { %v2555_v10 = vpop.f32.mrb[180].mxu0  ;;  %v1352_v9 = vpop.permute.xlu1 %1351 }
 0x471   : > { %4775 = vst.msk [vmem:[%s6484_s4 + $0x648] sm:$0xff] %vm2664_vm0, %v5037_v8  ;;  %v4926_v12 = vadd.f32 %v2555_v10, %v1307_v11  ;;  %v2557_v15 = vpop.f32.mrb[181].mxu0 }
 0x472   : > { %v3927_v13 = vpop.f32.mrb[180].mxu1 }
 0x473   : > { %v5038_v16 = vadd.f32 %v3927_v13, %v1307_v11  ;;  %v3929_v45 = vpop.f32.mrb[181].mxu1  ;;  %2755 = vst.msk [vmem:[%s6484_s4 + $0x2d0] sm:$0xff] %vm2664_vm0, %v4926_v12 }
 0x474   : > { %v2560_v18 = vpop.f32.mrb[182].mxu0  ;;  %v1357_v45 = vpop.permute.xlu0 %1356 }
 0x475   : > { %4776 = vst.msk [vmem:[%s6484_s4 + $0x650] sm:$0xff] %vm2664_vm0, %v5038_v16  ;;  %v4927_v14 = vadd.f32 %v2560_v18, %v1312_v17  ;;  %v2562_v22 = vpop.f32.mrb[183].mxu0 }
 0x476   : > { %v3932_v19 = vpop.f32.mrb[182].mxu1 }
 0x477   : > { %v5039_v23 = vadd.f32 %v3932_v19, %v1312_v17  ;;  %v3934_v24 = vpop.f32.mrb[183].mxu1  ;;  %2756 = vst.msk [vmem:[%s6484_s4 + $0x2d8] sm:$0xff] %vm2664_vm0, %v4927_v14 }
 0x478   : > { %v2565_v52 = vpop.f32.mrb[184].mxu0  ;;  %v1362_v24 = vpop.permute.xlu1 %1361 }
 0x479   : > { %4777 = vst.msk [vmem:[%s6484_s4 + $0x658] sm:$0xff] %vm2664_vm0, %v5039_v23  ;;  %v4928_v26 = vadd.f32 %v2565_v52, %v1317_v25  ;;  %v2567_v27 = vpop.f32.mrb[185].mxu0 }
 0x47a   : > { %v3937_v20 = vpop.f32.mrb[184].mxu1 }
 0x47b   : > { %v5040_v28 = vadd.f32 %v3937_v20, %v1317_v25  ;;  %v3939_v29 = vpop.f32.mrb[185].mxu1  ;;  %2757 = vst.msk [vmem:[%s6484_s4 + $0x2e0] sm:$0xff] %vm2664_vm0, %v4928_v26 }
 0x47c   : > { %v2570_v31 = vpop.f32.mrb[186].mxu0  ;;  %v1367_v29 = vpop.permute.xlu0 %1366 }
 0x47d   : > { %4778 = vst.msk [vmem:[%s6484_s4 + $0x660] sm:$0xff] %vm2664_vm0, %v5040_v28  ;;  %v4929_v32 = vadd.f32 %v2570_v31, %v1322_v30  ;;  %v2572_v33 = vpop.f32.mrb[187].mxu0 }
 0x47e   : > { %v3942_v53 = vpop.f32.mrb[186].mxu1 }
 0x47f   : > { %v5041_v21 = vadd.f32 %v3942_v53, %v1322_v30  ;;  %v3944_v34 = vpop.f32.mrb[187].mxu1  ;;  %2758 = vst.msk [vmem:[%s6484_s4 + $0x2e8] sm:$0xff] %vm2664_vm0, %v4929_v32 }
 0x480   : > { %v2575_v38 = vpop.f32.mrb[188].mxu0  ;;  %v1372_v34 = vpop.permute.xlu1 %1371 }
 0x481   : > { %4779 = vst.msk [vmem:[%s6484_s4 + $0x668] sm:$0xff] %vm2664_vm0, %v5041_v21  ;;  %v4930_v39 = vadd.f32 %v2575_v38, %v1327_v35  ;;  %v2577_v41 = vpop.f32.mrb[189].mxu0 }
 0x482   : > { %v3947_v40 = vpop.f32.mrb[188].mxu1 }
 0x483   : > { %v5042_v58 = vadd.f32 %v3947_v40, %v1327_v35  ;;  %v3949_v42 = vpop.f32.mrb[189].mxu1  ;;  %2759 = vst.msk [vmem:[%s6484_s4 + $0x2f0] sm:$0xff] %vm2664_vm0, %v4930_v39 }
 0x484   : > { %v2580_v44 = vpop.f32.mrb[190].mxu0  ;;  %v1377_v42 = vpop.permute.xlu0 %1376 }
 0x485   : > { %4780 = vst.msk [vmem:[%s6484_s4 + $0x670] sm:$0xff] %vm2664_vm0, %v5042_v58  ;;  %v4931_v46 = vadd.f32 %v2580_v44, %v1332_v43  ;;  %v2582_v37 = vpop.f32.mrb[191].mxu0 }
 0x486   : > { %v3952_v48 = vpop.f32.mrb[190].mxu1 }
 0x487   : > { %v5043_v49 = vadd.f32 %v3952_v48, %v1332_v43  ;;  %v3954_v62 = vpop.f32.mrb[191].mxu1  ;;  %2760 = vst.msk [vmem:[%s6484_s4 + $0x2f8] sm:$0xff] %vm2664_vm0, %v4931_v46 }
 0x488   : > { %v2585_v51 = vpop.f32.mrb[192].mxu0  ;;  %v1382_v62 = vpop.permute.xlu1 %1381 }
 0x489   : > { %4781 = vst.msk [vmem:[%s6484_s4 + $0x678] sm:$0xff] %vm2664_vm0, %v5043_v49  ;;  %v4932_v54 = vadd.f32 %v2585_v51, %v1337_v50  ;;  %v2587_v56 = vpop.f32.mrb[193].mxu0 }
 0x48a   : > { %v3957_v55 = vpop.f32.mrb[192].mxu1 }
 0x48b   : > { %v5044_v57 = vadd.f32 %v3957_v55, %v1337_v50  ;;  %v3959_v59 = vpop.f32.mrb[193].mxu1  ;;  %2761 = vst.msk [vmem:[%s6484_s4 + $0x300] sm:$0xff] %vm2664_vm0, %v4932_v54 }
 0x48c   : > { %v2590_v60 = vpop.f32.mrb[194].mxu0  ;;  %v1387_v59 = vpop.permute.xlu0 %1386 }
 0x48d   : > { %4782 = vst.msk [vmem:[%s6484_s4 + $0x680] sm:$0xff] %vm2664_vm0, %v5044_v57  ;;  %v4933_v61 = vadd.f32 %v2590_v60, %v1342_v4  ;;  %v2592_v63 = vpop.f32.mrb[195].mxu0 }
 0x48e   : > { %v3962_v47 = vpop.f32.mrb[194].mxu1 }
 0x48f   : > { %v5045_v0 = vadd.f32 %v3962_v47, %v1342_v4  ;;  %v3964_v1 = vpop.f32.mrb[195].mxu1  ;;  %2762 = vst.msk [vmem:[%s6484_s4 + $0x308] sm:$0xff] %vm2664_vm0, %v4933_v61 }
 0x490   : > { %v2595_v5 = vpop.f32.mrb[196].mxu0  ;;  %v1392_v1 = vpop.permute.xlu1 %1391 }
 0x491   : > { %4783 = vst.msk [vmem:[%s6484_s4 + $0x688] sm:$0xff] %vm2664_vm0, %v5045_v0  ;;  %v4934_v3 = vadd.f32 %v2595_v5, %v1347_v2  ;;  %v2597_v7 = vpop.f32.mrb[197].mxu0 }
 0x492   : > { %v3967_v6 = vpop.f32.mrb[196].mxu1 }
 0x493   : > { %v5046_v36 = vadd.f32 %v3967_v6, %v1347_v2  ;;  %v3969_v8 = vpop.f32.mrb[197].mxu1  ;;  %2763 = vst.msk [vmem:[%s6484_s4 + $0x310] sm:$0xff] %vm2664_vm0, %v4934_v3 }
 0x494   : > { %v2600_v11 = vpop.f32.mrb[198].mxu0  ;;  %v1397_v8 = vpop.permute.xlu0 %1396 }
 0x495   : > { %4784 = vst.msk [vmem:[%s6484_s4 + $0x690] sm:$0xff] %vm2664_vm0, %v5046_v36  ;;  %v4935_v10 = vadd.f32 %v2600_v11, %v1352_v9  ;;  %v2602_v13 = vpop.f32.mrb[199].mxu0 }
 0x496   : > { %v3972_v12 = vpop.f32.mrb[198].mxu1 }
 0x497   : > { %v5047_v15 = vadd.f32 %v3972_v12, %v1352_v9  ;;  %v3974_v16 = vpop.f32.mrb[199].mxu1  ;;  %2764 = vst.msk [vmem:[%s6484_s4 + $0x318] sm:$0xff] %vm2664_vm0, %v4935_v10 }
 0x498   : > { %v2605_v17 = vpop.f32.mrb[200].mxu0  ;;  %v1402_v16 = vpop.permute.xlu1 %1401 }
 0x499   : > { %4785 = vst.msk [vmem:[%s6484_s4 + $0x698] sm:$0xff] %vm2664_vm0, %v5047_v15  ;;  %v4936_v18 = vadd.f32 %v2605_v17, %v1357_v45  ;;  %v2607_v19 = vpop.f32.mrb[201].mxu0 }
 0x49a   : > { %v3977_v14 = vpop.f32.mrb[200].mxu1 }
 0x49b   : > { %v5048_v22 = vadd.f32 %v3977_v14, %v1357_v45  ;;  %v3979_v23 = vpop.f32.mrb[201].mxu1  ;;  %2765 = vst.msk [vmem:[%s6484_s4 + $0x320] sm:$0xff] %vm2664_vm0, %v4936_v18 }
 0x49c   : > { %v2610_v25 = vpop.f32.mrb[202].mxu0  ;;  %v1407_v23 = vpop.permute.xlu0 %1406 }
 0x49d   : > { %4786 = vst.msk [vmem:[%s6484_s4 + $0x6a0] sm:$0xff] %vm2664_vm0, %v5048_v22  ;;  %v4937_v52 = vadd.f32 %v2610_v25, %v1362_v24  ;;  %v2612_v20 = vpop.f32.mrb[203].mxu0 }
 0x49e   : > { %v3982_v26 = vpop.f32.mrb[202].mxu1 }
 0x49f   : > { %v5049_v27 = vadd.f32 %v3982_v26, %v1362_v24  ;;  %v3984_v28 = vpop.f32.mrb[203].mxu1  ;;  %2766 = vst.msk [vmem:[%s6484_s4 + $0x328] sm:$0xff] %vm2664_vm0, %v4937_v52 }
 0x4a0   : > { %v2615_v30 = vpop.f32.mrb[204].mxu0  ;;  %v1412_v28 = vpop.permute.xlu1 %1411 }
 0x4a1   : > { %4787 = vst.msk [vmem:[%s6484_s4 + $0x6a8] sm:$0xff] %vm2664_vm0, %v5049_v27  ;;  %v4938_v31 = vadd.f32 %v2615_v30, %v1367_v29  ;;  %v2617_v53 = vpop.f32.mrb[205].mxu0 }
 0x4a2   : > { %v3987_v32 = vpop.f32.mrb[204].mxu1 }
 0x4a3   : > { %v5050_v33 = vadd.f32 %v3987_v32, %v1367_v29  ;;  %v3989_v21 = vpop.f32.mrb[205].mxu1  ;;  %2767 = vst.msk [vmem:[%s6484_s4 + $0x330] sm:$0xff] %vm2664_vm0, %v4938_v31 }
 0x4a4   : > { %v2620_v35 = vpop.f32.mrb[206].mxu0 }
 0x4a5   : > { %4788 = vst.msk [vmem:[%s6484_s4 + $0x6b0] sm:$0xff] %vm2664_vm0, %v5050_v33  ;;  %v4939_v38 = vadd.f32 %v2620_v35, %v1372_v34  ;;  %v2622_v40 = vpop.f32.mrb[207].mxu0 }
 0x4a6   : > { %v3992_v39 = vpop.f32.mrb[206].mxu1 }
 0x4a7   : > { %v5051_v41 = vadd.f32 %v3992_v39, %v1372_v34  ;;  %v3994_v58 = vpop.f32.mrb[207].mxu1  ;;  %2768 = vst.msk [vmem:[%s6484_s4 + $0x338] sm:$0xff] %vm2664_vm0, %v4939_v38 }
 0x4a8   : > { %v2625_v43 = vpop.f32.mrb[208].mxu0 }
 0x4a9   : > { %4789 = vst.msk [vmem:[%s6484_s4 + $0x6b8] sm:$0xff] %vm2664_vm0, %v5051_v41  ;;  %v4940_v44 = vadd.f32 %v2625_v43, %v1377_v42  ;;  %v2627_v48 = vpop.f32.mrb[209].mxu0 }
 0x4aa   : > { %v3997_v46 = vpop.f32.mrb[208].mxu1 }
 0x4ab   : > { %v5052_v37 = vadd.f32 %v3997_v46, %v1377_v42  ;;  %v3999_v49 = vpop.f32.mrb[209].mxu1  ;;  %2769 = vst.msk [vmem:[%s6484_s4 + $0x340] sm:$0xff] %vm2664_vm0, %v4940_v44 }
 0x4ac   : > { %v2630_v50 = vpop.f32.mrb[210].mxu0 }
 0x4ad   : > { %4790 = vst.msk [vmem:[%s6484_s4 + $0x6c0] sm:$0xff] %vm2664_vm0, %v5052_v37  ;;  %v4941_v51 = vadd.f32 %v2630_v50, %v1382_v62  ;;  %v2632_v55 = vpop.f32.mrb[211].mxu0 }
 0x4ae   : > { %v4002_v54 = vpop.f32.mrb[210].mxu1 }
 0x4af   : > { %v5053_v56 = vadd.f32 %v4002_v54, %v1382_v62  ;;  %v4004_v57 = vpop.f32.mrb[211].mxu1  ;;  %2770 = vst.msk [vmem:[%s6484_s4 + $0x348] sm:$0xff] %vm2664_vm0, %v4941_v51 }
 0x4b0   : > { %v2635_v4 = vpop.f32.mrb[212].mxu0 }
 0x4b1   : > { %4791 = vst.msk [vmem:[%s6484_s4 + $0x6c8] sm:$0xff] %vm2664_vm0, %v5053_v56  ;;  %v4942_v60 = vadd.f32 %v2635_v4, %v1387_v59  ;;  %v2637_v47 = vpop.f32.mrb[213].mxu0 }
 0x4b2   : > { %v4007_v61 = vpop.f32.mrb[212].mxu1 }
 0x4b3   : > { %v5054_v63 = vadd.f32 %v4007_v61, %v1387_v59  ;;  %v4009_v0 = vpop.f32.mrb[213].mxu1  ;;  %2771 = vst.msk [vmem:[%s6484_s4 + $0x350] sm:$0xff] %vm2664_vm0, %v4942_v60 }
 0x4b4   : > { %v2640_v2 = vpop.f32.mrb[214].mxu0 }
 0x4b5   : > { %4792 = vst.msk [vmem:[%s6484_s4 + $0x6d0] sm:$0xff] %vm2664_vm0, %v5054_v63  ;;  %v4943_v5 = vadd.f32 %v2640_v2, %v1392_v1  ;;  %v2642_v6 = vpop.f32.mrb[215].mxu0 }
 0x4b6   : > { %v4012_v3 = vpop.f32.mrb[214].mxu1 }
 0x4b7   : > { %v5055_v7 = vadd.f32 %v4012_v3, %v1392_v1  ;;  %v4014_v36 = vpop.f32.mrb[215].mxu1  ;;  %2772 = vst.msk [vmem:[%s6484_s4 + $0x358] sm:$0xff] %vm2664_vm0, %v4943_v5 }
 0x4b8   : > { %v2645_v9 = vpop.f32.mrb[216].mxu0 }
 0x4b9   : > { %4793 = vst.msk [vmem:[%s6484_s4 + $0x6d8] sm:$0xff] %vm2664_vm0, %v5055_v7  ;;  %v4944_v11 = vadd.f32 %v2645_v9, %v1397_v8  ;;  %v2647_v12 = vpop.f32.mrb[217].mxu0 }
 0x4ba   : > { %v4017_v10 = vpop.f32.mrb[216].mxu1 }
 0x4bb   : > { %v5056_v13 = vadd.f32 %v4017_v10, %v1397_v8  ;;  %v4019_v15 = vpop.f32.mrb[217].mxu1  ;;  %2773 = vst.msk [vmem:[%s6484_s4 + $0x360] sm:$0xff] %vm2664_vm0, %v4944_v11 }
 0x4bc   : > { %v2650_v45 = vpop.f32.mrb[218].mxu0 }
 0x4bd   : > { %4794 = vst.msk [vmem:[%s6484_s4 + $0x6e0] sm:$0xff] %vm2664_vm0, %v5056_v13  ;;  %v4945_v17 = vadd.f32 %v2650_v45, %v1402_v16  ;;  %v2652_v14 = vpop.f32.mrb[219].mxu0 }
 0x4be   : > { %v4022_v18 = vpop.f32.mrb[218].mxu1 }
 0x4bf   : > { %v5057_v19 = vadd.f32 %v4022_v18, %v1402_v16  ;;  %v4024_v22 = vpop.f32.mrb[219].mxu1  ;;  %2774 = vst.msk [vmem:[%s6484_s4 + $0x368] sm:$0xff] %vm2664_vm0, %v4945_v17 }
 0x4c0   : > { %v2655_v24 = vpop.f32.mrb[220].mxu0 }
 0x4c1   : > { %4795 = vst.msk [vmem:[%s6484_s4 + $0x6e8] sm:$0xff] %vm2664_vm0, %v5057_v19  ;;  %v4946_v25 = vadd.f32 %v2655_v24, %v1407_v23  ;;  %v2657_v26 = vpop.f32.mrb[221].mxu0 }
 0x4c2   : > { %v4027_v52 = vpop.f32.mrb[220].mxu1 }
 0x4c3   : > { %v5058_v20 = vadd.f32 %v4027_v52, %v1407_v23  ;;  %v4029_v27 = vpop.f32.mrb[221].mxu1  ;;  %2775 = vst.msk [vmem:[%s6484_s4 + $0x370] sm:$0xff] %vm2664_vm0, %v4946_v25  ;;  %4155 = sbr.rel (!%p7310_p7) target bundleno = 1298 (0x512), region = 44 }
 0x4c4   : > { %v2660_v29 = vpop.f32.mrb[222].mxu0 }
 0x4c5   : > { %4796 = vst.msk [vmem:[%s6484_s4 + $0x6f0] sm:$0xff] %vm2664_vm0, %v5058_v20  ;;  %v4947_v30 = vadd.f32 %v2660_v29, %v1412_v28  ;;  %v2662_v32 = vpop.f32.mrb[223].mxu0 }
 0x4c6   : > { %v4032_v31 = vpop.f32.mrb[222].mxu1 }
 0x4c7   : > { %v5059_v53 = vadd.f32 %v4032_v31, %v1412_v28  ;;  %v4034_v33 = vpop.f32.mrb[223].mxu1  ;;  %2776 = vst.msk [vmem:[%s6484_s4 + $0x378] sm:$0xff] %vm2664_vm0, %v4947_v30 }
 0x4c9   : > { %4797 = vst.msk [vmem:[%s6484_s4 + $0x6f8] sm:$0xff] %vm2664_vm0, %v5059_v53 }
 0x4ca   : > { %s7326_s5 = smov (!%p4159_p9, %s4158_s5), 112 }
 0x4cb   : > { %s4798_s10 = sshll.u32 %s7326_s5, 8 }
 0x4cc   : > { %p4801_p11 = scmp.eq.s32.totalorder %s4798_s10, 0 }
 0x4cd   : > { %s7087_s11 = sshrl.u32 (!%p4801_p11), %s7326_s5, 5 }
 0x4ce   : > { %4169 = sbr.rel (%p4801_p11) target bundleno = 1298 (0x512), region = 48  ;;  %p4802_p13 = scmp.le.s32.totalorder (!%p4801_p11), %s7087_s11, 0 }
 0x4d5   : > { %4601 = sbr.rel (%p4802_p13) target bundleno = 1277 (0x4fd), region = 137  ;;  %s7311_s15 = smov (!%p4802_p13), %s7081_s21 }
 0x4d6   : > { %s7312_s26 = smov (!%p4802_p13), %s6484_s4  ;;  %s7096_s18 = smov (!%p4802_p13), 0  }
 0x4d7   : > { %s7098_s20 = smov (!%p4802_p13), 0  }
 0x4dc LB: >> { %v4359_v21 = vld [vmem:[%s5792_s26] sm:$0xff]  ;;  %v4361_v34 = vld [vmem:[%s5792_s26 + $0x8] sm:$0xff]  ;;  %v4363_v35 = vld [vmem:[%s5792_s26 + $0x10] sm:$0xff]  ;;  %s4487_s22 = sadd.s32 1, %s5796_s18  ;;  %s4353_s20 = sadd.s32 1, %s5800_s20   ;;  %s5800_s20 = sphi %s7098_s20, %s4353_s20   ;;  %s5796_s18 = sphi %s7096_s18, %s7315_s18   ;;  %s5792_s26 = sphi %s7312_s26, %s7314_s26   ;;  %s5788_s15 = sphi %s7311_s15, %s7313_s15  }
 0x4dd   : >> { %4360 = vst [vmem:[%s5788_s15] sm:$0xff] %v4359_v21  ;;  %4362 = vst [vmem:[%s5788_s15 + $0x8] sm:$0xff] %v4361_v34  ;;  %v4365_v38 = vld [vmem:[%s5792_s26 + $0x18] sm:$0xff]  ;;  %v4367_v39 = vld [vmem:[%s5792_s26 + $0x20] sm:$0xff]  ;;  %p4488_p1 = scmp.ge.s32.totalorder %s4487_s22, %s7087_s11  ;;  %p4352_p4 = scmp.ge.s32.totalorder %s4353_s20, %s7087_s11 }
 0x4de   : >> { %4364 = vst [vmem:[%s5788_s15 + $0x10] sm:$0xff] %v4363_v35  ;;  %v4369_v40 = vld [vmem:[%s5792_s26 + $0x28] sm:$0xff]  ;;  %4366 = vst [vmem:[%s5788_s15 + $0x18] sm:$0xff] %v4365_v38  ;;  %v4371_v41 = vld [vmem:[%s5792_s26 + $0x30] sm:$0xff] }
 0x4df   : >> { %4368 = vst [vmem:[%s5788_s15 + $0x20] sm:$0xff] %v4367_v39  ;;  %4370 = vst [vmem:[%s5788_s15 + $0x28] sm:$0xff] %v4369_v40  ;;  %v4373_v58 = vld [vmem:[%s5792_s26 + $0x38] sm:$0xff]  ;;  %v4375_v42 = vld [vmem:[%s5792_s26 + $0x40] sm:$0xff]  ;;  %s7328_s22 = smov (%p4488_p1, %s4487_s22), 0 }
 0x4e0   : >> { %4372 = vst [vmem:[%s5788_s15 + $0x30] sm:$0xff] %v4371_v41  ;;  %4374 = vst [vmem:[%s5788_s15 + $0x38] sm:$0xff] %v4373_v58  ;;  %v4377_v43 = vld [vmem:[%s5792_s26 + $0x48] sm:$0xff]  ;;  %v4379_v44 = vld [vmem:[%s5792_s26 + $0x50] sm:$0xff]  ;;  %s4803_s7 = sshll.u32 %s7328_s22, 8  ;;  %s7315_s18 = smov %s7328_s22 }
 0x4e1   : >> { %4376 = vst [vmem:[%s5788_s15 + $0x40] sm:$0xff] %v4375_v42  ;;  %v4381_v46 = vld [vmem:[%s5792_s26 + $0x58] sm:$0xff]  ;;  %4378 = vst [vmem:[%s5788_s15 + $0x48] sm:$0xff] %v4377_v43  ;;  %v4383_v48 = vld [vmem:[%s5792_s26 + $0x60] sm:$0xff]  ;;  %s7154_s23 = scalar_lea.vmem %s6484_s4, %s4803_s7 [#allocation6]   ;;  %s7157_s24 = scalar_lea.vmem %s7081_s21, %s4803_s7  }
 0x4e2   : >> { %4380 = vst [vmem:[%s5788_s15 + $0x50] sm:$0xff] %v4379_v44  ;;  %4382 = vst [vmem:[%s5788_s15 + $0x58] sm:$0xff] %v4381_v46  ;;  %v4385_v37 = vld [vmem:[%s5792_s26 + $0x68] sm:$0xff]  ;;  %v4387_v49 = vld [vmem:[%s5792_s26 + $0x70] sm:$0xff] }
 0x4e3   : >> { %4384 = vst [vmem:[%s5788_s15 + $0x60] sm:$0xff] %v4383_v48  ;;  %4386 = vst [vmem:[%s5788_s15 + $0x68] sm:$0xff] %v4385_v37  ;;  %v4389_v62 = vld [vmem:[%s5792_s26 + $0x78] sm:$0xff]  ;;  %v4391_v50 = vld [vmem:[%s5792_s26 + $0x80] sm:$0xff] }
 0x4e4   : >> { %4388 = vst [vmem:[%s5788_s15 + $0x70] sm:$0xff] %v4387_v49  ;;  %v4393_v51 = vld [vmem:[%s5792_s26 + $0x88] sm:$0xff]  ;;  %4390 = vst [vmem:[%s5788_s15 + $0x78] sm:$0xff] %v4389_v62  ;;  %v4395_v54 = vld [vmem:[%s5792_s26 + $0x90] sm:$0xff] }
 0x4e5   : >> { %4392 = vst [vmem:[%s5788_s15 + $0x80] sm:$0xff] %v4391_v50  ;;  %4394 = vst [vmem:[%s5788_s15 + $0x88] sm:$0xff] %v4393_v51  ;;  %v4397_v55 = vld [vmem:[%s5792_s26 + $0x98] sm:$0xff]  ;;  %v4399_v56 = vld [vmem:[%s5792_s26 + $0xa0] sm:$0xff] }
 0x4e6   : >> { %4396 = vst [vmem:[%s5788_s15 + $0x90] sm:$0xff] %v4395_v54  ;;  %4398 = vst [vmem:[%s5788_s15 + $0x98] sm:$0xff] %v4397_v55  ;;  %v4401_v57 = vld [vmem:[%s5792_s26 + $0xa8] sm:$0xff]  ;;  %v4403_v59 = vld [vmem:[%s5792_s26 + $0xb0] sm:$0xff] }
 0x4e7   : >> { %4400 = vst [vmem:[%s5788_s15 + $0xa0] sm:$0xff] %v4399_v56  ;;  %v4405_v4 = vld [vmem:[%s5792_s26 + $0xb8] sm:$0xff]  ;;  %4402 = vst [vmem:[%s5788_s15 + $0xa8] sm:$0xff] %v4401_v57  ;;  %v4407_v60 = vld [vmem:[%s5792_s26 + $0xc0] sm:$0xff] }
 0x4e8   : >> { %4404 = vst [vmem:[%s5788_s15 + $0xb0] sm:$0xff] %v4403_v59  ;;  %4406 = vst [vmem:[%s5788_s15 + $0xb8] sm:$0xff] %v4405_v4  ;;  %v4409_v61 = vld [vmem:[%s5792_s26 + $0xc8] sm:$0xff]  ;;  %v4411_v47 = vld [vmem:[%s5792_s26 + $0xd0] sm:$0xff] }
 0x4e9   : >> { %4408 = vst [vmem:[%s5788_s15 + $0xc0] sm:$0xff] %v4407_v60  ;;  %4410 = vst [vmem:[%s5788_s15 + $0xc8] sm:$0xff] %v4409_v61  ;;  %v4413_v63 = vld [vmem:[%s5792_s26 + $0xd8] sm:$0xff]  ;;  %v4415_v0 = vld [vmem:[%s5792_s26 + $0xe0] sm:$0xff] }
 0x4ea   : >> { %4412 = vst [vmem:[%s5788_s15 + $0xd0] sm:$0xff] %v4411_v47  ;;  %v4417_v1 = vld [vmem:[%s5792_s26 + $0xe8] sm:$0xff]  ;;  %4414 = vst [vmem:[%s5788_s15 + $0xd8] sm:$0xff] %v4413_v63  ;;  %v4419_v2 = vld [vmem:[%s5792_s26 + $0xf0] sm:$0xff] }
 0x4eb   : >> { %4416 = vst [vmem:[%s5788_s15 + $0xe0] sm:$0xff] %v4415_v0  ;;  %4418 = vst [vmem:[%s5788_s15 + $0xe8] sm:$0xff] %v4417_v1  ;;  %v4421_v5 = vld [vmem:[%s5792_s26 + $0xf8] sm:$0xff]  ;;  %v4423_v3 = vld [vmem:[%s5792_s26 + $0x380] sm:$0xff] }
 0x4ec   : >> { %4420 = vst [vmem:[%s5788_s15 + $0xf0] sm:$0xff] %v4419_v2  ;;  %4422 = vst [vmem:[%s5788_s15 + $0xf8] sm:$0xff] %v4421_v5  ;;  %v4425_v6 = vld [vmem:[%s5792_s26 + $0x388] sm:$0xff]  ;;  %v4427_v7 = vld [vmem:[%s5792_s26 + $0x390] sm:$0xff] }
 0x4ed   : >> { %4424 = vst [vmem:[%s5788_s15 + $0x3e8] sm:$0xff] %v4423_v3  ;;  %v4429_v36 = vld [vmem:[%s5792_s26 + $0x398] sm:$0xff]  ;;  %4426 = vst [vmem:[%s5788_s15 + $0x3f0] sm:$0xff] %v4425_v6  ;;  %v4431_v8 = vld [vmem:[%s5792_s26 + $0x3a0] sm:$0xff] }
 0x4ee   : >> { %4428 = vst [vmem:[%s5788_s15 + $0x3f8] sm:$0xff] %v4427_v7  ;;  %4430 = vst [vmem:[%s5788_s15 + $0x400] sm:$0xff] %v4429_v36  ;;  %v4433_v9 = vld [vmem:[%s5792_s26 + $0x3a8] sm:$0xff]  ;;  %v4435_v11 = vld [vmem:[%s5792_s26 + $0x3b0] sm:$0xff] }
 0x4ef   : >> { %4432 = vst [vmem:[%s5788_s15 + $0x408] sm:$0xff] %v4431_v8  ;;  %4434 = vst [vmem:[%s5788_s15 + $0x410] sm:$0xff] %v4433_v9  ;;  %v4437_v10 = vld [vmem:[%s5792_s26 + $0x3b8] sm:$0xff]  ;;  %v4439_v12 = vld [vmem:[%s5792_s26 + $0x3c0] sm:$0xff] }
 0x4f0   : >> { %4436 = vst [vmem:[%s5788_s15 + $0x418] sm:$0xff] %v4435_v11  ;;  %v4441_v13 = vld [vmem:[%s5792_s26 + $0x3c8] sm:$0xff]  ;;  %4438 = vst [vmem:[%s5788_s15 + $0x420] sm:$0xff] %v4437_v10  ;;  %v4443_v15 = vld [vmem:[%s5792_s26 + $0x3d0] sm:$0xff] }
 0x4f1   : >> { %4440 = vst [vmem:[%s5788_s15 + $0x428] sm:$0xff] %v4439_v12  ;;  %4442 = vst [vmem:[%s5788_s15 + $0x430] sm:$0xff] %v4441_v13  ;;  %v4445_v16 = vld [vmem:[%s5792_s26 + $0x3d8] sm:$0xff]  ;;  %v4447_v45 = vld [vmem:[%s5792_s26 + $0x3e0] sm:$0xff] }
 0x4f2   : >> { %4444 = vst [vmem:[%s5788_s15 + $0x438] sm:$0xff] %v4443_v15  ;;  %4446 = vst [vmem:[%s5788_s15 + $0x440] sm:$0xff] %v4445_v16  ;;  %v4449_v17 = vld [vmem:[%s5792_s26 + $0x3e8] sm:$0xff]  ;;  %v4451_v18 = vld [vmem:[%s5792_s26 + $0x3f0] sm:$0xff] }
 0x4f3   : >> { %4448 = vst [vmem:[%s5788_s15 + $0x448] sm:$0xff] %v4447_v45  ;;  %v4453_v14 = vld [vmem:[%s5792_s26 + $0x3f8] sm:$0xff]  ;;  %4450 = vst [vmem:[%s5788_s15 + $0x450] sm:$0xff] %v4449_v17  ;;  %v4455_v19 = vld [vmem:[%s5792_s26 + $0x400] sm:$0xff] }
 0x4f4   : >> { %4452 = vst [vmem:[%s5788_s15 + $0x458] sm:$0xff] %v4451_v18  ;;  %4454 = vst [vmem:[%s5788_s15 + $0x460] sm:$0xff] %v4453_v14  ;;  %v4457_v22 = vld [vmem:[%s5792_s26 + $0x408] sm:$0xff]  ;;  %v4459_v23 = vld [vmem:[%s5792_s26 + $0x410] sm:$0xff] }
 0x4f5   : >> { %4456 = vst [vmem:[%s5788_s15 + $0x468] sm:$0xff] %v4455_v19  ;;  %4458 = vst [vmem:[%s5788_s15 + $0x470] sm:$0xff] %v4457_v22  ;;  %v4461_v24 = vld [vmem:[%s5792_s26 + $0x418] sm:$0xff]  ;;  %v4463_v25 = vld [vmem:[%s5792_s26 + $0x420] sm:$0xff] }
 0x4f6   : >> { %4460 = vst [vmem:[%s5788_s15 + $0x478] sm:$0xff] %v4459_v23  ;;  %v4465_v52 = vld [vmem:[%s5792_s26 + $0x428] sm:$0xff]  ;;  %4462 = vst [vmem:[%s5788_s15 + $0x480] sm:$0xff] %v4461_v24  ;;  %v4467_v26 = vld [vmem:[%s5792_s26 + $0x430] sm:$0xff]  ;;  %4355 = sbr.rel (!%p4352_p4) target bundleno = 1244 (0x4dc), region = 143 }
 0x4f7   : >> { %4464 = vst [vmem:[%s5788_s15 + $0x488] sm:$0xff] %v4463_v25  ;;  %4466 = vst [vmem:[%s5788_s15 + $0x490] sm:$0xff] %v4465_v52  ;;  %v4469_v20 = vld [vmem:[%s5792_s26 + $0x438] sm:$0xff]  ;;  %v4471_v27 = vld [vmem:[%s5792_s26 + $0x440] sm:$0xff] }
 0x4f8   : >> { %4468 = vst [vmem:[%s5788_s15 + $0x498] sm:$0xff] %v4467_v26  ;;  %4470 = vst [vmem:[%s5788_s15 + $0x4a0] sm:$0xff] %v4469_v20  ;;  %v4473_v28 = vld [vmem:[%s5792_s26 + $0x448] sm:$0xff]  ;;  %v4475_v29 = vld [vmem:[%s5792_s26 + $0x450] sm:$0xff] }
 0x4f9   : >> { %4472 = vst [vmem:[%s5788_s15 + $0x4a8] sm:$0xff] %v4471_v27  ;;  %v4477_v30 = vld [vmem:[%s5792_s26 + $0x458] sm:$0xff]  ;;  %4474 = vst [vmem:[%s5788_s15 + $0x4b0] sm:$0xff] %v4473_v28  ;;  %v4479_v31 = vld [vmem:[%s5792_s26 + $0x460] sm:$0xff] }
 0x4fa   : >> { %4476 = vst [vmem:[%s5788_s15 + $0x4b8] sm:$0xff] %v4475_v29  ;;  %4478 = vst [vmem:[%s5788_s15 + $0x4c0] sm:$0xff] %v4477_v30  ;;  %v4481_v32 = vld [vmem:[%s5792_s26 + $0x468] sm:$0xff]  ;;  %v4483_v53 = vld [vmem:[%s5792_s26 + $0x470] sm:$0xff] }
 0x4fb   : >> { %4480 = vst [vmem:[%s5788_s15 + $0x4c8] sm:$0xff] %v4479_v31  ;;  %4482 = vst [vmem:[%s5788_s15 + $0x4d0] sm:$0xff] %v4481_v32  ;;  %v4485_v33 = vld [vmem:[%s5792_s26 + $0x478] sm:$0xff]  ;;  %s7314_s26 = smov %s7154_s23 }
 0x4fc   : >> { %4484 = vst [vmem:[%s5788_s15 + $0x4d8] sm:$0xff] %v4483_v53  ;;  %4486 = vst [vmem:[%s5788_s15 + $0x4e0] sm:$0xff] %v4485_v33  ;;  %s7313_s15 = smov %s7157_s24 }
 0x4fd PF: > { %s7262_s27 = sand.u32 31, %s7326_s5   ;;  %s4817_s8 = sshll.u32 %s7087_s11, 8 }
 0x4fe   : > { %s7266_s9 = scalar_lea.vmem %s6484_s4, %s4817_s8 [#allocation6]   ;;  %s4500_s12 = scalar_lea.vmem %s7081_s21, %s4817_s8  }
 0x4ff   : > { %p4808_p3 = scmp.le.s32.totalorder %s7262_s27, 0 }
 0x500   : > { %s5802_s28 = smov (!%p4808_p3), %s4500_s12   ;;  %s5806_s6 = smov (!%p4808_p3), %s7266_s9  }
 0x501   : > { %4615 = sbr.rel (%p4808_p3) target bundleno = 1298 (0x512), region = 148  ;;  %s5810_s30 = smov (!%p4808_p3), 0  }
 0x502   : > { %s5814_s29 = smov (!%p4808_p3), 0  }
 0x508 LB: >> { %v4510_v21 = vld [vmem:[%s5808_s6] sm:$0xff]  ;;  %s4514_s4 = sadd.s32 1, %s5812_s30  ;;  %s4504_s29 = sadd.s32 1, %s5816_s29   ;;  %s5816_s29 = sphi %s5814_s29, %s4504_s29   ;;  %s5812_s30 = sphi %s5810_s30, %s5811_s30   ;;  %s5808_s6 = sphi %s5806_s6, %s4519_s6   ;;  %s5804_s28 = sphi %s5802_s28, %s4520_s28  }
 0x509   : >> { %v4512_v34 = vld [vmem:[%s5808_s6 + $0x380] sm:$0xff]  ;;  %4511 = vst [vmem:[%s5804_s28] sm:$0xff] %v4510_v21  ;;  %p4515_p8 = scmp.ge.s32.totalorder %s4514_s4, %s7262_s27  ;;  %p4503_p10 = scmp.ge.s32.totalorder %s4504_s29, %s7262_s27 }
 0x50a   : >> { %4513 = vst [vmem:[%s5804_s28 + $0x3e8] sm:$0xff] %v4512_v34 }
 0x50b   : >> { %s7330_s4 = smov (%p4515_p8, %s4514_s4), 0  ;;  %4506 = sbr.rel (!%p4503_p10) target bundleno = 1288 (0x508), region = 154 }
 0x50c   : >> { %s4809_s5 = sshll.u32 %s7330_s4, 3  ;;  %s5811_s30 = smov %s7330_s4  }
 0x50d   : >> { %s4519_s6 = scalar_lea.vmem %s7266_s9, %s4809_s5 [#allocation6]   ;;  %s4520_s28 = scalar_lea.vmem %s4500_s12, %s4809_s5  }
 0x512 PF: > { %s17_s17 = sadd.s32 1, %s5784_s17   ;;  %s7316_s12 = smov %s5768_s13 }
 0x513   : > { %p14_p0 = scmp.ge.s32.totalorder %s17_s17, 4   ;;  %s7317_s13 = smov %s5772_s14 }
 0x514   : > { %s7318_s14 = smov %s5900_s25  ;;  %s7319_s15 = smov %s5780_s16 }
 0x515   : > { %s7320_s16 = smov %s7322_s19  ;;  %16 = sbr.rel (!%p14_p0) target bundleno = 5 (0x5), region = 165 }
 0x51c   :  { %4536 = vsyncpa [#allocation3], 1 }
 0x51d   :  { %4538 = vsyncpa [#allocation3 + $0x1], 1 }
 0x51e   :  { %4539 = vsyncpa [#allocation5], 1 }
 0x51f   :  { %4541 = vsyncpa [#allocation5 + $0x1], 1 }

</bundles_post_ra>
